<compile_context>
chip_gen: v7x
topology: tpu7x:2x2x1
jax: 0.10.0
libtpu: 0.0.40
codegen_flags: <defaults>
</compile_context>

<pallas_src>
import functools

import jax
import jax.numpy as jnp
from jax import lax
from jax.experimental import pallas as pl
from jax.experimental.pallas import tpu as pltpu

USE_BF16_MATMUL = True               # bf16 MXU operands, f32 accumulation (v5e/v6e/v7x)
_VMEM_BUDGET = 24 * 1024 * 1024      # stay inside v7x's 32 MiB scoped VMEM default


# ----------------------------- Pallas kernels ------------------------------

def _conv_bn_lrelu_kernel(x_ref, w_ref, b_ref, g_ref, bt_ref, o_ref, y_scr,
                          *, eps, slope):
    """Fused layer: conv-as-matmul + bias + BatchNorm (training-mode batch stats,
    biased variance) + LeakyReLU.

    x_ref : (N, K, M)   im2col patches (K = Cin*16, M = Ho*Wo), taps channel-major
    w_ref : (Cout, K)   conv weight = w_oihw.reshape(Cout, Cin*16)
    b_ref, g_ref, bt_ref : (Cout, 1) f32   conv bias / BN gamma / BN beta
    o_ref : (N, Cout, M)
    y_scr : VMEM (N, Cout, M) f32 pre-BN conv outputs
    """
    n_b = x_ref.shape[0]
    m = x_ref.shape[2]
    w = w_ref[...]
    bias = b_ref[...]

    # Pass 1: per-image MXU matmul (lane dim = spatial -> dense stores) + channel sums.
    s = jnp.zeros(bias.shape, jnp.float32)
    for n in range(n_b):                                  # static batch, unrolled
        y_n = jnp.dot(w, x_ref[n], preferred_element_type=jnp.float32) + bias
        y_scr[n] = y_n
        s = s + jnp.sum(y_n, axis=1, keepdims=True)
    cnt = float(n_b * m)
    mean = s * (1.0 / cnt)                                # (Cout, 1)

    # Pass 2: centered sum of squares (avoids E[y^2]-E[y]^2 cancellation).
    sq = jnp.zeros(bias.shape, jnp.float32)
    for n in range(n_b):
        d = y_scr[n] - mean
        sq = sq + jnp.sum(d * d, axis=1, keepdims=True)
    var = sq * (1.0 / cnt)                                # biased variance (training BN)

    inv = lax.rsqrt(var + eps)
    scale = g_ref[...] * inv                              # (Cout, 1)
    shift = bt_ref[...] - mean * scale

    # Pass 3: BN affine + LeakyReLU in f32, cast on store.
    for n in range(n_b):
        z = y_scr[n] * scale + shift
        o_ref[n] = jnp.where(z >= 0.0, z, slope * z).astype(o_ref.dtype)


def _head_kernel(x_ref, w1_ref, b1_ref, w2_ref, b2_ref, o_ref):
    """Fused fc1 (mu) + classifier: out = (x @ W1 + b1) @ W2 + b2; latent stays in VMEM."""
    mu = jnp.dot(x_ref[...], w1_ref[...], preferred_element_type=jnp.float32)
    mu = mu + b1_ref[...]
    y = jnp.dot(mu.astype(w2_ref.dtype), w2_ref[...],
                preferred_element_type=jnp.float32) + b2_ref[...]
    o_ref[...] = y.astype(o_ref.dtype)


# -------------------------- layer-level wrappers ---------------------------

def conv_bn_lrelu(x_nchw, w_oihw, bias, gamma, beta, *, eps=1e-5, slope=0.2):
    """Conv2d(4,2,1) + BatchNorm2d (training mode) + LeakyReLU(0.2), NCHW in/out."""
    N, Cin, H, W = x_nchw.shape
    Cout = w_oihw.shape[0]
    Ho, Wo = H // 2, W // 2
    M = Ho * Wo
    K = Cin * 16
    dt = jnp.bfloat16 if USE_BF16_MATMUL else jnp.float32

    # ONE XLA op for im2col; patches[n, c*16 + a*4 + b, i, j] = x_pad[n, c, 2i+a, 2j+b],
    # so the matching weight matrix is simply w_oihw.reshape(Cout, Cin*16).
    # Cast BEFORE patch extraction so the inflated patch tensor is bf16 in HBM.
    patches = lax.conv_general_dilated_patches(
        x_nchw.astype(dt), (4, 4), (2, 2), [(1, 1), (1, 1)])        # (N, K, Ho, Wo)
    X = patches.reshape(N, K, M)
    Wm = w_oihw.reshape(Cout, K).astype(dt)

    itm = jnp.dtype(dt).itemsize
    est = 2 * (X.size * itm + Wm.size * itm + N * Cout * M * itm) + N * Cout * M * 4
    assert est < _VMEM_BUDGET, (
        f"single-block conv layer needs ~{est} B of VMEM; switch to an M-tiled grid")

    out = pl.pallas_call(
        functools.partial(_conv_bn_lrelu_kernel, eps=eps, slope=slope),
        out_shape=jax.ShapeDtypeStruct((N, Cout, M), dt),
        grid=(1,),
        in_specs=[pl.BlockSpec((N, K, M), lambda i: (0, 0, 0)),
                  pl.BlockSpec((Cout, K), lambda i: (0, 0)),
                  pl.BlockSpec((Cout, 1), lambda i: (0, 0)),
                  pl.BlockSpec((Cout, 1), lambda i: (0, 0)),
                  pl.BlockSpec((Cout, 1), lambda i: (0, 0))],
        out_specs=pl.BlockSpec((N, Cout, M), lambda i: (0, 0, 0)),
        scratch_shapes=[pltpu.VMEM((N, Cout, M), jnp.float32)],
    )(X, Wm,
      bias.reshape(Cout, 1).astype(jnp.float32),
      gamma.reshape(Cout, 1).astype(jnp.float32),
      beta.reshape(Cout, 1).astype(jnp.float32))
    return out.reshape(N, Cout, Ho, Wo)


def pallas_head(h, w1, b1, w2, b2):
    """h: (B, F); w1: (F, L); b1: (1, L); w2: (L, O); b2: (1, O) -> logits (B, O) f32."""
    B, F = h.shape
    L = w1.shape[1]
    O = w2.shape[1]
    dt = jnp.bfloat16 if USE_BF16_MATMUL else jnp.float32
    return pl.pallas_call(
        _head_kernel,
        out_shape=jax.ShapeDtypeStruct((B, O), jnp.float32),
        grid=(1,),
        in_specs=[pl.BlockSpec((B, F), lambda i: (0, 0)),
                  pl.BlockSpec((F, L), lambda i: (0, 0)),
                  pl.BlockSpec((1, L), lambda i: (0, 0)),
                  pl.BlockSpec((L, O), lambda i: (0, 0)),
                  pl.BlockSpec((1, O), lambda i: (0, 0))],
        out_specs=pl.BlockSpec((B, O), lambda i: (0, 0)),
    )(h.astype(dt), w1.astype(dt), b1.astype(jnp.float32),
      w2.astype(dt), b2.astype(jnp.float32))


def image_classifier_forward(x_nchw, params):
    """x: (B, nc, 64, 64) -> logits (B, nout), matching ImageClassifier.forward."""
    x = x_nchw
    for li in range(5):
        x = conv_bn_lrelu(x, params[f"w_conv{li}"], params[f"b_conv{li}"],
                          params[f"gamma{li}"], params[f"beta{li}"])
    B = x.shape[0]
    # torch does h.view(-1, ndf*8*2*2) on NCHW; x is already NCHW -> plain reshape.
    h = x.reshape(B, -1)
    # Fused fc1 (mu) + classifier; logvar / fc2 is discarded by forward, never computed.
    return pallas_head(h,
                       params["w_fc1"].T, params["b_fc1"].reshape(1, -1),
                       params["w_cls"].T, params["b_cls"].reshape(1, -1))


# ------------------------------- parameters --------------------------------

def init_params(key, nc, ndf, latent, nout):
    ks = jax.random.split(key, 32)
    p = {}
    chans = [nc, ndf, ndf * 2, ndf * 4, ndf * 8, ndf * 8]
    k = 0
    for li in range(5):
        cin, cout = chans[li], chans[li + 1]
        p[f"w_conv{li}"] = 0.05 * jax.random.normal(ks[k], (cout, cin, 4, 4), jnp.float32); k += 1
        p[f"b_conv{li}"] = 0.05 * jax.random.normal(ks[k], (cout,), jnp.float32); k += 1
        p[f"gamma{li}"] = 1.0 + 0.1 * jax.random.normal(ks[k], (cout,), jnp.float32); k += 1
        p[f"beta{li}"] = 0.1 * jax.random.normal(ks[k], (cout,), jnp.float32); k += 1
    feat = ndf * 8 * 2 * 2
    p["w_fc1"] = 0.05 * jax.random.normal(ks[k], (latent, feat), jnp.float32); k += 1  # torch (out, in)
    p["b_fc1"] = 0.05 * jax.random.normal(ks[k], (latent,), jnp.float32); k += 1
    p["w_cls"] = 0.05 * jax.random.normal(ks[k], (nout, latent), jnp.float32); k += 1  # torch (out, in)
    p["b_cls"] = 0.05 * jax.random.normal(ks[k], (nout,), jnp.float32); k += 1
    return p


# ---------------------------------- main ------------------------------------

if __name__ == "__main__":
    nc, ndf, latent, nout = 3, 8, 32, 2     # small synthetic config
    batch, H, W = 2, 64, 64                 # encoder expects 64x64 -> 2x2 bottleneck

    key = jax.random.PRNGKey(0)
    kp, kx = jax.random.split(key)
    params = init_params(kp, nc, ndf, latent, nout)
    x = jax.random.normal(kx, (batch, nc, H, W), jnp.float32)

    fwd = jax.jit(image_classifier_forward)
    out = jax.block_until_ready(fwd(x, params))

    assert out.shape == (batch, nout), out.shape
    assert bool(jnp.all(jnp.isfinite(out)))
    print("KERNEL_OK")
</pallas_src>

<mosaic_0001>
module attributes {stable_mosaic.version = 11 : i64} {
  func.func @_conv_bn_lrelu_kernel(%arg0: i32, %arg1: memref<2x48x1024xbf16, #tpu.memory_space<vmem>>, %arg2: memref<8x48xbf16, #tpu.memory_space<vmem>>, %arg3: memref<8x1xf32, #tpu.memory_space<vmem>>, %arg4: memref<8x1xf32, #tpu.memory_space<vmem>>, %arg5: memref<8x1xf32, #tpu.memory_space<vmem>>, %arg6: memref<2x8x1024xbf16, #tpu.memory_space<vmem>>, %arg7: memref<2x8x1024xf32, #tpu.memory_space<vmem>>) attributes {dimension_semantics = [#tpu.dimension_semantics<arbitrary>], iteration_bounds = array<i64: 1>, scalar_prefetch = 0 : i64, scratch_operands = 1 : i64, tpu.core_type = #tpu.core_type<tc>, window_params = [{pipeline_mode = #tpu.pipeline_mode<synchronous>, transform_indices = @transform_0, window_bounds = array<i64: 2, 48, 1024>}, {pipeline_mode = #tpu.pipeline_mode<synchronous>, transform_indices = @transform_1, window_bounds = array<i64: 8, 48>}, {pipeline_mode = #tpu.pipeline_mode<synchronous>, transform_indices = @transform_2, window_bounds = array<i64: 8, 1>}, {pipeline_mode = #tpu.pipeline_mode<synchronous>, transform_indices = @transform_3, window_bounds = array<i64: 8, 1>}, {pipeline_mode = #tpu.pipeline_mode<synchronous>, transform_indices = @transform_4, window_bounds = array<i64: 8, 1>}, {pipeline_mode = #tpu.pipeline_mode<synchronous>, transform_indices = @transform_5, window_bounds = array<i64: 2, 8, 1024>}]} {
    %c0 = arith.constant 0 : index
    %c0_0 = arith.constant 0 : index
    %0 = vector.load %arg2[%c0, %c0_0] : memref<8x48xbf16, #tpu.memory_space<vmem>>, vector<8x48xbf16>
    %c0_1 = arith.constant 0 : index
    %c0_2 = arith.constant 0 : index
    %1 = vector.load %arg3[%c0_1, %c0_2] : memref<8x1xf32, #tpu.memory_space<vmem>>, vector<8x1xf32>
    %cst = arith.constant 0.000000e+00 : f32
    %2 = vector.broadcast %cst : f32 to vector<8x1xf32>
    %c0_3 = arith.constant 0 : index
    %c0_4 = arith.constant 0 : index
    %c0_5 = arith.constant 0 : index
    %3 = vector.load %arg1[%c0_3, %c0_4, %c0_5] : memref<2x48x1024xbf16, #tpu.memory_space<vmem>>, vector<1x48x1024xbf16>
    %4 = vector.shape_cast %3 : vector<1x48x1024xbf16> to vector<48x1024xbf16>
    %cst_6 = arith.constant dense<0.000000e+00> : vector<8x1024xf32>
    %5 = tpu.matmul %0, %4, %cst_6 {dimension_numbers = #tpu.dot_dimension_numbers<[1], [0], [0], [1], [0, 0, 1, 1], [], []>} : vector<8x48xbf16>, vector<48x1024xbf16>, vector<8x1024xf32> -> vector<8x1024xf32>
    %6 = vector.broadcast %1 : vector<8x1xf32> to vector<8x1024xf32>
    %7 = arith.addf %5, %6 : vector<8x1024xf32>
    %c0_7 = arith.constant 0 : index
    %c0_8 = arith.constant 0 : index
    %c0_9 = arith.constant 0 : index
    %8 = vector.load %arg7[%c0_7, %c0_8, %c0_9] : memref<2x8x1024xf32, #tpu.memory_space<vmem>>, vector<1x8x1024xf32>
    %9 = vector.shape_cast %8 : vector<1x8x1024xf32> to vector<8x1024xf32>
    %10 = vector.shape_cast %7 : vector<8x1024xf32> to vector<1x8x1024xf32>
    tpu.vector_store %arg7[%c0_7, %c0_8, %c0_9], %10 {strides = array<i32>} : memref<2x8x1024xf32, #tpu.memory_space<vmem>>, vector<1x8x1024xf32>,
    %cst_10 = arith.constant dense<0.000000e+00> : vector<8xf32>
    %11 = vector.multi_reduction <add>, %7, %cst_10 [1] : vector<8x1024xf32> to vector<8xf32>
    %12 = vector.shape_cast %11 : vector<8xf32> to vector<8x1xf32>
    %13 = arith.addf %2, %12 : vector<8x1xf32>
    %c1 = arith.constant 1 : index
    %c0_11 = arith.constant 0 : index
    %c0_12 = arith.constant 0 : index
    %14 = vector.load %arg1[%c1, %c0_11, %c0_12] : memref<2x48x1024xbf16, #tpu.memory_space<vmem>>, vector<1x48x1024xbf16>
    %15 = vector.shape_cast %14 : vector<1x48x1024xbf16> to vector<48x1024xbf16>
    %cst_13 = arith.constant dense<0.000000e+00> : vector<8x1024xf32>
    %16 = tpu.matmul %0, %15, %cst_13 {dimension_numbers = #tpu.dot_dimension_numbers<[1], [0], [0], [1], [0, 0, 1, 1], [], []>} : vector<8x48xbf16>, vector<48x1024xbf16>, vector<8x1024xf32> -> vector<8x1024xf32>
    %17 = vector.broadcast %1 : vector<8x1xf32> to vector<8x1024xf32>
    %18 = arith.addf %16, %17 : vector<8x1024xf32>
    %c1_14 = arith.constant 1 : index
    %c0_15 = arith.constant 0 : index
    %c0_16 = arith.constant 0 : index
    %19 = vector.load %arg7[%c1_14, %c0_15, %c0_16] : memref<2x8x1024xf32, #tpu.memory_space<vmem>>, vector<1x8x1024xf32>
    %20 = vector.shape_cast %19 : vector<1x8x1024xf32> to vector<8x1024xf32>
    %21 = vector.shape_cast %18 : vector<8x1024xf32> to vector<1x8x1024xf32>
    tpu.vector_store %arg7[%c1_14, %c0_15, %c0_16], %21 {strides = array<i32>} : memref<2x8x1024xf32, #tpu.memory_space<vmem>>, vector<1x8x1024xf32>,
    %cst_17 = arith.constant dense<0.000000e+00> : vector<8xf32>
    %22 = vector.multi_reduction <add>, %18, %cst_17 [1] : vector<8x1024xf32> to vector<8xf32>
    %23 = vector.shape_cast %22 : vector<8xf32> to vector<8x1xf32>
    %24 = arith.addf %13, %23 : vector<8x1xf32>
    %cst_18 = arith.constant 4.8828125E-4 : f32
    %25 = vector.broadcast %cst_18 : f32 to vector<8x1xf32>
    %26 = arith.mulf %24, %25 : vector<8x1xf32>
    %cst_19 = arith.constant 0.000000e+00 : f32
    %27 = vector.broadcast %cst_19 : f32 to vector<8x1xf32>
    %c0_20 = arith.constant 0 : index
    %c0_21 = arith.constant 0 : index
    %c0_22 = arith.constant 0 : index
    %28 = vector.load %arg7[%c0_20, %c0_21, %c0_22] : memref<2x8x1024xf32, #tpu.memory_space<vmem>>, vector<1x8x1024xf32>
    %29 = vector.shape_cast %28 : vector<1x8x1024xf32> to vector<8x1024xf32>
    %30 = vector.broadcast %26 : vector<8x1xf32> to vector<8x1024xf32>
    %31 = arith.subf %29, %30 : vector<8x1024xf32>
    %32 = arith.mulf %31, %31 : vector<8x1024xf32>
    %cst_23 = arith.constant dense<0.000000e+00> : vector<8xf32>
    %33 = vector.multi_reduction <add>, %32, %cst_23 [1] : vector<8x1024xf32> to vector<8xf32>
    %34 = vector.shape_cast %33 : vector<8xf32> to vector<8x1xf32>
    %35 = arith.addf %27, %34 : vector<8x1xf32>
    %c1_24 = arith.constant 1 : index
    %c0_25 = arith.constant 0 : index
    %c0_26 = arith.constant 0 : index
    %36 = vector.load %arg7[%c1_24, %c0_25, %c0_26] : memref<2x8x1024xf32, #tpu.memory_space<vmem>>, vector<1x8x1024xf32>
    %37 = vector.shape_cast %36 : vector<1x8x1024xf32> to vector<8x1024xf32>
    %38 = vector.broadcast %26 : vector<8x1xf32> to vector<8x1024xf32>
    %39 = arith.subf %37, %38 : vector<8x1024xf32>
    %40 = arith.mulf %39, %39 : vector<8x1024xf32>
    %cst_27 = arith.constant dense<0.000000e+00> : vector<8xf32>
    %41 = vector.multi_reduction <add>, %40, %cst_27 [1] : vector<8x1024xf32> to vector<8xf32>
    %42 = vector.shape_cast %41 : vector<8xf32> to vector<8x1xf32>
    %43 = arith.addf %35, %42 : vector<8x1xf32>
    %cst_28 = arith.constant 4.8828125E-4 : f32
    %44 = vector.broadcast %cst_28 : f32 to vector<8x1xf32>
    %45 = arith.mulf %43, %44 : vector<8x1xf32>
    %cst_29 = arith.constant 9.99999974E-6 : f32
    %46 = vector.broadcast %cst_29 : f32 to vector<8x1xf32>
    %47 = arith.addf %45, %46 : vector<8x1xf32>
    %48 = math.rsqrt %47 : vector<8x1xf32>
    %c0_30 = arith.constant 0 : index
    %c0_31 = arith.constant 0 : index
    %49 = vector.load %arg4[%c0_30, %c0_31] : memref<8x1xf32, #tpu.memory_space<vmem>>, vector<8x1xf32>
    %50 = arith.mulf %49, %48 : vector<8x1xf32>
    %c0_32 = arith.constant 0 : index
    %c0_33 = arith.constant 0 : index
    %51 = vector.load %arg5[%c0_32, %c0_33] : memref<8x1xf32, #tpu.memory_space<vmem>>, vector<8x1xf32>
    %52 = arith.mulf %26, %50 : vector<8x1xf32>
    %53 = arith.subf %51, %52 : vector<8x1xf32>
    %c0_34 = arith.constant 0 : index
    %c0_35 = arith.constant 0 : index
    %c0_36 = arith.constant 0 : index
    %54 = vector.load %arg7[%c0_34, %c0_35, %c0_36] : memref<2x8x1024xf32, #tpu.memory_space<vmem>>, vector<1x8x1024xf32>
    %55 = vector.shape_cast %54 : vector<1x8x1024xf32> to vector<8x1024xf32>
    %56 = vector.broadcast %50 : vector<8x1xf32> to vector<8x1024xf32>
    %57 = arith.mulf %55, %56 : vector<8x1024xf32>
    %58 = vector.broadcast %53 : vector<8x1xf32> to vector<8x1024xf32>
    %59 = arith.addf %57, %58 : vector<8x1024xf32>
    %cst_37 = arith.constant 0.000000e+00 : f32
    %60 = vector.broadcast %cst_37 : f32 to vector<8x1024xf32>
    %61 = arith.cmpf oge, %59, %60 : vector<8x1024xf32>
    %cst_38 = arith.constant 2.000000e-01 : f32
    %62 = vector.broadcast %cst_38 : f32 to vector<8x1024xf32>
    %63 = arith.mulf %62, %59 : vector<8x1024xf32>
    %64 = arith.select %61, %59, %63 : vector<8x1024xi1>, vector<8x1024xf32>
    %65 = arith.truncf %64 : vector<8x1024xf32> to vector<8x1024xbf16>
    %c0_39 = arith.constant 0 : index
    %c0_40 = arith.constant 0 : index
    %c0_41 = arith.constant 0 : index
    %66 = vector.load %arg6[%c0_39, %c0_40, %c0_41] : memref<2x8x1024xbf16, #tpu.memory_space<vmem>>, vector<1x8x1024xbf16>
    %67 = vector.shape_cast %66 : vector<1x8x1024xbf16> to vector<8x1024xbf16>
    %68 = vector.shape_cast %65 : vector<8x1024xbf16> to vector<1x8x1024xbf16>
    tpu.vector_store %arg6[%c0_39, %c0_40, %c0_41], %68 {strides = array<i32>} : memref<2x8x1024xbf16, #tpu.memory_space<vmem>>, vector<1x8x1024xbf16>,
    %c1_42 = arith.constant 1 : index
    %c0_43 = arith.constant 0 : index
    %c0_44 = arith.constant 0 : index
    %69 = vector.load %arg7[%c1_42, %c0_43, %c0_44] : memref<2x8x1024xf32, #tpu.memory_space<vmem>>, vector<1x8x1024xf32>
    %70 = vector.shape_cast %69 : vector<1x8x1024xf32> to vector<8x1024xf32>
    %71 = vector.broadcast %50 : vector<8x1xf32> to vector<8x1024xf32>
    %72 = arith.mulf %70, %71 : vector<8x1024xf32>
    %73 = vector.broadcast %53 : vector<8x1xf32> to vector<8x1024xf32>
    %74 = arith.addf %72, %73 : vector<8x1024xf32>
    %cst_45 = arith.constant 0.000000e+00 : f32
    %75 = vector.broadcast %cst_45 : f32 to vector<8x1024xf32>
    %76 = arith.cmpf oge, %74, %75 : vector<8x1024xf32>
    %cst_46 = arith.constant 2.000000e-01 : f32
    %77 = vector.broadcast %cst_46 : f32 to vector<8x1024xf32>
    %78 = arith.mulf %77, %74 : vector<8x1024xf32>
    %79 = arith.select %76, %74, %78 : vector<8x1024xi1>, vector<8x1024xf32>
    %80 = arith.truncf %79 : vector<8x1024xf32> to vector<8x1024xbf16>
    %c1_47 = arith.constant 1 : index
    %c0_48 = arith.constant 0 : index
    %c0_49 = arith.constant 0 : index
    %81 = vector.load %arg6[%c1_47, %c0_48, %c0_49] : memref<2x8x1024xbf16, #tpu.memory_space<vmem>>, vector<1x8x1024xbf16>
    %82 = vector.shape_cast %81 : vector<1x8x1024xbf16> to vector<8x1024xbf16>
    %83 = vector.shape_cast %80 : vector<8x1024xbf16> to vector<1x8x1024xbf16>
    tpu.vector_store %arg6[%c1_47, %c0_48, %c0_49], %83 {strides = array<i32>} : memref<2x8x1024xbf16, #tpu.memory_space<vmem>>, vector<1x8x1024xbf16>,
    return
  }
  func.func @transform_0(%arg0: i32) -> (i32, i32, i32) {
    %c0_i32 = arith.constant 0 : i32
    %c0_i32_0 = arith.constant 0 : i32
    %c0_i32_1 = arith.constant 0 : i32
    %c0_i32_2 = arith.constant 0 : i32
    return %c0_i32, %c0_i32_0, %c0_i32_1 : i32, i32, i32
  }
  func.func @transform_1(%arg0: i32) -> (i32, i32) {
    %c0_i32 = arith.constant 0 : i32
    %c0_i32_0 = arith.constant 0 : i32
    %c0_i32_1 = arith.constant 0 : i32
    return %c0_i32, %c0_i32_0 : i32, i32
  }
  func.func @transform_2(%arg0: i32) -> (i32, i32) {
    %c0_i32 = arith.constant 0 : i32
    %c0_i32_0 = arith.constant 0 : i32
    %c0_i32_1 = arith.constant 0 : i32
    return %c0_i32, %c0_i32_0 : i32, i32
  }
  func.func @transform_3(%arg0: i32) -> (i32, i32) {
    %c0_i32 = arith.constant 0 : i32
    %c0_i32_0 = arith.constant 0 : i32
    %c0_i32_1 = arith.constant 0 : i32
    return %c0_i32, %c0_i32_0 : i32, i32
  }
  func.func @transform_4(%arg0: i32) -> (i32, i32) {
    %c0_i32 = arith.constant 0 : i32
    %c0_i32_0 = arith.constant 0 : i32
    %c0_i32_1 = arith.constant 0 : i32
    return %c0_i32, %c0_i32_0 : i32, i32
  }
  func.func @transform_5(%arg0: i32) -> (i32, i32, i32) {
    %c0_i32 = arith.constant 0 : i32
    %c0_i32_0 = arith.constant 0 : i32
    %c0_i32_1 = arith.constant 0 : i32
    %c0_i32_2 = arith.constant 0 : i32
    return %c0_i32, %c0_i32_0, %c0_i32_1 : i32, i32, i32
  }
}

module attributes {stable_mosaic.version = 11 : i64} {
  func.func @_conv_bn_lrelu_kernel(%arg0: i32, %arg1: memref<2x128x256xbf16, #tpu.memory_space<vmem>>, %arg2: memref<16x128xbf16, #tpu.memory_space<vmem>>, %arg3: memref<16x1xf32, #tpu.memory_space<vmem>>, %arg4: memref<16x1xf32, #tpu.memory_space<vmem>>, %arg5: memref<16x1xf32, #tpu.memory_space<vmem>>, %arg6: memref<2x16x256xbf16, #tpu.memory_space<vmem>>, %arg7: memref<2x16x256xf32, #tpu.memory_space<vmem>>) attributes {dimension_semantics = [#tpu.dimension_semantics<arbitrary>], iteration_bounds = array<i64: 1>, scalar_prefetch = 0 : i64, scratch_operands = 1 : i64, tpu.core_type = #tpu.core_type<tc>, window_params = [{pipeline_mode = #tpu.pipeline_mode<synchronous>, transform_indices = @transform_0, window_bounds = array<i64: 2, 128, 256>}, {pipeline_mode = #tpu.pipeline_mode<synchronous>, transform_indices = @transform_1, window_bounds = array<i64: 16, 128>}, {pipeline_mode = #tpu.pipeline_mode<synchronous>, transform_indices = @transform_2, window_bounds = array<i64: 16, 1>}, {pipeline_mode = #tpu.pipeline_mode<synchronous>, transform_indices = @transform_3, window_bounds = array<i64: 16, 1>}, {pipeline_mode = #tpu.pipeline_mode<synchronous>, transform_indices = @transform_4, window_bounds = array<i64: 16, 1>}, {pipeline_mode = #tpu.pipeline_mode<synchronous>, transform_indices = @transform_5, window_bounds = array<i64: 2, 16, 256>}]} {
    %c0 = arith.constant 0 : index
    %c0_0 = arith.constant 0 : index
    %0 = vector.load %arg2[%c0, %c0_0] : memref<16x128xbf16, #tpu.memory_space<vmem>>, vector<16x128xbf16>
    %c0_1 = arith.constant 0 : index
    %c0_2 = arith.constant 0 : index
    %1 = vector.load %arg3[%c0_1, %c0_2] : memref<16x1xf32, #tpu.memory_space<vmem>>, vector<16x1xf32>
    %cst = arith.constant 0.000000e+00 : f32
    %2 = vector.broadcast %cst : f32 to vector<16x1xf32>
    %c0_3 = arith.constant 0 : index
    %c0_4 = arith.constant 0 : index
    %c0_5 = arith.constant 0 : index
    %3 = vector.load %arg1[%c0_3, %c0_4, %c0_5] : memref<2x128x256xbf16, #tpu.memory_space<vmem>>, vector<1x128x256xbf16>
    %4 = vector.shape_cast %3 : vector<1x128x256xbf16> to vector<128x256xbf16>
    %cst_6 = arith.constant dense<0.000000e+00> : vector<16x256xf32>
    %5 = tpu.matmul %0, %4, %cst_6 {dimension_numbers = #tpu.dot_dimension_numbers<[1], [0], [0], [1], [0, 0, 1, 1], [], []>} : vector<16x128xbf16>, vector<128x256xbf16>, vector<16x256xf32> -> vector<16x256xf32>
    %6 = vector.broadcast %1 : vector<16x1xf32> to vector<16x256xf32>
    %7 = arith.addf %5, %6 : vector<16x256xf32>
    %c0_7 = arith.constant 0 : index
    %c0_8 = arith.constant 0 : index
    %c0_9 = arith.constant 0 : index
    %8 = vector.load %arg7[%c0_7, %c0_8, %c0_9] : memref<2x16x256xf32, #tpu.memory_space<vmem>>, vector<1x16x256xf32>
    %9 = vector.shape_cast %8 : vector<1x16x256xf32> to vector<16x256xf32>
    %10 = vector.shape_cast %7 : vector<16x256xf32> to vector<1x16x256xf32>
    tpu.vector_store %arg7[%c0_7, %c0_8, %c0_9], %10 {strides = array<i32>} : memref<2x16x256xf32, #tpu.memory_space<vmem>>, vector<1x16x256xf32>,
    %cst_10 = arith.constant dense<0.000000e+00> : vector<16xf32>
    %11 = vector.multi_reduction <add>, %7, %cst_10 [1] : vector<16x256xf32> to vector<16xf32>
    %12 = vector.shape_cast %11 : vector<16xf32> to vector<16x1xf32>
    %13 = arith.addf %2, %12 : vector<16x1xf32>
    %c1 = arith.constant 1 : index
    %c0_11 = arith.constant 0 : index
    %c0_12 = arith.constant 0 : index
    %14 = vector.load %arg1[%c1, %c0_11, %c0_12] : memref<2x128x256xbf16, #tpu.memory_space<vmem>>, vector<1x128x256xbf16>
    %15 = vector.shape_cast %14 : vector<1x128x256xbf16> to vector<128x256xbf16>
    %cst_13 = arith.constant dense<0.000000e+00> : vector<16x256xf32>
    %16 = tpu.matmul %0, %15, %cst_13 {dimension_numbers = #tpu.dot_dimension_numbers<[1], [0], [0], [1], [0, 0, 1, 1], [], []>} : vector<16x128xbf16>, vector<128x256xbf16>, vector<16x256xf32> -> vector<16x256xf32>
    %17 = vector.broadcast %1 : vector<16x1xf32> to vector<16x256xf32>
    %18 = arith.addf %16, %17 : vector<16x256xf32>
    %c1_14 = arith.constant 1 : index
    %c0_15 = arith.constant 0 : index
    %c0_16 = arith.constant 0 : index
    %19 = vector.load %arg7[%c1_14, %c0_15, %c0_16] : memref<2x16x256xf32, #tpu.memory_space<vmem>>, vector<1x16x256xf32>
    %20 = vector.shape_cast %19 : vector<1x16x256xf32> to vector<16x256xf32>
    %21 = vector.shape_cast %18 : vector<16x256xf32> to vector<1x16x256xf32>
    tpu.vector_store %arg7[%c1_14, %c0_15, %c0_16], %21 {strides = array<i32>} : memref<2x16x256xf32, #tpu.memory_space<vmem>>, vector<1x16x256xf32>,
    %cst_17 = arith.constant dense<0.000000e+00> : vector<16xf32>
    %22 = vector.multi_reduction <add>, %18, %cst_17 [1] : vector<16x256xf32> to vector<16xf32>
    %23 = vector.shape_cast %22 : vector<16xf32> to vector<16x1xf32>
    %24 = arith.addf %13, %23 : vector<16x1xf32>
    %cst_18 = arith.constant 0.001953125 : f32
    %25 = vector.broadcast %cst_18 : f32 to vector<16x1xf32>
    %26 = arith.mulf %24, %25 : vector<16x1xf32>
    %cst_19 = arith.constant 0.000000e+00 : f32
    %27 = vector.broadcast %cst_19 : f32 to vector<16x1xf32>
    %c0_20 = arith.constant 0 : index
    %c0_21 = arith.constant 0 : index
    %c0_22 = arith.constant 0 : index
    %28 = vector.load %arg7[%c0_20, %c0_21, %c0_22] : memref<2x16x256xf32, #tpu.memory_space<vmem>>, vector<1x16x256xf32>
    %29 = vector.shape_cast %28 : vector<1x16x256xf32> to vector<16x256xf32>
    %30 = vector.broadcast %26 : vector<16x1xf32> to vector<16x256xf32>
    %31 = arith.subf %29, %30 : vector<16x256xf32>
    %32 = arith.mulf %31, %31 : vector<16x256xf32>
    %cst_23 = arith.constant dense<0.000000e+00> : vector<16xf32>
    %33 = vector.multi_reduction <add>, %32, %cst_23 [1] : vector<16x256xf32> to vector<16xf32>
    %34 = vector.shape_cast %33 : vector<16xf32> to vector<16x1xf32>
    %35 = arith.addf %27, %34 : vector<16x1xf32>
    %c1_24 = arith.constant 1 : index
    %c0_25 = arith.constant 0 : index
    %c0_26 = arith.constant 0 : index
    %36 = vector.load %arg7[%c1_24, %c0_25, %c0_26] : memref<2x16x256xf32, #tpu.memory_space<vmem>>, vector<1x16x256xf32>
    %37 = vector.shape_cast %36 : vector<1x16x256xf32> to vector<16x256xf32>
    %38 = vector.broadcast %26 : vector<16x1xf32> to vector<16x256xf32>
    %39 = arith.subf %37, %38 : vector<16x256xf32>
    %40 = arith.mulf %39, %39 : vector<16x256xf32>
    %cst_27 = arith.constant dense<0.000000e+00> : vector<16xf32>
    %41 = vector.multi_reduction <add>, %40, %cst_27 [1] : vector<16x256xf32> to vector<16xf32>
    %42 = vector.shape_cast %41 : vector<16xf32> to vector<16x1xf32>
    %43 = arith.addf %35, %42 : vector<16x1xf32>
    %cst_28 = arith.constant 0.001953125 : f32
    %44 = vector.broadcast %cst_28 : f32 to vector<16x1xf32>
    %45 = arith.mulf %43, %44 : vector<16x1xf32>
    %cst_29 = arith.constant 9.99999974E-6 : f32
    %46 = vector.broadcast %cst_29 : f32 to vector<16x1xf32>
    %47 = arith.addf %45, %46 : vector<16x1xf32>
    %48 = math.rsqrt %47 : vector<16x1xf32>
    %c0_30 = arith.constant 0 : index
    %c0_31 = arith.constant 0 : index
    %49 = vector.load %arg4[%c0_30, %c0_31] : memref<16x1xf32, #tpu.memory_space<vmem>>, vector<16x1xf32>
    %50 = arith.mulf %49, %48 : vector<16x1xf32>
    %c0_32 = arith.constant 0 : index
    %c0_33 = arith.constant 0 : index
    %51 = vector.load %arg5[%c0_32, %c0_33] : memref<16x1xf32, #tpu.memory_space<vmem>>, vector<16x1xf32>
    %52 = arith.mulf %26, %50 : vector<16x1xf32>
    %53 = arith.subf %51, %52 : vector<16x1xf32>
    %c0_34 = arith.constant 0 : index
    %c0_35 = arith.constant 0 : index
    %c0_36 = arith.constant 0 : index
    %54 = vector.load %arg7[%c0_34, %c0_35, %c0_36] : memref<2x16x256xf32, #tpu.memory_space<vmem>>, vector<1x16x256xf32>
    %55 = vector.shape_cast %54 : vector<1x16x256xf32> to vector<16x256xf32>
    %56 = vector.broadcast %50 : vector<16x1xf32> to vector<16x256xf32>
    %57 = arith.mulf %55, %56 : vector<16x256xf32>
    %58 = vector.broadcast %53 : vector<16x1xf32> to vector<16x256xf32>
    %59 = arith.addf %57, %58 : vector<16x256xf32>
    %cst_37 = arith.constant 0.000000e+00 : f32
    %60 = vector.broadcast %cst_37 : f32 to vector<16x256xf32>
    %61 = arith.cmpf oge, %59, %60 : vector<16x256xf32>
    %cst_38 = arith.constant 2.000000e-01 : f32
    %62 = vector.broadcast %cst_38 : f32 to vector<16x256xf32>
    %63 = arith.mulf %62, %59 : vector<16x256xf32>
    %64 = arith.select %61, %59, %63 : vector<16x256xi1>, vector<16x256xf32>
    %65 = arith.truncf %64 : vector<16x256xf32> to vector<16x256xbf16>
    %c0_39 = arith.constant 0 : index
    %c0_40 = arith.constant 0 : index
    %c0_41 = arith.constant 0 : index
    %66 = vector.load %arg6[%c0_39, %c0_40, %c0_41] : memref<2x16x256xbf16, #tpu.memory_space<vmem>>, vector<1x16x256xbf16>
    %67 = vector.shape_cast %66 : vector<1x16x256xbf16> to vector<16x256xbf16>
    %68 = vector.shape_cast %65 : vector<16x256xbf16> to vector<1x16x256xbf16>
    tpu.vector_store %arg6[%c0_39, %c0_40, %c0_41], %68 {strides = array<i32>} : memref<2x16x256xbf16, #tpu.memory_space<vmem>>, vector<1x16x256xbf16>,
    %c1_42 = arith.constant 1 : index
    %c0_43 = arith.constant 0 : index
    %c0_44 = arith.constant 0 : index
    %69 = vector.load %arg7[%c1_42, %c0_43, %c0_44] : memref<2x16x256xf32, #tpu.memory_space<vmem>>, vector<1x16x256xf32>
    %70 = vector.shape_cast %69 : vector<1x16x256xf32> to vector<16x256xf32>
    %71 = vector.broadcast %50 : vector<16x1xf32> to vector<16x256xf32>
    %72 = arith.mulf %70, %71 : vector<16x256xf32>
    %73 = vector.broadcast %53 : vector<16x1xf32> to vector<16x256xf32>
    %74 = arith.addf %72, %73 : vector<16x256xf32>
    %cst_45 = arith.constant 0.000000e+00 : f32
    %75 = vector.broadcast %cst_45 : f32 to vector<16x256xf32>
    %76 = arith.cmpf oge, %74, %75 : vector<16x256xf32>
    %cst_46 = arith.constant 2.000000e-01 : f32
    %77 = vector.broadcast %cst_46 : f32 to vector<16x256xf32>
    %78 = arith.mulf %77, %74 : vector<16x256xf32>
    %79 = arith.select %76, %74, %78 : vector<16x256xi1>, vector<16x256xf32>
    %80 = arith.truncf %79 : vector<16x256xf32> to vector<16x256xbf16>
    %c1_47 = arith.constant 1 : index
    %c0_48 = arith.constant 0 : index
    %c0_49 = arith.constant 0 : index
    %81 = vector.load %arg6[%c1_47, %c0_48, %c0_49] : memref<2x16x256xbf16, #tpu.memory_space<vmem>>, vector<1x16x256xbf16>
    %82 = vector.shape_cast %81 : vector<1x16x256xbf16> to vector<16x256xbf16>
    %83 = vector.shape_cast %80 : vector<16x256xbf16> to vector<1x16x256xbf16>
    tpu.vector_store %arg6[%c1_47, %c0_48, %c0_49], %83 {strides = array<i32>} : memref<2x16x256xbf16, #tpu.memory_space<vmem>>, vector<1x16x256xbf16>,
    return
  }
  func.func @transform_0(%arg0: i32) -> (i32, i32, i32) {
    %c0_i32 = arith.constant 0 : i32
    %c0_i32_0 = arith.constant 0 : i32
    %c0_i32_1 = arith.constant 0 : i32
    %c0_i32_2 = arith.constant 0 : i32
    return %c0_i32, %c0_i32_0, %c0_i32_1 : i32, i32, i32
  }
  func.func @transform_1(%arg0: i32) -> (i32, i32) {
    %c0_i32 = arith.constant 0 : i32
    %c0_i32_0 = arith.constant 0 : i32
    %c0_i32_1 = arith.constant 0 : i32
    return %c0_i32, %c0_i32_0 : i32, i32
  }
  func.func @transform_2(%arg0: i32) -> (i32, i32) {
    %c0_i32 = arith.constant 0 : i32
    %c0_i32_0 = arith.constant 0 : i32
    %c0_i32_1 = arith.constant 0 : i32
    return %c0_i32, %c0_i32_0 : i32, i32
  }
  func.func @transform_3(%arg0: i32) -> (i32, i32) {
    %c0_i32 = arith.constant 0 : i32
    %c0_i32_0 = arith.constant 0 : i32
    %c0_i32_1 = arith.constant 0 : i32
    return %c0_i32, %c0_i32_0 : i32, i32
  }
  func.func @transform_4(%arg0: i32) -> (i32, i32) {
    %c0_i32 = arith.constant 0 : i32
    %c0_i32_0 = arith.constant 0 : i32
    %c0_i32_1 = arith.constant 0 : i32
    return %c0_i32, %c0_i32_0 : i32, i32
  }
  func.func @transform_5(%arg0: i32) -> (i32, i32, i32) {
    %c0_i32 = arith.constant 0 : i32
    %c0_i32_0 = arith.constant 0 : i32
    %c0_i32_1 = arith.constant 0 : i32
    %c0_i32_2 = arith.constant 0 : i32
    return %c0_i32, %c0_i32_0, %c0_i32_1 : i32, i32, i32
  }
}

module attributes {stable_mosaic.version = 11 : i64} {
  func.func @_conv_bn_lrelu_kernel(%arg0: i32, %arg1: memref<2x256x64xbf16, #tpu.memory_space<vmem>>, %arg2: memref<32x256xbf16, #tpu.memory_space<vmem>>, %arg3: memref<32x1xf32, #tpu.memory_space<vmem>>, %arg4: memref<32x1xf32, #tpu.memory_space<vmem>>, %arg5: memref<32x1xf32, #tpu.memory_space<vmem>>, %arg6: memref<2x32x64xbf16, #tpu.memory_space<vmem>>, %arg7: memref<2x32x64xf32, #tpu.memory_space<vmem>>) attributes {dimension_semantics = [#tpu.dimension_semantics<arbitrary>], iteration_bounds = array<i64: 1>, scalar_prefetch = 0 : i64, scratch_operands = 1 : i64, tpu.core_type = #tpu.core_type<tc>, window_params = [{pipeline_mode = #tpu.pipeline_mode<synchronous>, transform_indices = @transform_0, window_bounds = array<i64: 2, 256, 64>}, {pipeline_mode = #tpu.pipeline_mode<synchronous>, transform_indices = @transform_1, window_bounds = array<i64: 32, 256>}, {pipeline_mode = #tpu.pipeline_mode<synchronous>, transform_indices = @transform_2, window_bounds = array<i64: 32, 1>}, {pipeline_mode = #tpu.pipeline_mode<synchronous>, transform_indices = @transform_3, window_bounds = array<i64: 32, 1>}, {pipeline_mode = #tpu.pipeline_mode<synchronous>, transform_indices = @transform_4, window_bounds = array<i64: 32, 1>}, {pipeline_mode = #tpu.pipeline_mode<synchronous>, transform_indices = @transform_5, window_bounds = array<i64: 2, 32, 64>}]} {
    %c0 = arith.constant 0 : index
    %c0_0 = arith.constant 0 : index
    %0 = vector.load %arg2[%c0, %c0_0] : memref<32x256xbf16, #tpu.memory_space<vmem>>, vector<32x256xbf16>
    %c0_1 = arith.constant 0 : index
    %c0_2 = arith.constant 0 : index
    %1 = vector.load %arg3[%c0_1, %c0_2] : memref<32x1xf32, #tpu.memory_space<vmem>>, vector<32x1xf32>
    %cst = arith.constant 0.000000e+00 : f32
    %2 = vector.broadcast %cst : f32 to vector<32x1xf32>
    %c0_3 = arith.constant 0 : index
    %c0_4 = arith.constant 0 : index
    %c0_5 = arith.constant 0 : index
    %3 = vector.load %arg1[%c0_3, %c0_4, %c0_5] : memref<2x256x64xbf16, #tpu.memory_space<vmem>>, vector<1x256x64xbf16>
    %4 = vector.shape_cast %3 : vector<1x256x64xbf16> to vector<256x64xbf16>
    %cst_6 = arith.constant dense<0.000000e+00> : vector<32x64xf32>
    %5 = tpu.matmul %0, %4, %cst_6 {dimension_numbers = #tpu.dot_dimension_numbers<[1], [0], [0], [1], [0, 0, 1, 1], [], []>} : vector<32x256xbf16>, vector<256x64xbf16>, vector<32x64xf32> -> vector<32x64xf32>
    %6 = vector.broadcast %1 : vector<32x1xf32> to vector<32x64xf32>
    %7 = arith.addf %5, %6 : vector<32x64xf32>
    %c0_7 = arith.constant 0 : index
    %c0_8 = arith.constant 0 : index
    %c0_9 = arith.constant 0 : index
    %8 = vector.load %arg7[%c0_7, %c0_8, %c0_9] : memref<2x32x64xf32, #tpu.memory_space<vmem>>, vector<1x32x64xf32>
    %9 = vector.shape_cast %8 : vector<1x32x64xf32> to vector<32x64xf32>
    %10 = vector.shape_cast %7 : vector<32x64xf32> to vector<1x32x64xf32>
    tpu.vector_store %arg7[%c0_7, %c0_8, %c0_9], %10 {strides = array<i32>} : memref<2x32x64xf32, #tpu.memory_space<vmem>>, vector<1x32x64xf32>,
    %cst_10 = arith.constant dense<0.000000e+00> : vector<32xf32>
    %11 = vector.multi_reduction <add>, %7, %cst_10 [1] : vector<32x64xf32> to vector<32xf32>
    %12 = vector.shape_cast %11 : vector<32xf32> to vector<32x1xf32>
    %13 = arith.addf %2, %12 : vector<32x1xf32>
    %c1 = arith.constant 1 : index
    %c0_11 = arith.constant 0 : index
    %c0_12 = arith.constant 0 : index
    %14 = vector.load %arg1[%c1, %c0_11, %c0_12] : memref<2x256x64xbf16, #tpu.memory_space<vmem>>, vector<1x256x64xbf16>
    %15 = vector.shape_cast %14 : vector<1x256x64xbf16> to vector<256x64xbf16>
    %cst_13 = arith.constant dense<0.000000e+00> : vector<32x64xf32>
    %16 = tpu.matmul %0, %15, %cst_13 {dimension_numbers = #tpu.dot_dimension_numbers<[1], [0], [0], [1], [0, 0, 1, 1], [], []>} : vector<32x256xbf16>, vector<256x64xbf16>, vector<32x64xf32> -> vector<32x64xf32>
    %17 = vector.broadcast %1 : vector<32x1xf32> to vector<32x64xf32>
    %18 = arith.addf %16, %17 : vector<32x64xf32>
    %c1_14 = arith.constant 1 : index
    %c0_15 = arith.constant 0 : index
    %c0_16 = arith.constant 0 : index
    %19 = vector.load %arg7[%c1_14, %c0_15, %c0_16] : memref<2x32x64xf32, #tpu.memory_space<vmem>>, vector<1x32x64xf32>
    %20 = vector.shape_cast %19 : vector<1x32x64xf32> to vector<32x64xf32>
    %21 = vector.shape_cast %18 : vector<32x64xf32> to vector<1x32x64xf32>
    tpu.vector_store %arg7[%c1_14, %c0_15, %c0_16], %21 {strides = array<i32>} : memref<2x32x64xf32, #tpu.memory_space<vmem>>, vector<1x32x64xf32>,
    %cst_17 = arith.constant dense<0.000000e+00> : vector<32xf32>
    %22 = vector.multi_reduction <add>, %18, %cst_17 [1] : vector<32x64xf32> to vector<32xf32>
    %23 = vector.shape_cast %22 : vector<32xf32> to vector<32x1xf32>
    %24 = arith.addf %13, %23 : vector<32x1xf32>
    %cst_18 = arith.constant 7.812500e-03 : f32
    %25 = vector.broadcast %cst_18 : f32 to vector<32x1xf32>
    %26 = arith.mulf %24, %25 : vector<32x1xf32>
    %cst_19 = arith.constant 0.000000e+00 : f32
    %27 = vector.broadcast %cst_19 : f32 to vector<32x1xf32>
    %c0_20 = arith.constant 0 : index
    %c0_21 = arith.constant 0 : index
    %c0_22 = arith.constant 0 : index
    %28 = vector.load %arg7[%c0_20, %c0_21, %c0_22] : memref<2x32x64xf32, #tpu.memory_space<vmem>>, vector<1x32x64xf32>
    %29 = vector.shape_cast %28 : vector<1x32x64xf32> to vector<32x64xf32>
    %30 = vector.broadcast %26 : vector<32x1xf32> to vector<32x64xf32>
    %31 = arith.subf %29, %30 : vector<32x64xf32>
    %32 = arith.mulf %31, %31 : vector<32x64xf32>
    %cst_23 = arith.constant dense<0.000000e+00> : vector<32xf32>
    %33 = vector.multi_reduction <add>, %32, %cst_23 [1] : vector<32x64xf32> to vector<32xf32>
    %34 = vector.shape_cast %33 : vector<32xf32> to vector<32x1xf32>
    %35 = arith.addf %27, %34 : vector<32x1xf32>
    %c1_24 = arith.constant 1 : index
    %c0_25 = arith.constant 0 : index
    %c0_26 = arith.constant 0 : index
    %36 = vector.load %arg7[%c1_24, %c0_25, %c0_26] : memref<2x32x64xf32, #tpu.memory_space<vmem>>, vector<1x32x64xf32>
    %37 = vector.shape_cast %36 : vector<1x32x64xf32> to vector<32x64xf32>
    %38 = vector.broadcast %26 : vector<32x1xf32> to vector<32x64xf32>
    %39 = arith.subf %37, %38 : vector<32x64xf32>
    %40 = arith.mulf %39, %39 : vector<32x64xf32>
    %cst_27 = arith.constant dense<0.000000e+00> : vector<32xf32>
    %41 = vector.multi_reduction <add>, %40, %cst_27 [1] : vector<32x64xf32> to vector<32xf32>
    %42 = vector.shape_cast %41 : vector<32xf32> to vector<32x1xf32>
    %43 = arith.addf %35, %42 : vector<32x1xf32>
    %cst_28 = arith.constant 7.812500e-03 : f32
    %44 = vector.broadcast %cst_28 : f32 to vector<32x1xf32>
    %45 = arith.mulf %43, %44 : vector<32x1xf32>
    %cst_29 = arith.constant 9.99999974E-6 : f32
    %46 = vector.broadcast %cst_29 : f32 to vector<32x1xf32>
    %47 = arith.addf %45, %46 : vector<32x1xf32>
    %48 = math.rsqrt %47 : vector<32x1xf32>
    %c0_30 = arith.constant 0 : index
    %c0_31 = arith.constant 0 : index
    %49 = vector.load %arg4[%c0_30, %c0_31] : memref<32x1xf32, #tpu.memory_space<vmem>>, vector<32x1xf32>
    %50 = arith.mulf %49, %48 : vector<32x1xf32>
    %c0_32 = arith.constant 0 : index
    %c0_33 = arith.constant 0 : index
    %51 = vector.load %arg5[%c0_32, %c0_33] : memref<32x1xf32, #tpu.memory_space<vmem>>, vector<32x1xf32>
    %52 = arith.mulf %26, %50 : vector<32x1xf32>
    %53 = arith.subf %51, %52 : vector<32x1xf32>
    %c0_34 = arith.constant 0 : index
    %c0_35 = arith.constant 0 : index
    %c0_36 = arith.constant 0 : index
    %54 = vector.load %arg7[%c0_34, %c0_35, %c0_36] : memref<2x32x64xf32, #tpu.memory_space<vmem>>, vector<1x32x64xf32>
    %55 = vector.shape_cast %54 : vector<1x32x64xf32> to vector<32x64xf32>
    %56 = vector.broadcast %50 : vector<32x1xf32> to vector<32x64xf32>
    %57 = arith.mulf %55, %56 : vector<32x64xf32>
    %58 = vector.broadcast %53 : vector<32x1xf32> to vector<32x64xf32>
    %59 = arith.addf %57, %58 : vector<32x64xf32>
    %cst_37 = arith.constant 0.000000e+00 : f32
    %60 = vector.broadcast %cst_37 : f32 to vector<32x64xf32>
    %61 = arith.cmpf oge, %59, %60 : vector<32x64xf32>
    %cst_38 = arith.constant 2.000000e-01 : f32
    %62 = vector.broadcast %cst_38 : f32 to vector<32x64xf32>
    %63 = arith.mulf %62, %59 : vector<32x64xf32>
    %64 = arith.select %61, %59, %63 : vector<32x64xi1>, vector<32x64xf32>
    %65 = arith.truncf %64 : vector<32x64xf32> to vector<32x64xbf16>
    %c0_39 = arith.constant 0 : index
    %c0_40 = arith.constant 0 : index
    %c0_41 = arith.constant 0 : index
    %66 = vector.load %arg6[%c0_39, %c0_40, %c0_41] : memref<2x32x64xbf16, #tpu.memory_space<vmem>>, vector<1x32x64xbf16>
    %67 = vector.shape_cast %66 : vector<1x32x64xbf16> to vector<32x64xbf16>
    %68 = vector.shape_cast %65 : vector<32x64xbf16> to vector<1x32x64xbf16>
    tpu.vector_store %arg6[%c0_39, %c0_40, %c0_41], %68 {strides = array<i32>} : memref<2x32x64xbf16, #tpu.memory_space<vmem>>, vector<1x32x64xbf16>,
    %c1_42 = arith.constant 1 : index
    %c0_43 = arith.constant 0 : index
    %c0_44 = arith.constant 0 : index
    %69 = vector.load %arg7[%c1_42, %c0_43, %c0_44] : memref<2x32x64xf32, #tpu.memory_space<vmem>>, vector<1x32x64xf32>
    %70 = vector.shape_cast %69 : vector<1x32x64xf32> to vector<32x64xf32>
    %71 = vector.broadcast %50 : vector<32x1xf32> to vector<32x64xf32>
    %72 = arith.mulf %70, %71 : vector<32x64xf32>
    %73 = vector.broadcast %53 : vector<32x1xf32> to vector<32x64xf32>
    %74 = arith.addf %72, %73 : vector<32x64xf32>
    %cst_45 = arith.constant 0.000000e+00 : f32
    %75 = vector.broadcast %cst_45 : f32 to vector<32x64xf32>
    %76 = arith.cmpf oge, %74, %75 : vector<32x64xf32>
    %cst_46 = arith.constant 2.000000e-01 : f32
    %77 = vector.broadcast %cst_46 : f32 to vector<32x64xf32>
    %78 = arith.mulf %77, %74 : vector<32x64xf32>
    %79 = arith.select %76, %74, %78 : vector<32x64xi1>, vector<32x64xf32>
    %80 = arith.truncf %79 : vector<32x64xf32> to vector<32x64xbf16>
    %c1_47 = arith.constant 1 : index
    %c0_48 = arith.constant 0 : index
    %c0_49 = arith.constant 0 : index
    %81 = vector.load %arg6[%c1_47, %c0_48, %c0_49] : memref<2x32x64xbf16, #tpu.memory_space<vmem>>, vector<1x32x64xbf16>
    %82 = vector.shape_cast %81 : vector<1x32x64xbf16> to vector<32x64xbf16>
    %83 = vector.shape_cast %80 : vector<32x64xbf16> to vector<1x32x64xbf16>
    tpu.vector_store %arg6[%c1_47, %c0_48, %c0_49], %83 {strides = array<i32>} : memref<2x32x64xbf16, #tpu.memory_space<vmem>>, vector<1x32x64xbf16>,
    return
  }
  func.func @transform_0(%arg0: i32) -> (i32, i32, i32) {
    %c0_i32 = arith.constant 0 : i32
    %c0_i32_0 = arith.constant 0 : i32
    %c0_i32_1 = arith.constant 0 : i32
    %c0_i32_2 = arith.constant 0 : i32
    return %c0_i32, %c0_i32_0, %c0_i32_1 : i32, i32, i32
  }
  func.func @transform_1(%arg0: i32) -> (i32, i32) {
    %c0_i32 = arith.constant 0 : i32
    %c0_i32_0 = arith.constant 0 : i32
    %c0_i32_1 = arith.constant 0 : i32
    return %c0_i32, %c0_i32_0 : i32, i32
  }
  func.func @transform_2(%arg0: i32) -> (i32, i32) {
    %c0_i32 = arith.constant 0 : i32
    %c0_i32_0 = arith.constant 0 : i32
    %c0_i32_1 = arith.constant 0 : i32
    return %c0_i32, %c0_i32_0 : i32, i32
  }
  func.func @transform_3(%arg0: i32) -> (i32, i32) {
    %c0_i32 = arith.constant 0 : i32
    %c0_i32_0 = arith.constant 0 : i32
    %c0_i32_1 = arith.constant 0 : i32
    return %c0_i32, %c0_i32_0 : i32, i32
  }
  func.func @transform_4(%arg0: i32) -> (i32, i32) {
    %c0_i32 = arith.constant 0 : i32
    %c0_i32_0 = arith.constant 0 : i32
    %c0_i32_1 = arith.constant 0 : i32
    return %c0_i32, %c0_i32_0 : i32, i32
  }
  func.func @transform_5(%arg0: i32) -> (i32, i32, i32) {
    %c0_i32 = arith.constant 0 : i32
    %c0_i32_0 = arith.constant 0 : i32
    %c0_i32_1 = arith.constant 0 : i32
    %c0_i32_2 = arith.constant 0 : i32
    return %c0_i32, %c0_i32_0, %c0_i32_1 : i32, i32, i32
  }
}

module attributes {stable_mosaic.version = 11 : i64} {
  func.func @_conv_bn_lrelu_kernel(%arg0: i32, %arg1: memref<2x512x16xbf16, #tpu.memory_space<vmem>>, %arg2: memref<64x512xbf16, #tpu.memory_space<vmem>>, %arg3: memref<64x1xf32, #tpu.memory_space<vmem>>, %arg4: memref<64x1xf32, #tpu.memory_space<vmem>>, %arg5: memref<64x1xf32, #tpu.memory_space<vmem>>, %arg6: memref<2x64x16xbf16, #tpu.memory_space<vmem>>, %arg7: memref<2x64x16xf32, #tpu.memory_space<vmem>>) attributes {dimension_semantics = [#tpu.dimension_semantics<arbitrary>], iteration_bounds = array<i64: 1>, scalar_prefetch = 0 : i64, scratch_operands = 1 : i64, tpu.core_type = #tpu.core_type<tc>, window_params = [{pipeline_mode = #tpu.pipeline_mode<synchronous>, transform_indices = @transform_0, window_bounds = array<i64: 2, 512, 16>}, {pipeline_mode = #tpu.pipeline_mode<synchronous>, transform_indices = @transform_1, window_bounds = array<i64: 64, 512>}, {pipeline_mode = #tpu.pipeline_mode<synchronous>, transform_indices = @transform_2, window_bounds = array<i64: 64, 1>}, {pipeline_mode = #tpu.pipeline_mode<synchronous>, transform_indices = @transform_3, window_bounds = array<i64: 64, 1>}, {pipeline_mode = #tpu.pipeline_mode<synchronous>, transform_indices = @transform_4, window_bounds = array<i64: 64, 1>}, {pipeline_mode = #tpu.pipeline_mode<synchronous>, transform_indices = @transform_5, window_bounds = array<i64: 2, 64, 16>}]} {
    %c0 = arith.constant 0 : index
    %c0_0 = arith.constant 0 : index
    %0 = vector.load %arg2[%c0, %c0_0] : memref<64x512xbf16, #tpu.memory_space<vmem>>, vector<64x512xbf16>
    %c0_1 = arith.constant 0 : index
    %c0_2 = arith.constant 0 : index
    %1 = vector.load %arg3[%c0_1, %c0_2] : memref<64x1xf32, #tpu.memory_space<vmem>>, vector<64x1xf32>
    %cst = arith.constant 0.000000e+00 : f32
    %2 = vector.broadcast %cst : f32 to vector<64x1xf32>
    %c0_3 = arith.constant 0 : index
    %c0_4 = arith.constant 0 : index
    %c0_5 = arith.constant 0 : index
    %3 = vector.load %arg1[%c0_3, %c0_4, %c0_5] : memref<2x512x16xbf16, #tpu.memory_space<vmem>>, vector<1x512x16xbf16>
    %4 = vector.shape_cast %3 : vector<1x512x16xbf16> to vector<512x16xbf16>
    %cst_6 = arith.constant dense<0.000000e+00> : vector<64x16xf32>
    %5 = tpu.matmul %0, %4, %cst_6 {dimension_numbers = #tpu.dot_dimension_numbers<[1], [0], [0], [1], [0, 0, 1, 1], [], []>} : vector<64x512xbf16>, vector<512x16xbf16>, vector<64x16xf32> -> vector<64x16xf32>
    %6 = vector.broadcast %1 : vector<64x1xf32> to vector<64x16xf32>
    %7 = arith.addf %5, %6 : vector<64x16xf32>
    %c0_7 = arith.constant 0 : index
    %c0_8 = arith.constant 0 : index
    %c0_9 = arith.constant 0 : index
    %8 = vector.load %arg7[%c0_7, %c0_8, %c0_9] : memref<2x64x16xf32, #tpu.memory_space<vmem>>, vector<1x64x16xf32>
    %9 = vector.shape_cast %8 : vector<1x64x16xf32> to vector<64x16xf32>
    %10 = vector.shape_cast %7 : vector<64x16xf32> to vector<1x64x16xf32>
    tpu.vector_store %arg7[%c0_7, %c0_8, %c0_9], %10 {strides = array<i32>} : memref<2x64x16xf32, #tpu.memory_space<vmem>>, vector<1x64x16xf32>,
    %cst_10 = arith.constant dense<0.000000e+00> : vector<64xf32>
    %11 = vector.multi_reduction <add>, %7, %cst_10 [1] : vector<64x16xf32> to vector<64xf32>
    %12 = vector.shape_cast %11 : vector<64xf32> to vector<64x1xf32>
    %13 = arith.addf %2, %12 : vector<64x1xf32>
    %c1 = arith.constant 1 : index
    %c0_11 = arith.constant 0 : index
    %c0_12 = arith.constant 0 : index
    %14 = vector.load %arg1[%c1, %c0_11, %c0_12] : memref<2x512x16xbf16, #tpu.memory_space<vmem>>, vector<1x512x16xbf16>
    %15 = vector.shape_cast %14 : vector<1x512x16xbf16> to vector<512x16xbf16>
    %cst_13 = arith.constant dense<0.000000e+00> : vector<64x16xf32>
    %16 = tpu.matmul %0, %15, %cst_13 {dimension_numbers = #tpu.dot_dimension_numbers<[1], [0], [0], [1], [0, 0, 1, 1], [], []>} : vector<64x512xbf16>, vector<512x16xbf16>, vector<64x16xf32> -> vector<64x16xf32>
    %17 = vector.broadcast %1 : vector<64x1xf32> to vector<64x16xf32>
    %18 = arith.addf %16, %17 : vector<64x16xf32>
    %c1_14 = arith.constant 1 : index
    %c0_15 = arith.constant 0 : index
    %c0_16 = arith.constant 0 : index
    %19 = vector.load %arg7[%c1_14, %c0_15, %c0_16] : memref<2x64x16xf32, #tpu.memory_space<vmem>>, vector<1x64x16xf32>
    %20 = vector.shape_cast %19 : vector<1x64x16xf32> to vector<64x16xf32>
    %21 = vector.shape_cast %18 : vector<64x16xf32> to vector<1x64x16xf32>
    tpu.vector_store %arg7[%c1_14, %c0_15, %c0_16], %21 {strides = array<i32>} : memref<2x64x16xf32, #tpu.memory_space<vmem>>, vector<1x64x16xf32>,
    %cst_17 = arith.constant dense<0.000000e+00> : vector<64xf32>
    %22 = vector.multi_reduction <add>, %18, %cst_17 [1] : vector<64x16xf32> to vector<64xf32>
    %23 = vector.shape_cast %22 : vector<64xf32> to vector<64x1xf32>
    %24 = arith.addf %13, %23 : vector<64x1xf32>
    %cst_18 = arith.constant 3.125000e-02 : f32
    %25 = vector.broadcast %cst_18 : f32 to vector<64x1xf32>
    %26 = arith.mulf %24, %25 : vector<64x1xf32>
    %cst_19 = arith.constant 0.000000e+00 : f32
    %27 = vector.broadcast %cst_19 : f32 to vector<64x1xf32>
    %c0_20 = arith.constant 0 : index
    %c0_21 = arith.constant 0 : index
    %c0_22 = arith.constant 0 : index
    %28 = vector.load %arg7[%c0_20, %c0_21, %c0_22] : memref<2x64x16xf32, #tpu.memory_space<vmem>>, vector<1x64x16xf32>
    %29 = vector.shape_cast %28 : vector<1x64x16xf32> to vector<64x16xf32>
    %30 = vector.broadcast %26 : vector<64x1xf32> to vector<64x16xf32>
    %31 = arith.subf %29, %30 : vector<64x16xf32>
    %32 = arith.mulf %31, %31 : vector<64x16xf32>
    %cst_23 = arith.constant dense<0.000000e+00> : vector<64xf32>
    %33 = vector.multi_reduction <add>, %32, %cst_23 [1] : vector<64x16xf32> to vector<64xf32>
    %34 = vector.shape_cast %33 : vector<64xf32> to vector<64x1xf32>
    %35 = arith.addf %27, %34 : vector<64x1xf32>
    %c1_24 = arith.constant 1 : index
    %c0_25 = arith.constant 0 : index
    %c0_26 = arith.constant 0 : index
    %36 = vector.load %arg7[%c1_24, %c0_25, %c0_26] : memref<2x64x16xf32, #tpu.memory_space<vmem>>, vector<1x64x16xf32>
    %37 = vector.shape_cast %36 : vector<1x64x16xf32> to vector<64x16xf32>
    %38 = vector.broadcast %26 : vector<64x1xf32> to vector<64x16xf32>
    %39 = arith.subf %37, %38 : vector<64x16xf32>
    %40 = arith.mulf %39, %39 : vector<64x16xf32>
    %cst_27 = arith.constant dense<0.000000e+00> : vector<64xf32>
    %41 = vector.multi_reduction <add>, %40, %cst_27 [1] : vector<64x16xf32> to vector<64xf32>
    %42 = vector.shape_cast %41 : vector<64xf32> to vector<64x1xf32>
    %43 = arith.addf %35, %42 : vector<64x1xf32>
    %cst_28 = arith.constant 3.125000e-02 : f32
    %44 = vector.broadcast %cst_28 : f32 to vector<64x1xf32>
    %45 = arith.mulf %43, %44 : vector<64x1xf32>
    %cst_29 = arith.constant 9.99999974E-6 : f32
    %46 = vector.broadcast %cst_29 : f32 to vector<64x1xf32>
    %47 = arith.addf %45, %46 : vector<64x1xf32>
    %48 = math.rsqrt %47 : vector<64x1xf32>
    %c0_30 = arith.constant 0 : index
    %c0_31 = arith.constant 0 : index
    %49 = vector.load %arg4[%c0_30, %c0_31] : memref<64x1xf32, #tpu.memory_space<vmem>>, vector<64x1xf32>
    %50 = arith.mulf %49, %48 : vector<64x1xf32>
    %c0_32 = arith.constant 0 : index
    %c0_33 = arith.constant 0 : index
    %51 = vector.load %arg5[%c0_32, %c0_33] : memref<64x1xf32, #tpu.memory_space<vmem>>, vector<64x1xf32>
    %52 = arith.mulf %26, %50 : vector<64x1xf32>
    %53 = arith.subf %51, %52 : vector<64x1xf32>
    %c0_34 = arith.constant 0 : index
    %c0_35 = arith.constant 0 : index
    %c0_36 = arith.constant 0 : index
    %54 = vector.load %arg7[%c0_34, %c0_35, %c0_36] : memref<2x64x16xf32, #tpu.memory_space<vmem>>, vector<1x64x16xf32>
    %55 = vector.shape_cast %54 : vector<1x64x16xf32> to vector<64x16xf32>
    %56 = vector.broadcast %50 : vector<64x1xf32> to vector<64x16xf32>
    %57 = arith.mulf %55, %56 : vector<64x16xf32>
    %58 = vector.broadcast %53 : vector<64x1xf32> to vector<64x16xf32>
    %59 = arith.addf %57, %58 : vector<64x16xf32>
    %cst_37 = arith.constant 0.000000e+00 : f32
    %60 = vector.broadcast %cst_37 : f32 to vector<64x16xf32>
    %61 = arith.cmpf oge, %59, %60 : vector<64x16xf32>
    %cst_38 = arith.constant 2.000000e-01 : f32
    %62 = vector.broadcast %cst_38 : f32 to vector<64x16xf32>
    %63 = arith.mulf %62, %59 : vector<64x16xf32>
    %64 = arith.select %61, %59, %63 : vector<64x16xi1>, vector<64x16xf32>
    %65 = arith.truncf %64 : vector<64x16xf32> to vector<64x16xbf16>
    %c0_39 = arith.constant 0 : index
    %c0_40 = arith.constant 0 : index
    %c0_41 = arith.constant 0 : index
    %66 = vector.load %arg6[%c0_39, %c0_40, %c0_41] : memref<2x64x16xbf16, #tpu.memory_space<vmem>>, vector<1x64x16xbf16>
    %67 = vector.shape_cast %66 : vector<1x64x16xbf16> to vector<64x16xbf16>
    %68 = vector.shape_cast %65 : vector<64x16xbf16> to vector<1x64x16xbf16>
    tpu.vector_store %arg6[%c0_39, %c0_40, %c0_41], %68 {strides = array<i32>} : memref<2x64x16xbf16, #tpu.memory_space<vmem>>, vector<1x64x16xbf16>,
    %c1_42 = arith.constant 1 : index
    %c0_43 = arith.constant 0 : index
    %c0_44 = arith.constant 0 : index
    %69 = vector.load %arg7[%c1_42, %c0_43, %c0_44] : memref<2x64x16xf32, #tpu.memory_space<vmem>>, vector<1x64x16xf32>
    %70 = vector.shape_cast %69 : vector<1x64x16xf32> to vector<64x16xf32>
    %71 = vector.broadcast %50 : vector<64x1xf32> to vector<64x16xf32>
    %72 = arith.mulf %70, %71 : vector<64x16xf32>
    %73 = vector.broadcast %53 : vector<64x1xf32> to vector<64x16xf32>
    %74 = arith.addf %72, %73 : vector<64x16xf32>
    %cst_45 = arith.constant 0.000000e+00 : f32
    %75 = vector.broadcast %cst_45 : f32 to vector<64x16xf32>
    %76 = arith.cmpf oge, %74, %75 : vector<64x16xf32>
    %cst_46 = arith.constant 2.000000e-01 : f32
    %77 = vector.broadcast %cst_46 : f32 to vector<64x16xf32>
    %78 = arith.mulf %77, %74 : vector<64x16xf32>
    %79 = arith.select %76, %74, %78 : vector<64x16xi1>, vector<64x16xf32>
    %80 = arith.truncf %79 : vector<64x16xf32> to vector<64x16xbf16>
    %c1_47 = arith.constant 1 : index
    %c0_48 = arith.constant 0 : index
    %c0_49 = arith.constant 0 : index
    %81 = vector.load %arg6[%c1_47, %c0_48, %c0_49] : memref<2x64x16xbf16, #tpu.memory_space<vmem>>, vector<1x64x16xbf16>
    %82 = vector.shape_cast %81 : vector<1x64x16xbf16> to vector<64x16xbf16>
    %83 = vector.shape_cast %80 : vector<64x16xbf16> to vector<1x64x16xbf16>
    tpu.vector_store %arg6[%c1_47, %c0_48, %c0_49], %83 {strides = array<i32>} : memref<2x64x16xbf16, #tpu.memory_space<vmem>>, vector<1x64x16xbf16>,
    return
  }
  func.func @transform_0(%arg0: i32) -> (i32, i32, i32) {
    %c0_i32 = arith.constant 0 : i32
    %c0_i32_0 = arith.constant 0 : i32
    %c0_i32_1 = arith.constant 0 : i32
    %c0_i32_2 = arith.constant 0 : i32
    return %c0_i32, %c0_i32_0, %c0_i32_1 : i32, i32, i32
  }
  func.func @transform_1(%arg0: i32) -> (i32, i32) {
    %c0_i32 = arith.constant 0 : i32
    %c0_i32_0 = arith.constant 0 : i32
    %c0_i32_1 = arith.constant 0 : i32
    return %c0_i32, %c0_i32_0 : i32, i32
  }
  func.func @transform_2(%arg0: i32) -> (i32, i32) {
    %c0_i32 = arith.constant 0 : i32
    %c0_i32_0 = arith.constant 0 : i32
    %c0_i32_1 = arith.constant 0 : i32
    return %c0_i32, %c0_i32_0 : i32, i32
  }
  func.func @transform_3(%arg0: i32) -> (i32, i32) {
    %c0_i32 = arith.constant 0 : i32
    %c0_i32_0 = arith.constant 0 : i32
    %c0_i32_1 = arith.constant 0 : i32
    return %c0_i32, %c0_i32_0 : i32, i32
  }
  func.func @transform_4(%arg0: i32) -> (i32, i32) {
    %c0_i32 = arith.constant 0 : i32
    %c0_i32_0 = arith.constant 0 : i32
    %c0_i32_1 = arith.constant 0 : i32
    return %c0_i32, %c0_i32_0 : i32, i32
  }
  func.func @transform_5(%arg0: i32) -> (i32, i32, i32) {
    %c0_i32 = arith.constant 0 : i32
    %c0_i32_0 = arith.constant 0 : i32
    %c0_i32_1 = arith.constant 0 : i32
    %c0_i32_2 = arith.constant 0 : i32
    return %c0_i32, %c0_i32_0, %c0_i32_1 : i32, i32, i32
  }
}

module attributes {stable_mosaic.version = 11 : i64} {
  func.func @_conv_bn_lrelu_kernel(%arg0: i32, %arg1: memref<2x1024x4xbf16, #tpu.memory_space<vmem>>, %arg2: memref<64x1024xbf16, #tpu.memory_space<vmem>>, %arg3: memref<64x1xf32, #tpu.memory_space<vmem>>, %arg4: memref<64x1xf32, #tpu.memory_space<vmem>>, %arg5: memref<64x1xf32, #tpu.memory_space<vmem>>, %arg6: memref<2x64x4xbf16, #tpu.memory_space<vmem>>, %arg7: memref<2x64x4xf32, #tpu.memory_space<vmem>>) attributes {dimension_semantics = [#tpu.dimension_semantics<arbitrary>], iteration_bounds = array<i64: 1>, scalar_prefetch = 0 : i64, scratch_operands = 1 : i64, tpu.core_type = #tpu.core_type<tc>, window_params = [{pipeline_mode = #tpu.pipeline_mode<synchronous>, transform_indices = @transform_0, window_bounds = array<i64: 2, 1024, 4>}, {pipeline_mode = #tpu.pipeline_mode<synchronous>, transform_indices = @transform_1, window_bounds = array<i64: 64, 1024>}, {pipeline_mode = #tpu.pipeline_mode<synchronous>, transform_indices = @transform_2, window_bounds = array<i64: 64, 1>}, {pipeline_mode = #tpu.pipeline_mode<synchronous>, transform_indices = @transform_3, window_bounds = array<i64: 64, 1>}, {pipeline_mode = #tpu.pipeline_mode<synchronous>, transform_indices = @transform_4, window_bounds = array<i64: 64, 1>}, {pipeline_mode = #tpu.pipeline_mode<synchronous>, transform_indices = @transform_5, window_bounds = array<i64: 2, 64, 4>}]} {
    %c0 = arith.constant 0 : index
    %c0_0 = arith.constant 0 : index
    %0 = vector.load %arg2[%c0, %c0_0] : memref<64x1024xbf16, #tpu.memory_space<vmem>>, vector<64x1024xbf16>
    %c0_1 = arith.constant 0 : index
    %c0_2 = arith.constant 0 : index
    %1 = vector.load %arg3[%c0_1, %c0_2] : memref<64x1xf32, #tpu.memory_space<vmem>>, vector<64x1xf32>
    %cst = arith.constant 0.000000e+00 : f32
    %2 = vector.broadcast %cst : f32 to vector<64x1xf32>
    %c0_3 = arith.constant 0 : index
    %c0_4 = arith.constant 0 : index
    %c0_5 = arith.constant 0 : index
    %3 = vector.load %arg1[%c0_3, %c0_4, %c0_5] : memref<2x1024x4xbf16, #tpu.memory_space<vmem>>, vector<1x1024x4xbf16>
    %4 = vector.shape_cast %3 : vector<1x1024x4xbf16> to vector<1024x4xbf16>
    %cst_6 = arith.constant dense<0.000000e+00> : vector<64x4xf32>
    %5 = tpu.matmul %0, %4, %cst_6 {dimension_numbers = #tpu.dot_dimension_numbers<[1], [0], [0], [1], [0, 0, 1, 1], [], []>} : vector<64x1024xbf16>, vector<1024x4xbf16>, vector<64x4xf32> -> vector<64x4xf32>
    %6 = vector.broadcast %1 : vector<64x1xf32> to vector<64x4xf32>
    %7 = arith.addf %5, %6 : vector<64x4xf32>
    %c0_7 = arith.constant 0 : index
    %c0_8 = arith.constant 0 : index
    %c0_9 = arith.constant 0 : index
    %8 = vector.load %arg7[%c0_7, %c0_8, %c0_9] : memref<2x64x4xf32, #tpu.memory_space<vmem>>, vector<1x64x4xf32>
    %9 = vector.shape_cast %8 : vector<1x64x4xf32> to vector<64x4xf32>
    %10 = vector.shape_cast %7 : vector<64x4xf32> to vector<1x64x4xf32>
    tpu.vector_store %arg7[%c0_7, %c0_8, %c0_9], %10 {strides = array<i32>} : memref<2x64x4xf32, #tpu.memory_space<vmem>>, vector<1x64x4xf32>,
    %cst_10 = arith.constant dense<0.000000e+00> : vector<64xf32>
    %11 = vector.multi_reduction <add>, %7, %cst_10 [1] : vector<64x4xf32> to vector<64xf32>
    %12 = vector.shape_cast %11 : vector<64xf32> to vector<64x1xf32>
    %13 = arith.addf %2, %12 : vector<64x1xf32>
    %c1 = arith.constant 1 : index
    %c0_11 = arith.constant 0 : index
    %c0_12 = arith.constant 0 : index
    %14 = vector.load %arg1[%c1, %c0_11, %c0_12] : memref<2x1024x4xbf16, #tpu.memory_space<vmem>>, vector<1x1024x4xbf16>
    %15 = vector.shape_cast %14 : vector<1x1024x4xbf16> to vector<1024x4xbf16>
    %cst_13 = arith.constant dense<0.000000e+00> : vector<64x4xf32>
    %16 = tpu.matmul %0, %15, %cst_13 {dimension_numbers = #tpu.dot_dimension_numbers<[1], [0], [0], [1], [0, 0, 1, 1], [], []>} : vector<64x1024xbf16>, vector<1024x4xbf16>, vector<64x4xf32> -> vector<64x4xf32>
    %17 = vector.broadcast %1 : vector<64x1xf32> to vector<64x4xf32>
    %18 = arith.addf %16, %17 : vector<64x4xf32>
    %c1_14 = arith.constant 1 : index
    %c0_15 = arith.constant 0 : index
    %c0_16 = arith.constant 0 : index
    %19 = vector.load %arg7[%c1_14, %c0_15, %c0_16] : memref<2x64x4xf32, #tpu.memory_space<vmem>>, vector<1x64x4xf32>
    %20 = vector.shape_cast %19 : vector<1x64x4xf32> to vector<64x4xf32>
    %21 = vector.shape_cast %18 : vector<64x4xf32> to vector<1x64x4xf32>
    tpu.vector_store %arg7[%c1_14, %c0_15, %c0_16], %21 {strides = array<i32>} : memref<2x64x4xf32, #tpu.memory_space<vmem>>, vector<1x64x4xf32>,
    %cst_17 = arith.constant dense<0.000000e+00> : vector<64xf32>
    %22 = vector.multi_reduction <add>, %18, %cst_17 [1] : vector<64x4xf32> to vector<64xf32>
    %23 = vector.shape_cast %22 : vector<64xf32> to vector<64x1xf32>
    %24 = arith.addf %13, %23 : vector<64x1xf32>
    %cst_18 = arith.constant 1.250000e-01 : f32
    %25 = vector.broadcast %cst_18 : f32 to vector<64x1xf32>
    %26 = arith.mulf %24, %25 : vector<64x1xf32>
    %cst_19 = arith.constant 0.000000e+00 : f32
    %27 = vector.broadcast %cst_19 : f32 to vector<64x1xf32>
    %c0_20 = arith.constant 0 : index
    %c0_21 = arith.constant 0 : index
    %c0_22 = arith.constant 0 : index
    %28 = vector.load %arg7[%c0_20, %c0_21, %c0_22] : memref<2x64x4xf32, #tpu.memory_space<vmem>>, vector<1x64x4xf32>
    %29 = vector.shape_cast %28 : vector<1x64x4xf32> to vector<64x4xf32>
    %30 = vector.broadcast %26 : vector<64x1xf32> to vector<64x4xf32>
    %31 = arith.subf %29, %30 : vector<64x4xf32>
    %32 = arith.mulf %31, %31 : vector<64x4xf32>
    %cst_23 = arith.constant dense<0.000000e+00> : vector<64xf32>
    %33 = vector.multi_reduction <add>, %32, %cst_23 [1] : vector<64x4xf32> to vector<64xf32>
    %34 = vector.shape_cast %33 : vector<64xf32> to vector<64x1xf32>
    %35 = arith.addf %27, %34 : vector<64x1xf32>
    %c1_24 = arith.constant 1 : index
    %c0_25 = arith.constant 0 : index
    %c0_26 = arith.constant 0 : index
    %36 = vector.load %arg7[%c1_24, %c0_25, %c0_26] : memref<2x64x4xf32, #tpu.memory_space<vmem>>, vector<1x64x4xf32>
    %37 = vector.shape_cast %36 : vector<1x64x4xf32> to vector<64x4xf32>
    %38 = vector.broadcast %26 : vector<64x1xf32> to vector<64x4xf32>
    %39 = arith.subf %37, %38 : vector<64x4xf32>
    %40 = arith.mulf %39, %39 : vector<64x4xf32>
    %cst_27 = arith.constant dense<0.000000e+00> : vector<64xf32>
    %41 = vector.multi_reduction <add>, %40, %cst_27 [1] : vector<64x4xf32> to vector<64xf32>
    %42 = vector.shape_cast %41 : vector<64xf32> to vector<64x1xf32>
    %43 = arith.addf %35, %42 : vector<64x1xf32>
    %cst_28 = arith.constant 1.250000e-01 : f32
    %44 = vector.broadcast %cst_28 : f32 to vector<64x1xf32>
    %45 = arith.mulf %43, %44 : vector<64x1xf32>
    %cst_29 = arith.constant 9.99999974E-6 : f32
    %46 = vector.broadcast %cst_29 : f32 to vector<64x1xf32>
    %47 = arith.addf %45, %46 : vector<64x1xf32>
    %48 = math.rsqrt %47 : vector<64x1xf32>
    %c0_30 = arith.constant 0 : index
    %c0_31 = arith.constant 0 : index
    %49 = vector.load %arg4[%c0_30, %c0_31] : memref<64x1xf32, #tpu.memory_space<vmem>>, vector<64x1xf32>
    %50 = arith.mulf %49, %48 : vector<64x1xf32>
    %c0_32 = arith.constant 0 : index
    %c0_33 = arith.constant 0 : index
    %51 = vector.load %arg5[%c0_32, %c0_33] : memref<64x1xf32, #tpu.memory_space<vmem>>, vector<64x1xf32>
    %52 = arith.mulf %26, %50 : vector<64x1xf32>
    %53 = arith.subf %51, %52 : vector<64x1xf32>
    %c0_34 = arith.constant 0 : index
    %c0_35 = arith.constant 0 : index
    %c0_36 = arith.constant 0 : index
    %54 = vector.load %arg7[%c0_34, %c0_35, %c0_36] : memref<2x64x4xf32, #tpu.memory_space<vmem>>, vector<1x64x4xf32>
    %55 = vector.shape_cast %54 : vector<1x64x4xf32> to vector<64x4xf32>
    %56 = vector.broadcast %50 : vector<64x1xf32> to vector<64x4xf32>
    %57 = arith.mulf %55, %56 : vector<64x4xf32>
    %58 = vector.broadcast %53 : vector<64x1xf32> to vector<64x4xf32>
    %59 = arith.addf %57, %58 : vector<64x4xf32>
    %cst_37 = arith.constant 0.000000e+00 : f32
    %60 = vector.broadcast %cst_37 : f32 to vector<64x4xf32>
    %61 = arith.cmpf oge, %59, %60 : vector<64x4xf32>
    %cst_38 = arith.constant 2.000000e-01 : f32
    %62 = vector.broadcast %cst_38 : f32 to vector<64x4xf32>
    %63 = arith.mulf %62, %59 : vector<64x4xf32>
    %64 = arith.select %61, %59, %63 : vector<64x4xi1>, vector<64x4xf32>
    %65 = arith.truncf %64 : vector<64x4xf32> to vector<64x4xbf16>
    %c0_39 = arith.constant 0 : index
    %c0_40 = arith.constant 0 : index
    %c0_41 = arith.constant 0 : index
    %66 = vector.load %arg6[%c0_39, %c0_40, %c0_41] : memref<2x64x4xbf16, #tpu.memory_space<vmem>>, vector<1x64x4xbf16>
    %67 = vector.shape_cast %66 : vector<1x64x4xbf16> to vector<64x4xbf16>
    %68 = vector.shape_cast %65 : vector<64x4xbf16> to vector<1x64x4xbf16>
    tpu.vector_store %arg6[%c0_39, %c0_40, %c0_41], %68 {strides = array<i32>} : memref<2x64x4xbf16, #tpu.memory_space<vmem>>, vector<1x64x4xbf16>,
    %c1_42 = arith.constant 1 : index
    %c0_43 = arith.constant 0 : index
    %c0_44 = arith.constant 0 : index
    %69 = vector.load %arg7[%c1_42, %c0_43, %c0_44] : memref<2x64x4xf32, #tpu.memory_space<vmem>>, vector<1x64x4xf32>
    %70 = vector.shape_cast %69 : vector<1x64x4xf32> to vector<64x4xf32>
    %71 = vector.broadcast %50 : vector<64x1xf32> to vector<64x4xf32>
    %72 = arith.mulf %70, %71 : vector<64x4xf32>
    %73 = vector.broadcast %53 : vector<64x1xf32> to vector<64x4xf32>
    %74 = arith.addf %72, %73 : vector<64x4xf32>
    %cst_45 = arith.constant 0.000000e+00 : f32
    %75 = vector.broadcast %cst_45 : f32 to vector<64x4xf32>
    %76 = arith.cmpf oge, %74, %75 : vector<64x4xf32>
    %cst_46 = arith.constant 2.000000e-01 : f32
    %77 = vector.broadcast %cst_46 : f32 to vector<64x4xf32>
    %78 = arith.mulf %77, %74 : vector<64x4xf32>
    %79 = arith.select %76, %74, %78 : vector<64x4xi1>, vector<64x4xf32>
    %80 = arith.truncf %79 : vector<64x4xf32> to vector<64x4xbf16>
    %c1_47 = arith.constant 1 : index
    %c0_48 = arith.constant 0 : index
    %c0_49 = arith.constant 0 : index
    %81 = vector.load %arg6[%c1_47, %c0_48, %c0_49] : memref<2x64x4xbf16, #tpu.memory_space<vmem>>, vector<1x64x4xbf16>
    %82 = vector.shape_cast %81 : vector<1x64x4xbf16> to vector<64x4xbf16>
    %83 = vector.shape_cast %80 : vector<64x4xbf16> to vector<1x64x4xbf16>
    tpu.vector_store %arg6[%c1_47, %c0_48, %c0_49], %83 {strides = array<i32>} : memref<2x64x4xbf16, #tpu.memory_space<vmem>>, vector<1x64x4xbf16>,
    return
  }
  func.func @transform_0(%arg0: i32) -> (i32, i32, i32) {
    %c0_i32 = arith.constant 0 : i32
    %c0_i32_0 = arith.constant 0 : i32
    %c0_i32_1 = arith.constant 0 : i32
    %c0_i32_2 = arith.constant 0 : i32
    return %c0_i32, %c0_i32_0, %c0_i32_1 : i32, i32, i32
  }
  func.func @transform_1(%arg0: i32) -> (i32, i32) {
    %c0_i32 = arith.constant 0 : i32
    %c0_i32_0 = arith.constant 0 : i32
    %c0_i32_1 = arith.constant 0 : i32
    return %c0_i32, %c0_i32_0 : i32, i32
  }
  func.func @transform_2(%arg0: i32) -> (i32, i32) {
    %c0_i32 = arith.constant 0 : i32
    %c0_i32_0 = arith.constant 0 : i32
    %c0_i32_1 = arith.constant 0 : i32
    return %c0_i32, %c0_i32_0 : i32, i32
  }
  func.func @transform_3(%arg0: i32) -> (i32, i32) {
    %c0_i32 = arith.constant 0 : i32
    %c0_i32_0 = arith.constant 0 : i32
    %c0_i32_1 = arith.constant 0 : i32
    return %c0_i32, %c0_i32_0 : i32, i32
  }
  func.func @transform_4(%arg0: i32) -> (i32, i32) {
    %c0_i32 = arith.constant 0 : i32
    %c0_i32_0 = arith.constant 0 : i32
    %c0_i32_1 = arith.constant 0 : i32
    return %c0_i32, %c0_i32_0 : i32, i32
  }
  func.func @transform_5(%arg0: i32) -> (i32, i32, i32) {
    %c0_i32 = arith.constant 0 : i32
    %c0_i32_0 = arith.constant 0 : i32
    %c0_i32_1 = arith.constant 0 : i32
    %c0_i32_2 = arith.constant 0 : i32
    return %c0_i32, %c0_i32_0, %c0_i32_1 : i32, i32, i32
  }
}

module attributes {stable_mosaic.version = 11 : i64} {
  func.func @_head_kernel(%arg0: i32, %arg1: memref<2x256xbf16, #tpu.memory_space<vmem>>, %arg2: memref<256x32xbf16, #tpu.memory_space<vmem>>, %arg3: memref<1x32xf32, #tpu.memory_space<vmem>>, %arg4: memref<32x2xbf16, #tpu.memory_space<vmem>>, %arg5: memref<1x2xf32, #tpu.memory_space<vmem>>, %arg6: memref<2x2xf32, #tpu.memory_space<vmem>>) attributes {dimension_semantics = [#tpu.dimension_semantics<arbitrary>], iteration_bounds = array<i64: 1>, scalar_prefetch = 0 : i64, scratch_operands = 0 : i64, tpu.core_type = #tpu.core_type<tc>, window_params = [{pipeline_mode = #tpu.pipeline_mode<synchronous>, transform_indices = @transform_0, window_bounds = array<i64: 2, 256>}, {pipeline_mode = #tpu.pipeline_mode<synchronous>, transform_indices = @transform_1, window_bounds = array<i64: 256, 32>}, {pipeline_mode = #tpu.pipeline_mode<synchronous>, transform_indices = @transform_2, window_bounds = array<i64: 1, 32>}, {pipeline_mode = #tpu.pipeline_mode<synchronous>, transform_indices = @transform_3, window_bounds = array<i64: 32, 2>}, {pipeline_mode = #tpu.pipeline_mode<synchronous>, transform_indices = @transform_4, window_bounds = array<i64: 1, 2>}, {pipeline_mode = #tpu.pipeline_mode<synchronous>, transform_indices = @transform_5, window_bounds = array<i64: 2, 2>}]} {
    %c0 = arith.constant 0 : index
    %c0_0 = arith.constant 0 : index
    %0 = vector.load %arg1[%c0, %c0_0] : memref<2x256xbf16, #tpu.memory_space<vmem>>, vector<2x256xbf16>
    %c0_1 = arith.constant 0 : index
    %c0_2 = arith.constant 0 : index
    %1 = vector.load %arg2[%c0_1, %c0_2] : memref<256x32xbf16, #tpu.memory_space<vmem>>, vector<256x32xbf16>
    %cst = arith.constant dense<0.000000e+00> : vector<2x32xf32>
    %2 = tpu.matmul %0, %1, %cst {dimension_numbers = #tpu.dot_dimension_numbers<[1], [0], [0], [1], [0, 0, 1, 1], [], []>} : vector<2x256xbf16>, vector<256x32xbf16>, vector<2x32xf32> -> vector<2x32xf32>
    %c0_3 = arith.constant 0 : index
    %c0_4 = arith.constant 0 : index
    %3 = vector.load %arg3[%c0_3, %c0_4] : memref<1x32xf32, #tpu.memory_space<vmem>>, vector<1x32xf32>
    %4 = vector.broadcast %3 : vector<1x32xf32> to vector<2x32xf32>
    %5 = arith.addf %2, %4 : vector<2x32xf32>
    %6 = arith.truncf %5 : vector<2x32xf32> to vector<2x32xbf16>
    %c0_5 = arith.constant 0 : index
    %c0_6 = arith.constant 0 : index
    %7 = vector.load %arg4[%c0_5, %c0_6] : memref<32x2xbf16, #tpu.memory_space<vmem>>, vector<32x2xbf16>
    %cst_7 = arith.constant dense<0.000000e+00> : vector<2x2xf32>
    %8 = tpu.matmul %6, %7, %cst_7 {dimension_numbers = #tpu.dot_dimension_numbers<[1], [0], [0], [1], [0, 0, 1, 1], [], []>} : vector<2x32xbf16>, vector<32x2xbf16>, vector<2x2xf32> -> vector<2x2xf32>
    %c0_8 = arith.constant 0 : index
    %c0_9 = arith.constant 0 : index
    %9 = vector.load %arg5[%c0_8, %c0_9] : memref<1x2xf32, #tpu.memory_space<vmem>>, vector<1x2xf32>
    %10 = vector.broadcast %9 : vector<1x2xf32> to vector<2x2xf32>
    %11 = arith.addf %8, %10 : vector<2x2xf32>
    %c0_10 = arith.constant 0 : index
    %c0_11 = arith.constant 0 : index
    %12 = vector.load %arg6[%c0_10, %c0_11] : memref<2x2xf32, #tpu.memory_space<vmem>>, vector<2x2xf32>
    tpu.vector_store %arg6[%c0_10, %c0_11], %11 {strides = array<i32>} : memref<2x2xf32, #tpu.memory_space<vmem>>, vector<2x2xf32>,
    return
  }
  func.func @transform_0(%arg0: i32) -> (i32, i32) {
    %c0_i32 = arith.constant 0 : i32
    %c0_i32_0 = arith.constant 0 : i32
    %c0_i32_1 = arith.constant 0 : i32
    return %c0_i32, %c0_i32_0 : i32, i32
  }
  func.func @transform_1(%arg0: i32) -> (i32, i32) {
    %c0_i32 = arith.constant 0 : i32
    %c0_i32_0 = arith.constant 0 : i32
    %c0_i32_1 = arith.constant 0 : i32
    return %c0_i32, %c0_i32_0 : i32, i32
  }
  func.func @transform_2(%arg0: i32) -> (i32, i32) {
    %c0_i32 = arith.constant 0 : i32
    %c0_i32_0 = arith.constant 0 : i32
    %c0_i32_1 = arith.constant 0 : i32
    return %c0_i32, %c0_i32_0 : i32, i32
  }
  func.func @transform_3(%arg0: i32) -> (i32, i32) {
    %c0_i32 = arith.constant 0 : i32
    %c0_i32_0 = arith.constant 0 : i32
    %c0_i32_1 = arith.constant 0 : i32
    return %c0_i32, %c0_i32_0 : i32, i32
  }
  func.func @transform_4(%arg0: i32) -> (i32, i32) {
    %c0_i32 = arith.constant 0 : i32
    %c0_i32_0 = arith.constant 0 : i32
    %c0_i32_1 = arith.constant 0 : i32
    return %c0_i32, %c0_i32_0 : i32, i32
  }
  func.func @transform_5(%arg0: i32) -> (i32, i32) {
    %c0_i32 = arith.constant 0 : i32
    %c0_i32_0 = arith.constant 0 : i32
    %c0_i32_1 = arith.constant 0 : i32
    return %c0_i32, %c0_i32_0 : i32, i32
  }
}

</mosaic_0001>

<bundles_post_ra>
// kernel: image_classifier_forward.6
= control target key start
LH: loop header
LB: loop body
LE: loop exit
PB: predicated region body
PF: predicated region fallthrough
CT: control target
= control target key end

     0   :  { %v1043_v3 = vmov 0   ;;  %vm172_vm0 = vcmask 392192   ;;  %s1378_s0 = inlined_call_operand.vmem [shape: bf16[2,48,1024], index: 0, kind: input, shape index: {}]   ;;  %s1379_s1 = inlined_call_operand.vmem [shape: bf16[8,48], index: 1, kind: input, shape index: {}]   ;;  %s1380_s2 = inlined_call_operand.vmem [shape: f32[8,1], index: 2, kind: input, shape index: {}]   ;;  %s1381_s3 = inlined_call_operand.vmem [shape: f32[8,1], index: 3, kind: input, shape index: {}]   ;;  %s1382_s4 = inlined_call_operand.vmem [shape: f32[8,1], index: 4, kind: input, shape index: {}]   ;;  %s1383_s5 = inlined_call_operand.vmem [shape: bf16[2,8,1024], index: 5, kind: output, shape index: {}]  }
   0x1   :  { %v23_v0 = vld [vmem:[%s1378_s0] sm:$0xff]  ;;  %v24_v2 = vld [vmem:[%s1378_s0 + $0x8] sm:$0xff]  ;;  %208 = vmatprep.mubr.bf16.mxu0 %v1043_v3  ;;  %249 = vmatprep.mubr.bf16.mxu1 %v1043_v3  ;;  %v25_v23 = vld [vmem:[%s1378_s0 + $0x10] sm:$0xff] }
   0x2   :  { %v27_v1 = vld [vmem:[%s1378_s0 + $0x20] sm:$0xff]  ;;  %v28_v5 = vld [vmem:[%s1378_s0 + $0x28] sm:$0xff]  ;;  %1039 = vset.pattern.permute.xlu0 %v1043_v3  ;;  %1040 = vset.pattern.permute.xlu1 %v1043_v3  ;;  %v29_v24 = vld [vmem:[%s1378_s0 + $0x30] sm:$0xff] }
   0x3   :  { %v939_v4 = vcombine.high %v23_v0, %v27_v1  ;;  %v938_v6 = vcombine.low %v23_v0, %v27_v1  ;;  %v31_v7 = vld [vmem:[%s1378_s0 + $0x40] sm:$0xff]  ;;  %v941_v9 = vcombine.high %v24_v2, %v28_v5  ;;  %v940_v10 = vcombine.low %v24_v2, %v28_v5  ;;  %v32_v12 = vld [vmem:[%s1378_s0 + $0x48] sm:$0xff]  ;;  %v26_v25 = vld [vmem:[%s1378_s0 + $0x18] sm:$0xff] }
   0x4   :  { %v35_v8 = vld [vmem:[%s1378_s0 + $0x60] sm:$0xff]  ;;  %v36_v13 = vld [vmem:[%s1378_s0 + $0x68] sm:$0xff]  ;;  %v30_v26 = vld [vmem:[%s1378_s0 + $0x38] sm:$0xff]  ;;  %v943_v29 = vcombine.high %v25_v23, %v29_v24  ;;  %v942_v36 = vcombine.low %v25_v23, %v29_v24 }
   0x5   :  { %v947_v11 = vcombine.high %v31_v7, %v35_v8  ;;  %v39_v14 = vld [vmem:[%s1378_s0 + $0x80] sm:$0xff]  ;;  %176 = vmatprep.subr.bf16.mxu0 %v939_v4  ;;  %v949_v15 = vcombine.high %v32_v12, %v36_v13  ;;  %v40_v17 = vld [vmem:[%s1378_s0 + $0x88] sm:$0xff]  ;;  %217 = vmatprep.subr.bf16.mxu1 %v941_v9  ;;  %v946_v19 = vcombine.low %v31_v7, %v35_v8  ;;  %v33_v31 = vld [vmem:[%s1378_s0 + $0x50] sm:$0xff] }
   0x6   :  { %v43_v16 = vld [vmem:[%s1378_s0 + $0xa0] sm:$0xff]  ;;  %v44_v18 = vld [vmem:[%s1378_s0 + $0xa8] sm:$0xff]  ;;  %177 = vmatpush1.bf16.msra.mxu0 %v938_v6  ;;  %218 = vmatpush1.bf16.msra.mxu1 %v940_v10  ;;  %v948_v20 = vcombine.low %v32_v12, %v36_v13  ;;  %v945_v30 = vcombine.high %v26_v25, %v30_v26  ;;  %v37_v32 = vld [vmem:[%s1378_s0 + $0x70] sm:$0xff]  ;;  %v944_v37 = vcombine.low %v26_v25, %v30_v26 }
   0x7   :  { %178 = vmatprep.subr.bf16.mxu0 %v947_v11  ;;  %v955_v21 = vcombine.high %v39_v14, %v43_v16  ;;  %219 = vmatprep.subr.bf16.mxu1 %v949_v15  ;;  %v957_v22 = vcombine.high %v40_v17, %v44_v18  ;;  %v954_v27 = vcombine.low %v39_v14, %v43_v16  ;;  %v34_v33 = vld [vmem:[%s1378_s0 + $0x58] sm:$0xff]  ;;  %v1141_v35 = vld [vmem:[%s1379_s1] sm:$0xf]  ;;  %v41_v40 = vld [vmem:[%s1378_s0 + $0x90] sm:$0xff] }
   0x8   :  { %v956_v28 = vcombine.low %v40_v17, %v44_v18  ;;  %v38_v34 = vld [vmem:[%s1378_s0 + $0x78] sm:$0xff]  ;;  %v951_v38 = vcombine.high %v33_v31, %v37_v32  ;;  %v45_v41 = vld [vmem:[%s1378_s0 + $0xb0] sm:$0xff]  ;;  %v950_v44 = vcombine.low %v33_v31, %v37_v32  ;;  %v22_v45 = vld [vmem:[%s1380_s2] sm:$0xff] }
   0x9   :  { %v953_v39 = vcombine.high %v34_v33, %v38_v34  ;;  %v42_v42 = vld [vmem:[%s1378_s0 + $0x98] sm:$0xff]  ;;  %v952_v46 = vcombine.low %v34_v33, %v38_v34  ;;  %v959_v47 = vcombine.high %v41_v40, %v45_v41  ;;  %v966_v49 = vld [vmem:[%s1378_s0 + $0xc0] sm:$0xff]  ;;  %v967_v51 = vld [vmem:[%s1378_s0 + $0xc8] sm:$0xff]  ;;  %49 = vperm.xlu0 %1039, %v22_v45   ;;  %v958_v53 = vcombine.low %v41_v40, %v45_v41 }
   0xa   :  { %179 = vmatpush1.bf16.msra.mxu0 %v946_v19  ;;  %220 = vmatpush1.bf16.msra.mxu1 %v948_v20  ;;  %v46_v43 = vld [vmem:[%s1378_s0 + $0xb8] sm:$0xff]  ;;  %v970_v50 = vld [vmem:[%s1378_s0 + $0xe0] sm:$0xff]  ;;  %v971_v52 = vld [vmem:[%s1378_s0 + $0xe8] sm:$0xff] }
   0xb   :  { %180 = vmatprep.subr.bf16.mxu0 %v955_v21  ;;  %221 = vmatprep.subr.bf16.mxu1 %v957_v22  ;;  %v961_v48 = vcombine.high %v42_v42, %v46_v43  ;;  %v960_v54 = vcombine.low %v42_v42, %v46_v43  ;;  %v991_v55 = vcombine.high %v966_v49, %v970_v50  ;;  %v974_v57 = vld [vmem:[%s1378_s0 + $0x100] sm:$0xff]  ;;  %v975_v59 = vld [vmem:[%s1378_s0 + $0x108] sm:$0xff]  ;;  %v968_v10 = vld [vmem:[%s1378_s0 + $0xd0] sm:$0xff] }
   0xc   :  { %v993_v56 = vcombine.high %v967_v51, %v971_v52  ;;  %v978_v58 = vld [vmem:[%s1378_s0 + $0x120] sm:$0xff]  ;;  %v979_v60 = vld [vmem:[%s1378_s0 + $0x128] sm:$0xff]  ;;  %v990_v61 = vcombine.low %v966_v49, %v970_v50  ;;  %v992_v62 = vcombine.low %v967_v51, %v971_v52  ;;  %v972_v11 = vld [vmem:[%s1378_s0 + $0xf0] sm:$0xff] }
   0xd   :  { %v999_v63 = vcombine.high %v974_v57, %v978_v58  ;;  %v1001_v0 = vcombine.high %v975_v59, %v979_v60  ;;  %v982_v1 = vld [vmem:[%s1378_s0 + $0x140] sm:$0xff]  ;;  %v983_v4 = vld [vmem:[%s1378_s0 + $0x148] sm:$0xff]  ;;  %v998_v6 = vcombine.low %v974_v57, %v978_v58  ;;  %v1000_v7 = vcombine.low %v975_v59, %v979_v60  ;;  %v969_v12 = vld [vmem:[%s1378_s0 + $0xd8] sm:$0xff] }
   0xe   :  { %181 = vmatpush1.bf16.msra.mxu0 %v954_v27  ;;  %222 = vmatpush1.bf16.msra.mxu1 %v956_v28  ;;  %v986_v2 = vld [vmem:[%s1378_s0 + $0x160] sm:$0xff]  ;;  %v987_v5 = vld [vmem:[%s1378_s0 + $0x168] sm:$0xff]  ;;  %v973_v13 = vld [vmem:[%s1378_s0 + $0xf8] sm:$0xff]  ;;  %v995_v16 = vcombine.high %v968_v10, %v972_v11  ;;  %v994_v22 = vcombine.low %v968_v10, %v972_v11 }
   0xf   :  { %258 = vmatprep.subr.bf16.mxu0 %v943_v29  ;;  %299 = vmatprep.subr.bf16.mxu1 %v945_v30  ;;  %v1007_v8 = vcombine.high %v982_v1, %v986_v2  ;;  %v1009_v9 = vcombine.high %v983_v4, %v987_v5  ;;  %v1006_v14 = vcombine.low %v982_v1, %v986_v2  ;;  %v976_v18 = vld [vmem:[%s1378_s0 + $0x110] sm:$0xff]  ;;  %v977_v20 = vld [vmem:[%s1378_s0 + $0x118] sm:$0xff] }
  0x10   :  { %v1008_v15 = vcombine.low %v983_v4, %v987_v5  ;;  %v997_v17 = vcombine.high %v969_v12, %v973_v13  ;;  %v980_v19 = vld [vmem:[%s1378_s0 + $0x130] sm:$0xff]  ;;  %v981_v21 = vld [vmem:[%s1378_s0 + $0x138] sm:$0xff]  ;;  %v996_v23 = vcombine.low %v969_v12, %v973_v13 }
  0x11   :  { %962 = vmatmul.mubr.msk.bf16.vlgmr.msra.gmra.mrb[0].mxu0 %vm172_vm0, %v1141_v35  ;;  %963 = vmatmul.mubr.msk.bf16.vlgmr.msra.gmra.mrb[0].mxu1 %vm172_vm0, %v1141_v35  ;;  %v1003_v24 = vcombine.high %v976_v18, %v980_v19  ;;  %v1005_v25 = vcombine.high %v977_v20, %v981_v21  ;;  %v984_v26 = vld [vmem:[%s1378_s0 + $0x150] sm:$0xff]  ;;  %v985_v28 = vld [vmem:[%s1378_s0 + $0x158] sm:$0xff]  ;;  %v1002_v30 = vcombine.low %v976_v18, %v980_v19 }
  0x12   :  { %259 = vmatpush1.bf16.msra.mxu0 %v942_v36  ;;  %300 = vmatpush1.bf16.msra.mxu1 %v944_v37  ;;  %v988_v27 = vld [vmem:[%s1378_s0 + $0x170] sm:$0xff]  ;;  %v989_v29 = vld [vmem:[%s1378_s0 + $0x178] sm:$0xff]  ;;  %v1004_v31 = vcombine.low %v977_v20, %v981_v21 }
  0x13   :  { %260 = vmatprep.subr.bf16.mxu0 %v951_v38  ;;  %301 = vmatprep.subr.bf16.mxu1 %v953_v39  ;;  %v1011_v32 = vcombine.high %v984_v26, %v988_v27  ;;  %v1013_v33 = vcombine.high %v985_v28, %v989_v29  ;;  %v1010_v34 = vcombine.low %v984_v26, %v988_v27 }
  0x14   :  { %290 = vmatprep.mubr.bf16.mxu0 %v1043_v3  ;;  %331 = vmatprep.mubr.bf16.mxu1 %v1043_v3  ;;  %v1012_v36 = vcombine.low %v985_v28, %v989_v29 }
  0x16   :  { %261 = vmatpush1.bf16.msra.mxu0 %v950_v44  ;;  %302 = vmatpush1.bf16.msra.mxu1 %v952_v46 }
  0x17   :  { %262 = vmatprep.subr.bf16.mxu0 %v959_v47  ;;  %303 = vmatprep.subr.bf16.mxu1 %v961_v48 }
  0x1a   :  { %263 = vmatpush1.bf16.msra.mxu0 %v958_v53  ;;  %304 = vmatpush1.bf16.msra.mxu1 %v960_v54 }
  0x1b   :  { %503 = vmatprep.subr.bf16.mxu0 %v991_v55  ;;  %544 = vmatprep.subr.bf16.mxu1 %v993_v56 }
  0x1d   :  { %964 = vmatmul.mubr.msk.bf16.vlgmr.msra.gmra.mrb[4].mxu0 %vm172_vm0, %v1141_v35  ;;  %965 = vmatmul.mubr.msk.bf16.vlgmr.msra.gmra.mrb[4].mxu1 %vm172_vm0, %v1141_v35 }
  0x1e   :  { %504 = vmatpush1.bf16.msra.mxu0 %v990_v61  ;;  %545 = vmatpush1.bf16.msra.mxu1 %v992_v62 }
  0x1f   :  { %505 = vmatprep.subr.bf16.mxu0 %v999_v63  ;;  %546 = vmatprep.subr.bf16.mxu1 %v1001_v0 }
  0x20   :  { %535 = vmatprep.mubr.bf16.mxu0 %v1043_v3  ;;  %576 = vmatprep.mubr.bf16.mxu1 %v1043_v3 }
  0x22   :  { %506 = vmatpush1.bf16.msra.mxu0 %v998_v6  ;;  %547 = vmatpush1.bf16.msra.mxu1 %v1000_v7 }
  0x23   :  { %507 = vmatprep.subr.bf16.mxu0 %v1007_v8  ;;  %548 = vmatprep.subr.bf16.mxu1 %v1009_v9 }
  0x26   :  { %508 = vmatpush1.bf16.msra.mxu0 %v1006_v14  ;;  %549 = vmatpush1.bf16.msra.mxu1 %v1008_v15 }
  0x27   :  { %585 = vmatprep.subr.bf16.mxu0 %v995_v16  ;;  %626 = vmatprep.subr.bf16.mxu1 %v997_v17 }
  0x29   :  { %1014 = vmatmul.mubr.msk.bf16.vlgmr.msra.gmra.mrb[8].mxu0 %vm172_vm0, %v1141_v35  ;;  %1015 = vmatmul.mubr.msk.bf16.vlgmr.msra.gmra.mrb[8].mxu1 %vm172_vm0, %v1141_v35 }
  0x2a   :  { %586 = vmatpush1.bf16.msra.mxu0 %v994_v22  ;;  %627 = vmatpush1.bf16.msra.mxu1 %v996_v23 }
  0x2b   :  { %587 = vmatprep.subr.bf16.mxu0 %v1003_v24  ;;  %628 = vmatprep.subr.bf16.mxu1 %v1005_v25 }
  0x2c   :  { %617 = vmatprep.mubr.bf16.mxu0 %v1043_v3  ;;  %658 = vmatprep.mubr.bf16.mxu1 %v1043_v3 }
  0x2e   :  { %588 = vmatpush1.bf16.msra.mxu0 %v1002_v30  ;;  %629 = vmatpush1.bf16.msra.mxu1 %v1004_v31 }
  0x2f   :  { %589 = vmatprep.subr.bf16.mxu0 %v1011_v32  ;;  %630 = vmatprep.subr.bf16.mxu1 %v1013_v33 }
  0x32   :  { %590 = vmatpush1.bf16.msra.mxu0 %v1010_v34  ;;  %631 = vmatpush1.bf16.msra.mxu1 %v1012_v36 }
  0x35   :  { %1016 = vmatmul.mubr.msk.bf16.vlgmr.msra.gmra.mrb[12].mxu0 %vm172_vm0, %v1141_v35  ;;  %1017 = vmatmul.mubr.msk.bf16.vlgmr.msra.gmra.mrb[12].mxu1 %vm172_vm0, %v1141_v35 }
  0x88   :  { %v50_v37 = vpop.permute.xlu0 %49 }
  0xe4   :  { %v210_v38 = vpop.f32.mrb[0].mxu0  ;;  %v251_v3 = vpop.f32.mrb[0].mxu1 }
  0xe5   :  { %v1252_v39 = vadd.f32 %v210_v38, %v50_v37  ;;  %v212_v40 = vpop.f32.mrb[1].mxu0  ;;  %v253_v43 = vpop.f32.mrb[1].mxu1  ;;  %v1258_v48 = vadd.f32 %v251_v3, %v50_v37 }
  0xe6   :  { %v1254_v41 = vadd.f32 %v212_v40, %v50_v37  ;;  %v214_v42 = vpop.f32.mrb[2].mxu0  ;;  %v255_v45 = vpop.f32.mrb[2].mxu1  ;;  %v1261_v49 = vadd.f32 %v253_v43, %v50_v37 }
  0xe7   :  { %v215_v44 = vpop.f32.mrb[3].mxu0  ;;  %v256_v46 = vpop.f32.mrb[3].mxu1 }
  0xe8   :  { %v348_v47 = vadd.f32 %v1254_v41, %v1252_v39 }
  0xea   :  { %v349_v35 = vadd.f32 %v348_v47, %v1258_v48 }
  0xec   :  { %v350_v51 = vadd.f32 %v349_v35, %v1261_v49 }
  0xf0   :  { %v292_v50 = vpop.f32.mrb[4].mxu0  ;;  %v333_v54 = vpop.f32.mrb[4].mxu1 }
  0xf1   :  { %v1264_v52 = vadd.f32 %v292_v50, %v50_v37  ;;  %v294_v53 = vpop.f32.mrb[5].mxu0  ;;  %v335_v57 = vpop.f32.mrb[5].mxu1  ;;  %v1269_v59 = vadd.f32 %v333_v54, %v50_v37 }
  0xf2   :  { %v1266_v55 = vadd.f32 %v294_v53, %v50_v37  ;;  %v296_v56 = vpop.f32.mrb[6].mxu0  ;;  %v337_v61 = vpop.f32.mrb[6].mxu1  ;;  %v1272_v0 = vadd.f32 %v335_v57, %v50_v37 }
  0xf3   :  { %v351_v58 = vadd.f32 %v350_v51, %v1264_v52  ;;  %v297_v60 = vpop.f32.mrb[7].mxu0  ;;  %v338_v62 = vpop.f32.mrb[7].mxu1 }
  0xf5   :  { %v352_v63 = vadd.f32 %v351_v58, %v1266_v55 }
  0xf7   :  { %v353_v1 = vadd.f32 %v352_v63, %v1269_v59 }
  0xf9   :  { %v354_v2 = vadd.f32 %v353_v1, %v1272_v0 }
  0xfb   :  { %355 = vadd.xlane.f32.xlu0 %v354_v2 }
  0xfc   :  { %v537_v4 = vpop.f32.mrb[8].mxu0  ;;  %v578_v7 = vpop.f32.mrb[8].mxu1 }
  0xfd   :  { %v1276_v5 = vadd.f32 %v537_v4, %v50_v37  ;;  %v539_v6 = vpop.f32.mrb[9].mxu0  ;;  %v580_v10 = vpop.f32.mrb[9].mxu1  ;;  %v1282_v15 = vadd.f32 %v578_v7, %v50_v37 }
  0xfe   :  { %v1278_v8 = vadd.f32 %v539_v6, %v50_v37  ;;  %v541_v9 = vpop.f32.mrb[10].mxu0  ;;  %v582_v12 = vpop.f32.mrb[10].mxu1  ;;  %v1285_v17 = vadd.f32 %v580_v10, %v50_v37 }
  0xff   :  { %v542_v11 = vpop.f32.mrb[11].mxu0  ;;  %v583_v13 = vpop.f32.mrb[11].mxu1 }
 0x100   :  { %v676_v14 = vadd.f32 %v1278_v8, %v1276_v5 }
 0x102   :  { %v677_v16 = vadd.f32 %v676_v14, %v1282_v15 }
 0x104   :  { %v678_v19 = vadd.f32 %v677_v16, %v1285_v17 }
 0x108   :  { %v619_v18 = vpop.f32.mrb[12].mxu0  ;;  %v660_v21 = vpop.f32.mrb[12].mxu1 }
 0x109   :  { %v1288_v20 = vadd.f32 %v619_v18, %v50_v37  ;;  %v621_v22 = vpop.f32.mrb[13].mxu0  ;;  %v662_v24 = vpop.f32.mrb[13].mxu1  ;;  %v1293_v30 = vadd.f32 %v660_v21, %v50_v37 }
 0x10a   :  { %v1290_v23 = vadd.f32 %v621_v22, %v50_v37  ;;  %v623_v25 = vpop.f32.mrb[14].mxu0  ;;  %v664_v28 = vpop.f32.mrb[14].mxu1  ;;  %v1296_v32 = vadd.f32 %v662_v24, %v50_v37 }
 0x10b   :  { %v679_v26 = vadd.f32 %v678_v19, %v1288_v20  ;;  %v624_v27 = vpop.f32.mrb[15].mxu0  ;;  %v665_v29 = vpop.f32.mrb[15].mxu1 }
 0x10d   :  { %v680_v31 = vadd.f32 %v679_v26, %v1290_v23 }
 0x10f   :  { %v681_v33 = vadd.f32 %v680_v31, %v1293_v30 }
 0x111   :  { %v682_v34 = vadd.f32 %v681_v33, %v1296_v32 }
 0x113   :  { %683 = vadd.xlane.f32.xlu1 %v682_v34 }
 0x188   :  { %v356_v36 = vpop.xlane.xlu0 %355 }
 0x1a0   :  { %v684_v38 = vpop.xlane.xlu1 %683 }
 0x1a1   :  { %v685_v40 = vadd.f32 %v684_v38, %v356_v36 }
 0x1a3   :  { %v686_v3 = vmul.f32 0.00048828125, %v685_v40 }
 0x1a5   :  { %v695_v42 = vsub.f32 %v1252_v39, %v686_v3  ;;  %v696_v43 = vsub.f32 %v1254_v41, %v686_v3  ;;  %v697_v44 = vsub.f32 %v1258_v48, %v686_v3  ;;  %v698_v45 = vsub.f32 %v1261_v49, %v686_v3 }
 0x1a6   :  { %v699_v47 = vsub.f32 %v1264_v52, %v686_v3  ;;  %v729_v51 = vsub.f32 %v1276_v5, %v686_v3  ;;  %v730_v53 = vsub.f32 %v1278_v8, %v686_v3  ;;  %v731_v54 = vsub.f32 %v1282_v15, %v686_v3 }
 0x1a7   :  { %v703_v46 = vmul.f32 %v695_v42, %v695_v42  ;;  %v704_v37 = vmul.f32 %v696_v43, %v696_v43  ;;  %v705_v35 = vmul.f32 %v697_v44, %v697_v44  ;;  %v700_v56 = vsub.f32 %v1266_v55, %v686_v3 }
 0x1a8   :  { %v706_v57 = vmul.f32 %v698_v45, %v698_v45  ;;  %v732_v60 = vsub.f32 %v1285_v17, %v686_v3  ;;  %v737_v61 = vmul.f32 %v729_v51, %v729_v51  ;;  %v738_v62 = vmul.f32 %v730_v53, %v730_v53 }
 0x1a9   :  { %v711_v50 = vadd.f32 %v704_v37, %v703_v46  ;;  %v701_v63 = vsub.f32 %v1269_v59, %v686_v3  ;;  %v707_v1 = vmul.f32 %v699_v47, %v699_v47  ;;  %v733_v4 = vsub.f32 %v1288_v20, %v686_v3  ;;  %v758_v46 = vld [vmem:[%s1381_s3] sm:$0xff] }
 0x1aa   :  { %v739_v6 = vmul.f32 %v731_v54, %v731_v54  ;;  %v745_v7 = vadd.f32 %v738_v62, %v737_v61  ;;  %v702_v9 = vsub.f32 %v1272_v0, %v686_v3  ;;  %v708_v10 = vmul.f32 %v700_v56, %v700_v56 }
 0x1ab   :  { %v712_v58 = vadd.f32 %v711_v50, %v705_v35  ;;  %v734_v12 = vsub.f32 %v1290_v23, %v686_v3  ;;  %v740_v13 = vmul.f32 %v732_v60, %v732_v60  ;;  %v709_v16 = vmul.f32 %v701_v63, %v701_v63  ;;  %v760_v35 = vld [vmem:[%s1382_s4] sm:$0xff] }
 0x1ac   :  { %v746_v14 = vadd.f32 %v745_v7, %v739_v6  ;;  %v735_v19 = vsub.f32 %v1293_v30, %v686_v3  ;;  %v741_v21 = vmul.f32 %v733_v4, %v733_v4  ;;  %v710_v24 = vmul.f32 %v702_v9, %v702_v9 }
 0x1ad   :  { %v713_v2 = vadd.f32 %v712_v58, %v706_v57  ;;  %v736_v26 = vsub.f32 %v1296_v32, %v686_v3  ;;  %v742_v27 = vmul.f32 %v734_v12, %v734_v12 }
 0x1ae   :  { %v747_v22 = vadd.f32 %v746_v14, %v740_v13  ;;  %v743_v31 = vmul.f32 %v735_v19, %v735_v19 }
 0x1af   :  { %v714_v11 = vadd.f32 %v713_v2, %v707_v1  ;;  %v744_v34 = vmul.f32 %v736_v26, %v736_v26 }
 0x1b0   :  { %v748_v28 = vadd.f32 %v747_v22, %v741_v21 }
 0x1b1   :  { %v715_v18 = vadd.f32 %v714_v11, %v708_v10 }
 0x1b2   :  { %v749_v33 = vadd.f32 %v748_v28, %v742_v27 }
 0x1b3   :  { %v716_v25 = vadd.f32 %v715_v18, %v709_v16 }
 0x1b4   :  { %v750_v36 = vadd.f32 %v749_v33, %v743_v31 }
 0x1b5   :  { %v717_v29 = vadd.f32 %v716_v25, %v710_v24 }
 0x1b6   :  { %v751_v38 = vadd.f32 %v750_v36, %v744_v34 }
 0x1b7   :  { %718 = vadd.xlane.f32.xlu1 %v717_v29 }
 0x1bb   :  { %752 = vadd.xlane.f32.xlu1 %v751_v38 }
 0x244   :  { %v719_v40 = vpop.xlane.xlu1 %718 }
 0x248   :  { %v753_v42 = vpop.xlane.xlu1 %752 }
 0x249   :  { %v754_v43 = vadd.f32 %v753_v42, %v719_v40 }
 0x24b   :  { %v755_v44 = vmul.f32 0.00048828125, %v754_v43 }
 0x24d   :  { %v756_v45 = vadd.f32 1e-05, %v755_v44 }
 0x24f   :  { %1041 = vrsqrt.f32 %v756_v45 }
 0x259   :  { %v1042_v37 = vpop.eup %1041 }
 0x25a   :  { %v759_v47 = vmul.f32 %v1042_v37, %v758_v46 }
 0x25c   :  { %765 = vperm.xlu1 %1040, %v759_v47   ;;  %v761_v50 = vmul.f32 %v759_v47, %v686_v3 }
 0x25e   :  { %v762_v51 = vsub.f32 %v760_v35, %v761_v50 }
 0x260   :  { %778 = vperm.xlu1 %1040, %v762_v51  }
 0x2db   :  { %v766_v53 = vpop.permute.xlu1 %765 }
 0x2dc   :  { %v768_v54 = vmul.f32 %v766_v53, %v1252_v39  ;;  %v769_v56 = vmul.f32 %v766_v53, %v1254_v41  ;;  %v770_v57 = vmul.f32 %v766_v53, %v1258_v48  ;;  %v771_v58 = vmul.f32 %v766_v53, %v1261_v49 }
 0x2dd   :  { %v772_v60 = vmul.f32 %v766_v53, %v1264_v52  ;;  %v773_v61 = vmul.f32 %v766_v53, %v1266_v55  ;;  %v774_v62 = vmul.f32 %v766_v53, %v1269_v59  ;;  %v775_v63 = vmul.f32 %v766_v53, %v1272_v0 }
 0x2de   :  { %v857_v3 = vmul.f32 %v766_v53, %v1276_v5  ;;  %v858_v1 = vmul.f32 %v766_v53, %v1278_v8  ;;  %v859_v39 = vmul.f32 %v766_v53, %v1282_v15  ;;  %v860_v41 = vmul.f32 %v766_v53, %v1285_v17 }
 0x2df   :  { %v861_v48 = vmul.f32 %v766_v53, %v1288_v20  ;;  %v862_v49 = vmul.f32 %v766_v53, %v1290_v23  ;;  %v863_v52 = vmul.f32 %v766_v53, %v1293_v30  ;;  %v864_v55 = vmul.f32 %v766_v53, %v1296_v32  ;;  %v779_v2 = vpop.permute.xlu1 %778 }
 0x2e0   :  { %v781_v59 = vadd.f32 %v779_v2, %v768_v54  ;;  %v782_v4 = vadd.f32 %v779_v2, %v769_v56  ;;  %v783_v0 = vadd.f32 %v779_v2, %v770_v57  ;;  %v784_v6 = vadd.f32 %v779_v2, %v771_v58 }
 0x2e1   :  { %v785_v5 = vadd.f32 %v779_v2, %v772_v60  ;;  %v786_v7 = vadd.f32 %v779_v2, %v773_v61  ;;  %v787_v8 = vadd.f32 %v779_v2, %v774_v62  ;;  %v788_v9 = vadd.f32 %v779_v2, %v775_v63 }
 0x2e2   :  { %vm789_vm1 = vcmp.ge.f32.partialorder %v781_v59, 0.0  ;;  %vm790_vm2 = vcmp.ge.f32.partialorder %v782_v4, 0.0  ;;  %vm791_vm3 = vcmp.ge.f32.partialorder %v783_v0, 0.0  ;;  %vm792_vm4 = vcmp.ge.f32.partialorder %v784_v6, 0.0 }
 0x2e3   :  { %vm793_vm5 = vcmp.ge.f32.partialorder %v785_v5, 0.0  ;;  %vm794_vm6 = vcmp.ge.f32.partialorder %v786_v7, 0.0  ;;  %vm795_vm7 = vcmp.ge.f32.partialorder %v787_v8, 0.0  ;;  %vm796_vm8 = vcmp.ge.f32.partialorder %v788_v9, 0.0 }
 0x2e4   :  { %v797_v15 = vmul.f32 0.2, %v781_v59  ;;  %v798_v17 = vmul.f32 0.2, %v782_v4  ;;  %v799_v20 = vmul.f32 0.2, %v783_v0  ;;  %v865_v23 = vadd.f32 %v857_v3, %v779_v2 }
 0x2e5   :  { %v800_v30 = vmul.f32 0.2, %v784_v6  ;;  %v801_v32 = vmul.f32 0.2, %v785_v5  ;;  %v802_v10 = vmul.f32 0.2, %v786_v7  ;;  %v866_v11 = vadd.f32 %v858_v1, %v779_v2 }
 0x2e6   :  { %v803_v12 = vmul.f32 0.2, %v787_v8  ;;  %v804_v13 = vmul.f32 0.2, %v788_v9  ;;  %v805_v14 = vsel %vm789_vm1, %v781_v59, %v797_v15  ;;  %v806_v16 = vsel %vm790_vm2, %v782_v4, %v798_v17 }
 0x2e7   :  { %v807_v18 = vsel %vm791_vm3, %v783_v0, %v799_v20  ;;  %v808_v19 = vsel %vm792_vm4, %v784_v6, %v800_v30  ;;  %v809_v21 = vsel %vm793_vm5, %v785_v5, %v801_v32  ;;  %v810_v22 = vsel %vm794_vm6, %v786_v7, %v802_v10 }
 0x2e8   :  { %v811_v24 = vsel %vm795_vm7, %v787_v8, %v803_v12  ;;  %v812_v25 = vsel %vm796_vm8, %v788_v9, %v804_v13  ;;  %v1030_v26 = vpack.c.bf16 %v806_v16, %v805_v14  ;;  %v1031_v27 = vpack.c.bf16 %v808_v19, %v807_v18 }
 0x2e9   :  { %v1032_v28 = vpack.c.bf16 %v810_v22, %v809_v21  ;;  %v1033_v29 = vpack.c.bf16 %v812_v25, %v811_v24  ;;  %v867_v31 = vadd.f32 %v859_v39, %v779_v2  ;;  %v868_v33 = vadd.f32 %v860_v41, %v779_v2 }
 0x2ea   :  { %845 = vst [vmem:[%s1383_s5] sm:$0xff] %v1030_v26  ;;  %846 = vst [vmem:[%s1383_s5 + $0x8] sm:$0xff] %v1031_v27  ;;  %v869_v34 = vadd.f32 %v861_v48, %v779_v2  ;;  %v870_v36 = vadd.f32 %v862_v49, %v779_v2  ;;  %v871_v38 = vadd.f32 %v863_v52, %v779_v2  ;;  %vm873_vm9 = vcmp.ge.f32.partialorder %v865_v23, 0.0 }
 0x2eb   :  { %v872_v40 = vadd.f32 %v864_v55, %v779_v2  ;;  %847 = vst [vmem:[%s1383_s5 + $0x10] sm:$0xff] %v1032_v28  ;;  %848 = vst [vmem:[%s1383_s5 + $0x18] sm:$0xff] %v1033_v29  ;;  %vm874_vm10 = vcmp.ge.f32.partialorder %v866_v11, 0.0  ;;  %vm875_vm11 = vcmp.ge.f32.partialorder %v867_v31, 0.0  ;;  %vm876_vm12 = vcmp.ge.f32.partialorder %v868_v33, 0.0 }
 0x2ec   :  { %vm877_vm13 = vcmp.ge.f32.partialorder %v869_v34, 0.0  ;;  %vm878_vm14 = vcmp.ge.f32.partialorder %v870_v36, 0.0  ;;  %vm879_vm15 = vcmp.ge.f32.partialorder %v871_v38, 0.0  ;;  %v881_v42 = vmul.f32 0.2, %v865_v23 }
 0x2ed   :  { %vm880_vm0 = vcmp.ge.f32.partialorder %v872_v40, 0.0  ;;  %v882_v43 = vmul.f32 0.2, %v866_v11  ;;  %v883_v44 = vmul.f32 0.2, %v867_v31 }
 0x2ee   :  { %v884_v45 = vmul.f32 0.2, %v868_v33  ;;  %v885_v46 = vmul.f32 0.2, %v869_v34  ;;  %v886_v37 = vmul.f32 0.2, %v870_v36  ;;  %v889_v50 = vsel %vm873_vm9, %v865_v23, %v881_v42 }
 0x2ef   :  { %v887_v47 = vmul.f32 0.2, %v871_v38  ;;  %v888_v35 = vmul.f32 0.2, %v872_v40  ;;  %v890_v51 = vsel %vm874_vm10, %v866_v11, %v882_v43  ;;  %v891_v53 = vsel %vm875_vm11, %v867_v31, %v883_v44 }
 0x2f0   :  { %v892_v54 = vsel %vm876_vm12, %v868_v33, %v884_v45  ;;  %v893_v56 = vsel %vm877_vm13, %v869_v34, %v885_v46  ;;  %v894_v57 = vsel %vm878_vm14, %v870_v36, %v886_v37  ;;  %v1034_v61 = vpack.c.bf16 %v890_v51, %v889_v50 }
 0x2f1   :  { %v895_v58 = vsel %vm879_vm15, %v871_v38, %v887_v47  ;;  %v896_v60 = vsel %vm880_vm0, %v872_v40, %v888_v35  ;;  %v1035_v62 = vpack.c.bf16 %v892_v54, %v891_v53  ;;  %v1036_v63 = vpack.c.bf16 %v894_v57, %v893_v56 }
 0x2f2   :  { %v1037_v3 = vpack.c.bf16 %v896_v60, %v895_v58  ;;  %1026 = vst [vmem:[%s1383_s5 + $0x20] sm:$0xff] %v1034_v61 }
 0x2f3   :  { %1027 = vst [vmem:[%s1383_s5 + $0x28] sm:$0xff] %v1035_v62  ;;  %1028 = vst [vmem:[%s1383_s5 + $0x30] sm:$0xff] %v1036_v63 }
 0x2f4   :  { %1029 = vst [vmem:[%s1383_s5 + $0x38] sm:$0xff] %v1037_v3 }

// kernel: image_classifier_forward.7
= control target key start
LH: loop header
LB: loop body
LE: loop exit
PB: predicated region body
PF: predicated region fallthrough
CT: control target
= control target key end

     0   :  { %v615_v1 = vmov 0   ;;  %s815_s0 = inlined_call_operand.vmem [shape: bf16[2,128,256], index: 0, kind: input, shape index: {}]   ;;  %s816_s2 = inlined_call_operand.vmem [shape: f32[16,1], index: 2, kind: input, shape index: {}]   ;;  %s817_s1 = inlined_call_operand.vmem [shape: bf16[16,128], index: 1, kind: input, shape index: {}]   ;;  %s818_s3 = inlined_call_operand.vmem [shape: f32[16,1], index: 3, kind: input, shape index: {}]   ;;  %s819_s4 = inlined_call_operand.vmem [shape: f32[16,1], index: 4, kind: input, shape index: {}]   ;;  %s820_s5 = inlined_call_operand.vmem [shape: bf16[2,16,256], index: 5, kind: output, shape index: {}]  }
   0x1   :  { %v562_v0 = vld [vmem:[%s815_s0 + $0x4] ss:$8 sps:$4 sm:$0xff]   ;;  %169 = vmatprep.mubr.bf16.mxu0 %v615_v1  ;;  %321 = vmatprep.mubr.bf16.mxu1 %v615_v1  ;;  %v566_v3 = vld [vmem:[%s815_s0] ss:$8 sps:$4 sm:$0xff]   ;;  %v568_v5 = vld [vmem:[%s815_s0 + $0x14] ss:$8 sps:$4 sm:$0xff]  }
   0x2   :  { %v564_v2 = vld [vmem:[%s815_s0 + $0x84] ss:$8 sps:$4 sm:$0xff]   ;;  %560 = vset.pattern.permute.xlu0 %v615_v1  ;;  %561 = vset.pattern.permute.xlu1 %v615_v1  ;;  %v567_v4 = vld [vmem:[%s815_s0 + $0x80] ss:$8 sps:$4 sm:$0xff]   ;;  %v570_v6 = vld [vmem:[%s815_s0 + $0x94] ss:$8 sps:$4 sm:$0xff]  }
   0x3   :  { %137 = vmatprep.subr.bf16.mxu0 %v562_v0  ;;  %289 = vmatprep.subr.bf16.mxu1 %v564_v2  ;;  %v572_v7 = vld [vmem:[%s815_s0 + $0x10] ss:$8 sps:$4 sm:$0xff]   ;;  %v574_v9 = vld [vmem:[%s815_s0 + $0x24] ss:$8 sps:$4 sm:$0xff]   ;;  %v578_v11 = vld [vmem:[%s815_s0 + $0x20] ss:$8 sps:$4 sm:$0xff]  }
   0x4   :  { %138 = vmatpush1.bf16.msra.mxu0 %v566_v3  ;;  %290 = vmatpush1.bf16.msra.mxu1 %v567_v4  ;;  %v573_v8 = vld [vmem:[%s815_s0 + $0x90] ss:$8 sps:$4 sm:$0xff]   ;;  %v576_v10 = vld [vmem:[%s815_s0 + $0xa4] ss:$8 sps:$4 sm:$0xff]   ;;  %v579_v12 = vld [vmem:[%s815_s0 + $0xa0] ss:$8 sps:$4 sm:$0xff]  }
   0x5   :  { %139 = vmatprep.subr.bf16.mxu0 %v568_v5  ;;  %291 = vmatprep.subr.bf16.mxu1 %v570_v6  ;;  %v580_v13 = vld [vmem:[%s815_s0 + $0x34] ss:$8 sps:$4 sm:$0xff]   ;;  %v584_v15 = vld [vmem:[%s815_s0 + $0x30] ss:$8 sps:$4 sm:$0xff]   ;;  %v586_v17 = vld [vmem:[%s815_s0 + $0x44] ss:$8 sps:$4 sm:$0xff]  }
   0x6   :  { %v582_v14 = vld [vmem:[%s815_s0 + $0xb4] ss:$8 sps:$4 sm:$0xff]   ;;  %v585_v16 = vld [vmem:[%s815_s0 + $0xb0] ss:$8 sps:$4 sm:$0xff]   ;;  %v588_v18 = vld [vmem:[%s815_s0 + $0xc4] ss:$8 sps:$4 sm:$0xff]  }
   0x7   :  { %v590_v19 = vld [vmem:[%s815_s0 + $0x40] ss:$8 sps:$4 sm:$0xff]   ;;  %v592_v21 = vld [vmem:[%s815_s0 + $0x54] ss:$8 sps:$4 sm:$0xff]   ;;  %v596_v23 = vld [vmem:[%s815_s0 + $0x50] ss:$8 sps:$4 sm:$0xff]  }
   0x8   :  { %140 = vmatpush1.bf16.msra.mxu0 %v572_v7  ;;  %292 = vmatpush1.bf16.msra.mxu1 %v573_v8  ;;  %v591_v20 = vld [vmem:[%s815_s0 + $0xc0] ss:$8 sps:$4 sm:$0xff]   ;;  %v594_v22 = vld [vmem:[%s815_s0 + $0xd4] ss:$8 sps:$4 sm:$0xff]   ;;  %v597_v24 = vld [vmem:[%s815_s0 + $0xd0] ss:$8 sps:$4 sm:$0xff]  }
   0x9   :  { %141 = vmatprep.subr.bf16.mxu0 %v574_v9  ;;  %293 = vmatprep.subr.bf16.mxu1 %v576_v10  ;;  %v598_v25 = vld [vmem:[%s815_s0 + $0x64] ss:$8 sps:$4 sm:$0xff]   ;;  %v602_v28 = vld [vmem:[%s815_s0 + $0x60] ss:$8 sps:$4 sm:$0xff]   ;;  %v604_v31 = vld [vmem:[%s815_s0 + $0x74] ss:$8 sps:$4 sm:$0xff]  }
   0xa   :  { %v600_v26 = vld [vmem:[%s815_s0 + $0xe4] ss:$8 sps:$4 sm:$0xff]   ;;  %v603_v29 = vld [vmem:[%s815_s0 + $0xe0] ss:$8 sps:$4 sm:$0xff]   ;;  %v606_v32 = vld [vmem:[%s815_s0 + $0xf4] ss:$8 sps:$4 sm:$0xff]  }
   0xb   :  { %v23_v27 = vld [vmem:[%s816_s2] sm:$0xff]  ;;  %v24_v30 = vld [vmem:[%s816_s2 + $0x8] sm:$0xff]  ;;  %v608_v33 = vld [vmem:[%s815_s0 + $0x70] ss:$8 sps:$4 sm:$0xff]  }
   0xc   :  { %142 = vmatpush1.bf16.msra.mxu0 %v578_v11  ;;  %294 = vmatpush1.bf16.msra.mxu1 %v579_v12  ;;  %v609_v34 = vld [vmem:[%s815_s0 + $0xf0] ss:$8 sps:$4 sm:$0xff]   ;;  %v610_v35 = vld [vmem:[%s817_s1] sm:$0xff]  }
   0xd   :  { %143 = vmatprep.subr.bf16.mxu0 %v580_v13  ;;  %295 = vmatprep.subr.bf16.mxu1 %v582_v14 }
   0xe   :  { %43 = vperm.xlu0 %560, %v23_v27  }
  0x10   :  { %144 = vmatpush1.bf16.msra.mxu0 %v584_v15  ;;  %296 = vmatpush1.bf16.msra.mxu1 %v585_v16 }
  0x11   :  { %145 = vmatprep.subr.bf16.mxu0 %v586_v17  ;;  %297 = vmatprep.subr.bf16.mxu1 %v588_v18 }
  0x12   :  { %48 = vperm.xlu0 %560, %v24_v30  }
  0x14   :  { %146 = vmatpush1.bf16.msra.mxu0 %v590_v19  ;;  %298 = vmatpush1.bf16.msra.mxu1 %v591_v20 }
  0x15   :  { %147 = vmatprep.subr.bf16.mxu0 %v592_v21  ;;  %299 = vmatprep.subr.bf16.mxu1 %v594_v22 }
  0x18   :  { %148 = vmatpush1.bf16.msra.mxu0 %v596_v23  ;;  %300 = vmatpush1.bf16.msra.mxu1 %v597_v24 }
  0x19   :  { %149 = vmatprep.subr.bf16.mxu0 %v598_v25  ;;  %301 = vmatprep.subr.bf16.mxu1 %v600_v26 }
  0x1c   :  { %150 = vmatpush1.bf16.msra.mxu0 %v602_v28  ;;  %302 = vmatpush1.bf16.msra.mxu1 %v603_v29 }
  0x1d   :  { %151 = vmatprep.subr.bf16.mxu0 %v604_v31  ;;  %303 = vmatprep.subr.bf16.mxu1 %v606_v32  ;;  %v393_v32 = vld [vmem:[%s818_s3] sm:$0xff] }
  0x20   :  { %152 = vmatpush1.bf16.msra.mxu0 %v608_v33  ;;  %304 = vmatpush1.bf16.msra.mxu1 %v609_v34 }
  0x23   :  { %170 = vmatmul.mubr.bf16.vlgmr.msra.gmra.mrb[0].mxu0 %v610_v35  ;;  %322 = vmatmul.mubr.bf16.vlgmr.msra.gmra.mrb[0].mxu1 %v610_v35  ;;  %v397_v35 = vld [vmem:[%s819_s4] sm:$0xff] }
  0x8d   :  { %v44_v36 = vpop.permute.xlu0 %43 }
  0x91   :  { %v49_v37 = vpop.permute.xlu0 %48 }
  0xf6   :  { %v171_v38 = vpop.f32.mrb[0].mxu0  ;;  %v323_v39 = vpop.f32.mrb[0].mxu1 }
  0xf7   :  { %v751_v40 = vadd.f32 %v171_v38, %v44_v36  ;;  %v753_v41 = vadd.f32 %v323_v39, %v44_v36  ;;  %v173_v42 = vpop.f32.mrb[1].mxu0  ;;  %v325_v43 = vpop.f32.mrb[1].mxu1  ;;  %v394_v38 = vld [vmem:[%s818_s3 + $0x8] sm:$0xff] }
  0xf8   :  { %v755_v44 = vadd.f32 %v173_v42, %v44_v36  ;;  %v757_v45 = vadd.f32 %v325_v43, %v44_v36  ;;  %v175_v46 = vpop.f32.mrb[2].mxu0  ;;  %v327_v47 = vpop.f32.mrb[2].mxu1  ;;  %v398_v43 = vld [vmem:[%s819_s4 + $0x8] sm:$0xff] }
  0xf9   :  { %v177_v48 = vpop.f32.mrb[3].mxu0  ;;  %v329_v49 = vpop.f32.mrb[3].mxu1  ;;  %v759_v50 = vadd.f32 %v175_v46, %v49_v37  ;;  %v767_v54 = vadd.f32 %v327_v47, %v49_v37 }
  0xfa   :  { %v761_v51 = vadd.f32 %v177_v48, %v49_v37  ;;  %v337_v52 = vadd.f32 %v757_v45, %v753_v41  ;;  %v184_v53 = vadd.f32 %v755_v44, %v751_v40  ;;  %v769_v55 = vadd.f32 %v329_v49, %v49_v37 }
  0xfc   :  { %338 = vadd.xlane.f32.xlu0 %v337_v52  ;;  %185 = vadd.xlane.f32.xlu1 %v184_v53  ;;  %v187_v56 = vadd.f32 %v761_v51, %v759_v50  ;;  %v340_v57 = vadd.f32 %v769_v55, %v767_v54 }
 0x100   :  { %188 = vadd.xlane.f32.xlu1 %v187_v56 }
 0x104   :  { %341 = vadd.xlane.f32.xlu1 %v340_v57 }
 0x189   :  { %v339_v58 = vpop.xlane.xlu0 %338  ;;  %v186_v59 = vpop.xlane.xlu1 %185 }
 0x18a   :  { %v343_v60 = vadd.f32 %v339_v58, %v186_v59 }
 0x18c   :  { %v345_v61 = vmul.f32 0.001953125, %v343_v60 }
 0x18d   :  { %v189_v62 = vpop.xlane.xlu1 %188 }
 0x18e   :  { %v351_v63 = vsub.f32 %v751_v40, %v345_v61  ;;  %v352_v0 = vsub.f32 %v755_v44, %v345_v61  ;;  %v371_v1 = vsub.f32 %v753_v41, %v345_v61  ;;  %v372_v2 = vsub.f32 %v757_v45, %v345_v61 }
 0x190   :  { %v355_v3 = vmul.f32 %v351_v63, %v351_v63  ;;  %v356_v4 = vmul.f32 %v352_v0, %v352_v0  ;;  %v375_v6 = vmul.f32 %v371_v1, %v371_v1  ;;  %v376_v7 = vmul.f32 %v372_v2, %v372_v2 }
 0x191   :  { %v342_v5 = vpop.xlane.xlu1 %341 }
 0x192   :  { %v344_v8 = vadd.f32 %v342_v5, %v189_v62  ;;  %v359_v9 = vadd.f32 %v356_v4, %v355_v3  ;;  %v379_v11 = vadd.f32 %v376_v7, %v375_v6 }
 0x194   :  { %v346_v10 = vmul.f32 0.001953125, %v344_v8  ;;  %360 = vadd.xlane.f32.xlu1 %v359_v9 }
 0x196   :  { %v353_v12 = vsub.f32 %v759_v50, %v346_v10  ;;  %v354_v13 = vsub.f32 %v761_v51, %v346_v10  ;;  %v373_v14 = vsub.f32 %v767_v54, %v346_v10  ;;  %v374_v15 = vsub.f32 %v769_v55, %v346_v10 }
 0x198   :  { %380 = vadd.xlane.f32.xlu1 %v379_v11  ;;  %v357_v16 = vmul.f32 %v353_v12, %v353_v12  ;;  %v358_v17 = vmul.f32 %v354_v13, %v354_v13  ;;  %v377_v19 = vmul.f32 %v373_v14, %v373_v14  ;;  %v378_v20 = vmul.f32 %v374_v15, %v374_v15 }
 0x19a   :  { %v362_v18 = vadd.f32 %v358_v17, %v357_v16  ;;  %v382_v21 = vadd.f32 %v378_v20, %v377_v19 }
 0x19c   :  { %363 = vadd.xlane.f32.xlu1 %v362_v18 }
 0x1a0   :  { %383 = vadd.xlane.f32.xlu1 %v382_v21 }
 0x221   :  { %v361_v22 = vpop.xlane.xlu1 %360 }
 0x225   :  { %v381_v23 = vpop.xlane.xlu1 %380 }
 0x226   :  { %v385_v24 = vadd.f32 %v381_v23, %v361_v22 }
 0x228   :  { %v387_v25 = vmul.f32 0.001953125, %v385_v24 }
 0x229   :  { %v364_v26 = vpop.xlane.xlu1 %363 }
 0x22a   :  { %v389_v27 = vadd.f32 1e-05, %v387_v25 }
 0x22c   :  { %611 = vrsqrt.f32 %v389_v27 }
 0x22d   :  { %v384_v28 = vpop.xlane.xlu1 %383 }
 0x22e   :  { %v386_v29 = vadd.f32 %v384_v28, %v364_v26 }
 0x230   :  { %v388_v30 = vmul.f32 0.001953125, %v386_v29 }
 0x232   :  { %v390_v31 = vadd.f32 1e-05, %v388_v30 }
 0x234   :  { %613 = vrsqrt.f32 %v390_v31 }
 0x236   :  { %v612_v33 = vpop.eup %611 }
 0x237   :  { %v395_v34 = vmul.f32 %v612_v33, %v393_v32 }
 0x239   :  { %405 = vperm.xlu1 %561, %v395_v34   ;;  %v399_v36 = vmul.f32 %v395_v34, %v345_v61 }
 0x23b   :  { %v401_v37 = vsub.f32 %v397_v35, %v399_v36 }
 0x23d   :  { %419 = vperm.xlu1 %561, %v401_v37  }
 0x23e   :  { %v614_v39 = vpop.eup %613 }
 0x23f   :  { %v396_v42 = vmul.f32 %v614_v39, %v394_v38 }
 0x241   :  { %410 = vperm.xlu0 %560, %v396_v42   ;;  %v400_v46 = vmul.f32 %v396_v42, %v346_v10 }
 0x243   :  { %v402_v47 = vsub.f32 %v398_v43, %v400_v46 }
 0x245   :  { %424 = vperm.xlu1 %561, %v402_v47  }
 0x2b8   :  { %v406_v48 = vpop.permute.xlu1 %405 }
 0x2b9   :  { %v413_v49 = vmul.f32 %v406_v48, %v751_v40  ;;  %v414_v52 = vmul.f32 %v406_v48, %v755_v44  ;;  %v461_v53 = vmul.f32 %v406_v48, %v753_v41  ;;  %v462_v56 = vmul.f32 %v406_v48, %v757_v45 }
 0x2bc   :  { %v420_v57 = vpop.permute.xlu1 %419 }
 0x2bd   :  { %v427_v58 = vadd.f32 %v420_v57, %v413_v49  ;;  %v428_v59 = vadd.f32 %v420_v57, %v414_v52  ;;  %v465_v60 = vadd.f32 %v461_v53, %v420_v57  ;;  %v466_v61 = vadd.f32 %v462_v56, %v420_v57 }
 0x2bf   :  { %vm431_vm0 = vcmp.ge.f32.partialorder %v427_v58, 0.0  ;;  %vm432_vm1 = vcmp.ge.f32.partialorder %v428_v59, 0.0  ;;  %v435_v62 = vmul.f32 0.2, %v427_v58  ;;  %v436_v63 = vmul.f32 0.2, %v428_v59 }
 0x2c0   :  { %vm469_vm2 = vcmp.ge.f32.partialorder %v465_v60, 0.0  ;;  %vm470_vm3 = vcmp.ge.f32.partialorder %v466_v61, 0.0  ;;  %v473_v0 = vmul.f32 0.2, %v465_v60  ;;  %v474_v1 = vmul.f32 0.2, %v466_v61  ;;  %v411_v40 = vpop.permute.xlu0 %410 }
 0x2c1   :  { %v439_v2 = vsel %vm431_vm0, %v427_v58, %v435_v62  ;;  %v440_v44 = vsel %vm432_vm1, %v428_v59, %v436_v63  ;;  %v415_v45 = vmul.f32 %v411_v40, %v759_v50  ;;  %v416_v6 = vmul.f32 %v411_v40, %v761_v51 }
 0x2c2   :  { %v555_v3 = vpack.c.bf16 %v440_v44, %v439_v2  ;;  %v477_v41 = vsel %vm469_vm2, %v465_v60, %v473_v0  ;;  %v478_v4 = vsel %vm470_vm3, %v466_v61, %v474_v1  ;;  %v463_v7 = vmul.f32 %v411_v40, %v767_v54 }
 0x2c3   :  { %v557_v5 = vpack.c.bf16 %v478_v4, %v477_v41  ;;  %v464_v8 = vmul.f32 %v411_v40, %v769_v55 }
 0x2c4   :  { %455 = vst [vmem:[%s820_s5] sm:$0xff] %v555_v3  ;;  %v425_v9 = vpop.permute.xlu1 %424 }
 0x2c5   :  { %553 = vst [vmem:[%s820_s5 + $0x10] sm:$0xff] %v557_v5  ;;  %v429_v10 = vadd.f32 %v425_v9, %v415_v45  ;;  %v430_v11 = vadd.f32 %v425_v9, %v416_v6  ;;  %v467_v12 = vadd.f32 %v463_v7, %v425_v9  ;;  %v468_v50 = vadd.f32 %v464_v8, %v425_v9 }
 0x2c7   :  { %vm433_vm4 = vcmp.ge.f32.partialorder %v429_v10, 0.0  ;;  %vm434_vm5 = vcmp.ge.f32.partialorder %v430_v11, 0.0  ;;  %v437_v51 = vmul.f32 0.2, %v429_v10  ;;  %v438_v13 = vmul.f32 0.2, %v430_v11 }
 0x2c8   :  { %vm471_vm6 = vcmp.ge.f32.partialorder %v467_v12, 0.0  ;;  %vm472_vm7 = vcmp.ge.f32.partialorder %v468_v50, 0.0  ;;  %v475_v54 = vmul.f32 0.2, %v467_v12  ;;  %v476_v55 = vmul.f32 0.2, %v468_v50 }
 0x2c9   :  { %v441_v14 = vsel %vm433_vm4, %v429_v10, %v437_v51  ;;  %v442_v15 = vsel %vm434_vm5, %v430_v11, %v438_v13 }
 0x2ca   :  { %v556_v16 = vpack.c.bf16 %v442_v15, %v441_v14  ;;  %v479_v17 = vsel %vm471_vm6, %v467_v12, %v475_v54  ;;  %v480_v18 = vsel %vm472_vm7, %v468_v50, %v476_v55 }
 0x2cb   :  { %v558_v19 = vpack.c.bf16 %v480_v18, %v479_v17 }
 0x2cc   :  { %456 = vst [vmem:[%s820_s5 + $0x8] sm:$0xff] %v556_v16 }
 0x2cd   :  { %554 = vst [vmem:[%s820_s5 + $0x18] sm:$0xff] %v558_v19 }

// kernel: image_classifier_forward.8
= control target key start
LH: loop header
LB: loop body
LE: loop exit
PB: predicated region body
PF: predicated region fallthrough
CT: control target
= control target key end

     0   :  { %v881_v1 = vmov 0   ;;  %vm246_vm0 = vcmask 523264   ;;  %vm634_vm1 = vcmask 519168   ;;  %s1164_s0 = inlined_call_operand.vmem [shape: bf16[2,256,64], index: 0, kind: input, shape index: {}]   ;;  %s1165_s1 = inlined_call_operand.vmem [shape: bf16[32,256], index: 1, kind: input, shape index: {}]   ;;  %s1166_s2 = inlined_call_operand.vmem [shape: f32[32,1], index: 2, kind: input, shape index: {}]   ;;  %s1167_s3 = inlined_call_operand.vmem [shape: f32[32,1], index: 3, kind: input, shape index: {}]   ;;  %s1168_s4 = inlined_call_operand.vmem [shape: f32[32,1], index: 4, kind: input, shape index: {}]   ;;  %s1169_s5 = inlined_call_operand.vmem [shape: bf16[2,32,64], index: 5, kind: output, shape index: {}]  }
   0x1   :  { %v835_v0 = vld [vmem:[%s1164_s0 + $0x40] sm:$0xff]   ;;  %833 = vset.pattern.permute.xlu0 %v881_v1  ;;  %834 = vset.pattern.permute.xlu1 %v881_v1  ;;  %v839_v5 = vld [vmem:[%s1164_s0 + $0x48] sm:$0xff]   ;;  %v843_v9 = vld [vmem:[%s1164_s0 + $0x50] sm:$0xff]  }
   0x2   :  { %v836_v2 = vld [vmem:[%s1164_s0 + $0xc0] sm:$0xff]   ;;  %776 = vmatprep.subr.bf16.mxu0 %v835_v0  ;;  %v840_v6 = vld [vmem:[%s1164_s0 + $0xc8] sm:$0xff]   ;;  %v844_v10 = vld [vmem:[%s1164_s0 + $0xd0] sm:$0xff]  }
   0x3   :  { %v837_v3 = vld [vmem:[%s1164_s0] sm:$0xff]   ;;  %804 = vmatprep.subr.bf16.mxu1 %v836_v2  ;;  %v841_v7 = vld [vmem:[%s1164_s0 + $0x8] sm:$0xff]   ;;  %v845_v11 = vld [vmem:[%s1164_s0 + $0x10] sm:$0xff]  }
   0x4   :  { %v838_v4 = vld [vmem:[%s1164_s0 + $0x80] sm:$0xff]   ;;  %777 = vmatpush3.bf16.msra.mxu0 %v837_v3  ;;  %v842_v8 = vld [vmem:[%s1164_s0 + $0x88] sm:$0xff]   ;;  %v846_v12 = vld [vmem:[%s1164_s0 + $0x90] sm:$0xff]  }
   0x5   :  { %805 = vmatpush3.bf16.msra.mxu1 %v838_v4  ;;  %778 = vmatprep.subr.bf16.mxu0 %v839_v5  ;;  %v847_v13 = vld [vmem:[%s1164_s0 + $0x58] sm:$0xff]   ;;  %v851_v17 = vld [vmem:[%s1164_s0 + $0x60] sm:$0xff]   ;;  %v855_v21 = vld [vmem:[%s1164_s0 + $0x68] sm:$0xff]  }
   0x6   :  { %806 = vmatprep.subr.bf16.mxu1 %v840_v6  ;;  %v848_v14 = vld [vmem:[%s1164_s0 + $0xd8] sm:$0xff]   ;;  %v852_v18 = vld [vmem:[%s1164_s0 + $0xe0] sm:$0xff]   ;;  %v856_v22 = vld [vmem:[%s1164_s0 + $0xe8] sm:$0xff]  }
   0x7   :  { %v849_v15 = vld [vmem:[%s1164_s0 + $0x18] sm:$0xff]   ;;  %v853_v19 = vld [vmem:[%s1164_s0 + $0x20] sm:$0xff]   ;;  %v857_v23 = vld [vmem:[%s1164_s0 + $0x28] sm:$0xff]  }
   0x8   :  { %779 = vmatpush3.bf16.msra.mxu0 %v841_v7  ;;  %v850_v16 = vld [vmem:[%s1164_s0 + $0x98] sm:$0xff]   ;;  %v854_v20 = vld [vmem:[%s1164_s0 + $0xa0] sm:$0xff]   ;;  %v858_v24 = vld [vmem:[%s1164_s0 + $0xa8] sm:$0xff]  }
   0x9   :  { %807 = vmatpush3.bf16.msra.mxu1 %v842_v8  ;;  %780 = vmatprep.subr.bf16.mxu0 %v843_v9  ;;  %v859_v25 = vld [vmem:[%s1164_s0 + $0x70] sm:$0xff]   ;;  %v863_v29 = vld [vmem:[%s1164_s0 + $0x78] sm:$0xff]   ;;  %v867_v33 = vld [vmem:[%s1165_s1] ss:$8 sps:$4 sm:$0xff]  }
   0xa   :  { %808 = vmatprep.subr.bf16.mxu1 %v844_v10  ;;  %v860_v26 = vld [vmem:[%s1164_s0 + $0xf0] sm:$0xff]   ;;  %v864_v30 = vld [vmem:[%s1164_s0 + $0xf8] sm:$0xff]   ;;  %v869_v34 = vld [vmem:[%s1165_s1 + $0x4] ss:$8 sps:$4 sm:$0xff]  }
   0xb   :  { %v861_v27 = vld [vmem:[%s1164_s0 + $0x30] sm:$0xff]   ;;  %v865_v31 = vld [vmem:[%s1164_s0 + $0x38] sm:$0xff]   ;;  %229 = vmatprep.mubr.bf16.mxu0 %v869_v34  ;;  %428 = vmatprep.mubr.bf16.mxu1 %v869_v34  ;;  %v25_v36 = vld [vmem:[%s1166_s2] sm:$0xff] }
   0xc   :  { %781 = vmatpush3.bf16.msra.mxu0 %v845_v11  ;;  %v862_v28 = vld [vmem:[%s1164_s0 + $0xb0] sm:$0xff]   ;;  %v866_v32 = vld [vmem:[%s1164_s0 + $0xb8] sm:$0xff]   ;;  %63 = vperm.xlu0 %833, %v25_v36   ;;  %v26_v38 = vld [vmem:[%s1166_s2 + $0x8] sm:$0xff] }
   0xd   :  { %809 = vmatpush3.bf16.msra.mxu1 %v846_v12  ;;  %782 = vmatprep.subr.bf16.mxu0 %v847_v13  ;;  %v870_v35 = vld [vmem:[%s1165_s1 + $0x14] ss:$8 sps:$4 sm:$0xff]   ;;  %v872_v40 = vld [vmem:[%s1165_s1 + $0x10] ss:$8 sps:$4 sm:$0xff]  }
   0xe   :  { %810 = vmatprep.subr.bf16.mxu1 %v848_v14  ;;  %v27_v37 = vld [vmem:[%s1166_s2 + $0x10] sm:$0xff]  ;;  %v28_v39 = vld [vmem:[%s1166_s2 + $0x18] sm:$0xff] }
   0xf   :  { %73 = vperm.xlu1 %834, %v27_v37  }
  0x10   :  { %783 = vmatpush3.bf16.msra.mxu0 %v849_v15  ;;  %68 = vperm.xlu0 %833, %v26_v38  }
  0x11   :  { %811 = vmatpush3.bf16.msra.mxu1 %v850_v16  ;;  %784 = vmatprep.subr.bf16.mxu0 %v851_v17 }
  0x12   :  { %812 = vmatprep.subr.bf16.mxu1 %v852_v18 }
  0x13   :  { %78 = vperm.xlu1 %834, %v28_v39  }
  0x14   :  { %785 = vmatpush3.bf16.msra.mxu0 %v853_v19 }
  0x15   :  { %813 = vmatpush3.bf16.msra.mxu1 %v854_v20  ;;  %786 = vmatprep.subr.bf16.mxu0 %v855_v21 }
  0x16   :  { %814 = vmatprep.subr.bf16.mxu1 %v856_v22 }
  0x18   :  { %787 = vmatpush3.bf16.msra.mxu0 %v857_v23 }
  0x19   :  { %815 = vmatpush3.bf16.msra.mxu1 %v858_v24  ;;  %788 = vmatprep.subr.bf16.mxu0 %v859_v25 }
  0x1a   :  { %816 = vmatprep.subr.bf16.mxu1 %v860_v26 }
  0x1c   :  { %789 = vmatpush3.bf16.msra.mxu0 %v861_v27 }
  0x1d   :  { %817 = vmatpush3.bf16.msra.mxu1 %v862_v28  ;;  %790 = vmatprep.subr.bf16.mxu0 %v863_v29 }
  0x1e   :  { %818 = vmatprep.subr.bf16.mxu1 %v864_v30 }
  0x20   :  { %791 = vmatpush3.bf16.msra.mxu0 %v865_v31 }
  0x21   :  { %819 = vmatpush3.bf16.msra.mxu1 %v866_v32 }
  0x23   :  { %230 = vmatmul.mubr.bf16.vlgmr.msra.gmra.mrb[0].mxu0 %v867_v33 }
  0x24   :  { %429 = vmatmul.mubr.bf16.vlgmr.msra.gmra.mrb[0].mxu1 %v867_v33  ;;  %237 = vmatprep.mubr.bf16.mxu0 %v870_v35 }
  0x25   :  { %436 = vmatprep.mubr.bf16.mxu1 %v870_v35 }
  0x2b   :  { %238 = vmatmul.mubr.bf16.gmra.mrb[4].mxu0 %v872_v40 }
  0x2c   :  { %437 = vmatmul.mubr.bf16.gmra.mrb[4].mxu1 %v872_v40 }
  0x8b   :  { %v64_v41 = vpop.permute.xlu0 %63 }
  0x8e   :  { %v74_v61 = vpop.permute.xlu1 %73 }
  0x8f   :  { %v69_v56 = vpop.permute.xlu0 %68 }
  0x92   :  { %v79_v14 = vpop.permute.xlu1 %78 }
  0xf6   :  { %v792_v42 = vpop.f32.mrb[0].mxu0 }
  0xf7   :  { %v820_v43 = vpop.f32.mrb[0].mxu1  ;;  %v793_v44 = vpop.f32.mrb[1].mxu0 }
  0xf8   :  { %v821_v45 = vpop.f32.mrb[1].mxu1  ;;  %v794_v46 = vadd.f32 %v793_v44, %v792_v42  ;;  %v795_v48 = vpop.f32.mrb[2].mxu0 }
  0xf9   :  { %v822_v47 = vadd.f32 %v821_v45, %v820_v43  ;;  %v823_v49 = vpop.f32.mrb[2].mxu1  ;;  %v796_v50 = vpop.f32.mrb[3].mxu0 }
  0xfa   :  { %v824_v51 = vpop.f32.mrb[3].mxu1  ;;  %v797_v52 = vadd.f32 %v796_v50, %v795_v48  ;;  %v232_v55 = vadd.f32 %v794_v46, %v64_v41 }
  0xfb   :  { %v825_v53 = vadd.f32 %v824_v51, %v823_v49  ;;  %v431_v54 = vadd.f32 %v822_v47, %v64_v41 }
  0xfc   :  { %v251_v58 = vsel %vm246_vm0, %v232_v55, 0.0  ;;  %247 = vst.msk [vmem:[#allocation2] sm:$0xff] %vm246_vm0, %v232_v55  ;;  %v235_v59 = vadd.f32 %v797_v52, %v69_v56 }
  0xfd   :  { %v450_v57 = vsel %vm246_vm0, %v431_v54, 0.0  ;;  %446 = vst.msk [vmem:[#allocation2 + $0x20] sm:$0xff] %vm246_vm0, %v431_v54  ;;  %v434_v60 = vadd.f32 %v825_v53, %v69_v56  ;;  %252 = vadd.xlane.f32.xlu0 %v251_v58 }
  0xfe   :  { %451 = vadd.xlane.f32.xlu1 %v450_v57  ;;  %v798_v62 = vpop.f32.mrb[4].mxu0  ;;  %248 = vst.msk [vmem:[#allocation2 + $0x8] sm:$0xff] %vm246_vm0, %v235_v59  ;;  %v254_v6 = vsel %vm246_vm0, %v235_v59, 0.0 }
  0xff   :  { %v826_v63 = vpop.f32.mrb[4].mxu1  ;;  %447 = vst.msk [vmem:[#allocation2 + $0x28] sm:$0xff] %vm246_vm0, %v434_v60  ;;  %v799_v0 = vpop.f32.mrb[5].mxu0  ;;  %v453_v7 = vsel %vm246_vm0, %v434_v60, 0.0 }
 0x100   :  { %v827_v1 = vpop.f32.mrb[5].mxu1  ;;  %v800_v2 = vadd.f32 %v799_v0, %v798_v62  ;;  %v801_v4 = vpop.f32.mrb[6].mxu0 }
 0x101   :  { %v828_v3 = vadd.f32 %v827_v1, %v826_v63  ;;  %v829_v5 = vpop.f32.mrb[6].mxu1  ;;  %v802_v8 = vpop.f32.mrb[7].mxu0  ;;  %454 = vadd.xlane.f32.xlu0 %v453_v7 }
 0x102   :  { %v830_v9 = vpop.f32.mrb[7].mxu1  ;;  %255 = vadd.xlane.f32.xlu1 %v254_v6  ;;  %v803_v10 = vadd.f32 %v802_v8, %v801_v4  ;;  %v240_v13 = vadd.f32 %v800_v2, %v74_v61 }
 0x103   :  { %v831_v11 = vadd.f32 %v830_v9, %v829_v5  ;;  %v439_v12 = vadd.f32 %v828_v3, %v74_v61  ;;  %v1050_v27 = vld [vmem:[#allocation2] sm:$0xff] }
 0x104   :  { %249 = vst.msk [vmem:[#allocation2 + $0x10] sm:$0xff] %vm246_vm0, %v240_v13  ;;  %v257_v16 = vsel %vm246_vm0, %v240_v13, 0.0  ;;  %v243_v17 = vadd.f32 %v803_v10, %v79_v14  ;;  %v1052_v28 = vld [vmem:[#allocation2 + $0x20] sm:$0xff] }
 0x105   :  { %448 = vst.msk [vmem:[#allocation2 + $0x30] sm:$0xff] %vm246_vm0, %v439_v12  ;;  %v456_v15 = vsel %vm246_vm0, %v439_v12, 0.0  ;;  %v442_v18 = vadd.f32 %v831_v11, %v79_v14  ;;  %258 = vadd.xlane.f32.xlu0 %v257_v16  ;;  %v1060_v36 = vld [vmem:[#allocation2 + $0x8] sm:$0xff] }
 0x106   :  { %457 = vadd.xlane.f32.xlu1 %v456_v15  ;;  %250 = vst.msk [vmem:[#allocation2 + $0x18] sm:$0xff] %vm246_vm0, %v243_v17  ;;  %v260_v19 = vsel %vm246_vm0, %v243_v17, 0.0  ;;  %v1065_v41 = vld [vmem:[#allocation2 + $0x28] sm:$0xff] }
 0x107   :  { %449 = vst.msk [vmem:[#allocation2 + $0x38] sm:$0xff] %vm246_vm0, %v442_v18  ;;  %v459_v20 = vsel %vm246_vm0, %v442_v18, 0.0 }
 0x109   :  { %261 = vadd.xlane.f32.xlu0 %v260_v19 }
 0x10b   :  { %v1072_v47 = vld [vmem:[#allocation2 + $0x10] sm:$0xff] }
 0x10c   :  { %v1074_v48 = vld [vmem:[#allocation2 + $0x30] sm:$0xff] }
 0x10d   :  { %460 = vadd.xlane.f32.xlu0 %v459_v20  ;;  %v1085_v60 = vld [vmem:[#allocation2 + $0x18] sm:$0xff] }
 0x10e   :  { %v1087_v61 = vld [vmem:[#allocation2 + $0x38] sm:$0xff] }
 0x18a   :  { %v253_v22 = vpop.xlane.xlu0 %252 }
 0x18b   :  { %v452_v21 = vpop.xlane.xlu1 %451 }
 0x18c   :  { %v462_v23 = vadd.f32 %v452_v21, %v253_v22  ;;  %v538_v21 = vld [vmem:[%s1167_s3] sm:$0xff] }
 0x18e   :  { %v1048_v24 = vmul.f32 0.0078125, %v462_v23  ;;  %v455_v26 = vpop.xlane.xlu0 %454 }
 0x18f   :  { %v256_v25 = vpop.xlane.xlu1 %255 }
 0x190   :  { %v463_v29 = vadd.f32 %v455_v26, %v256_v25  ;;  %v474_v30 = vsub.f32 %v1050_v27, %v1048_v24  ;;  %v502_v31 = vsub.f32 %v1052_v28, %v1048_v24 }
 0x192   :  { %v1058_v32 = vmul.f32 0.0078125, %v463_v29  ;;  %v478_v33 = vmul.f32 %v474_v30, %v474_v30  ;;  %v259_v35 = vpop.xlane.xlu0 %258  ;;  %v506_v37 = vmul.f32 %v502_v31, %v502_v31  ;;  %v539_v30 = vld [vmem:[%s1167_s3 + $0x8] sm:$0xff] }
 0x193   :  { %v458_v34 = vpop.xlane.xlu1 %457 }
 0x194   :  { %v464_v38 = vadd.f32 %v458_v34, %v259_v35  ;;  %v482_v39 = vsel %vm246_vm0, %v478_v33, 0.0  ;;  %v475_v40 = vsub.f32 %v1060_v36, %v1058_v32  ;;  %v503_v42 = vsub.f32 %v1065_v41, %v1058_v32 }
 0x195   :  { %483 = vadd.xlane.f32.xlu1 %v482_v39  ;;  %v510_v46 = vsel %vm246_vm0, %v506_v37, 0.0  ;;  %v547_v37 = vld [vmem:[%s1168_s4 + $0x8] sm:$0xff]  ;;  %v540_v39 = vld [vmem:[%s1167_s3 + $0x10] sm:$0xff] }
 0x196   :  { %v1069_v43 = vmul.f32 0.0078125, %v464_v38  ;;  %v479_v44 = vmul.f32 %v475_v40, %v475_v40  ;;  %v262_v45 = vpop.xlane.xlu0 %261  ;;  %v507_v50 = vmul.f32 %v503_v42, %v503_v42  ;;  %v546_v38 = vld [vmem:[%s1168_s4] sm:$0xff] }
 0x198   :  { %v485_v49 = vsel %vm246_vm0, %v479_v44, 0.0  ;;  %v476_v51 = vsub.f32 %v1072_v47, %v1069_v43  ;;  %v504_v52 = vsub.f32 %v1074_v48, %v1069_v43  ;;  %v513_v56 = vsel %vm246_vm0, %v507_v50, 0.0 }
 0x199   :  { %486 = vadd.xlane.f32.xlu0 %v485_v49  ;;  %511 = vadd.xlane.f32.xlu1 %v510_v46  ;;  %v548_v46 = vld [vmem:[%s1168_s4 + $0x10] sm:$0xff] }
 0x19a   :  { %v480_v53 = vmul.f32 %v476_v51, %v476_v51  ;;  %v461_v54 = vpop.xlane.xlu0 %460  ;;  %v508_v58 = vmul.f32 %v504_v52, %v504_v52  ;;  %v541_v51 = vld [vmem:[%s1167_s3 + $0x18] sm:$0xff] }
 0x19b   :  { %v465_v55 = vadd.f32 %v461_v54, %v262_v45 }
 0x19c   :  { %v488_v57 = vsel %vm246_vm0, %v480_v53, 0.0  ;;  %v516_v62 = vsel %vm246_vm0, %v508_v58, 0.0  ;;  %v549_v53 = vld [vmem:[%s1168_s4 + $0x18] sm:$0xff] }
 0x19d   :  { %514 = vadd.xlane.f32.xlu0 %v513_v56  ;;  %489 = vadd.xlane.f32.xlu1 %v488_v57  ;;  %v1083_v59 = vmul.f32 0.0078125, %v465_v55 }
 0x19f   :  { %v477_v63 = vsub.f32 %v1085_v60, %v1083_v59  ;;  %v505_v0 = vsub.f32 %v1087_v61, %v1083_v59 }
 0x1a1   :  { %517 = vadd.xlane.f32.xlu1 %v516_v62  ;;  %v481_v1 = vmul.f32 %v477_v63, %v477_v63  ;;  %v509_v3 = vmul.f32 %v505_v0, %v505_v0 }
 0x1a3   :  { %v491_v2 = vsel %vm246_vm0, %v481_v1, 0.0  ;;  %v519_v4 = vsel %vm246_vm0, %v509_v3, 0.0 }
 0x1a4   :  { %492 = vadd.xlane.f32.xlu0 %v491_v2 }
 0x1a8   :  { %520 = vadd.xlane.f32.xlu0 %v519_v4 }
 0x222   :  { %v484_v5 = vpop.xlane.xlu1 %483 }
 0x226   :  { %v487_v6 = vpop.xlane.xlu0 %486  ;;  %v512_v7 = vpop.xlane.xlu1 %511 }
 0x227   :  { %v522_v8 = vadd.f32 %v512_v7, %v484_v5 }
 0x229   :  { %v526_v9 = vmul.f32 0.0078125, %v522_v8 }
 0x22a   :  { %v515_v10 = vpop.xlane.xlu0 %514  ;;  %v490_v11 = vpop.xlane.xlu1 %489 }
 0x22b   :  { %v530_v12 = vadd.f32 1e-05, %v526_v9  ;;  %v523_v13 = vadd.f32 %v515_v10, %v487_v6 }
 0x22d   :  { %873 = vrsqrt.f32 %v530_v12  ;;  %v527_v14 = vmul.f32 0.0078125, %v523_v13 }
 0x22e   :  { %v518_v15 = vpop.xlane.xlu1 %517 }
 0x22f   :  { %v531_v16 = vadd.f32 1e-05, %v527_v14  ;;  %v524_v17 = vadd.f32 %v518_v15, %v490_v11 }
 0x231   :  { %875 = vrsqrt.f32 %v531_v16  ;;  %v528_v18 = vmul.f32 0.0078125, %v524_v17  ;;  %v493_v19 = vpop.xlane.xlu0 %492 }
 0x233   :  { %v532_v20 = vadd.f32 1e-05, %v528_v18 }
 0x235   :  { %877 = vrsqrt.f32 %v532_v20  ;;  %v521_v22 = vpop.xlane.xlu0 %520 }
 0x236   :  { %v525_v25 = vadd.f32 %v521_v22, %v493_v19 }
 0x237   :  { %v874_v23 = vpop.eup %873 }
 0x238   :  { %v542_v26 = vmul.f32 %v874_v23, %v538_v21  ;;  %v529_v29 = vmul.f32 0.0078125, %v525_v25 }
 0x23a   :  { %560 = vperm.xlu1 %834, %v542_v26   ;;  %v533_v33 = vadd.f32 1e-05, %v529_v29  ;;  %v550_v35 = vmul.f32 %v542_v26, %v1048_v24 }
 0x23b   :  { %v876_v31 = vpop.eup %875 }
 0x23c   :  { %v543_v34 = vmul.f32 %v876_v31, %v539_v30  ;;  %879 = vrsqrt.f32 %v533_v33  ;;  %v554_v45 = vsub.f32 %v546_v38, %v550_v35 }
 0x23e   :  { %565 = vperm.xlu0 %833, %v543_v34   ;;  %v551_v40 = vmul.f32 %v543_v34, %v1058_v32 }
 0x23f   :  { %v878_v42 = vpop.eup %877 }
 0x240   :  { %v555_v44 = vsub.f32 %v547_v37, %v551_v40  ;;  %v544_v24 = vmul.f32 %v878_v42, %v540_v39 }
 0x242   :  { %589 = vperm.xlu1 %834, %v555_v44   ;;  %584 = vperm.xlu0 %833, %v554_v45   ;;  %v552_v49 = vmul.f32 %v544_v24, %v1069_v43 }
 0x244   :  { %v556_v50 = vsub.f32 %v548_v46, %v552_v49 }
 0x246   :  { %570 = vperm.xlu1 %834, %v544_v24   ;;  %594 = vperm.xlu0 %833, %v556_v50   ;;  %v880_v32 = vpop.eup %879 }
 0x247   :  { %v545_v52 = vmul.f32 %v880_v32, %v541_v51 }
 0x249   :  { %v553_v54 = vmul.f32 %v545_v52, %v1083_v59 }
 0x24a   :  { %575 = vperm.xlu1 %834, %v545_v52  }
 0x24b   :  { %v557_v55 = vsub.f32 %v549_v53, %v553_v54 }
 0x24e   :  { %599 = vperm.xlu1 %834, %v557_v55  }
 0x2b9   :  { %v561_v56 = vpop.permute.xlu1 %560 }
 0x2ba   :  { %v578_v57 = vmul.f32 %v561_v56, %v1050_v27  ;;  %v643_v58 = vmul.f32 %v561_v56, %v1052_v28 }
 0x2bd   :  { %v566_v43 = vpop.permute.xlu0 %565 }
 0x2be   :  { %v579_v62 = vmul.f32 %v566_v43, %v1060_v36  ;;  %v644_v63 = vmul.f32 %v566_v43, %v1065_v41 }
 0x2c1   :  { %v585_v0 = vpop.permute.xlu0 %584  ;;  %v590_v1 = vpop.permute.xlu1 %589 }
 0x2c2   :  { %v602_v2 = vadd.f32 %v585_v0, %v578_v57  ;;  %v647_v3 = vadd.f32 %v643_v58, %v585_v0  ;;  %v603_v4 = vadd.f32 %v590_v1, %v579_v62  ;;  %v648_v5 = vadd.f32 %v644_v63, %v590_v1 }
 0x2c4   :  { %vm606_vm2 = vcmp.ge.f32.partialorder %v602_v2, 0.0  ;;  %v610_v59 = vmul.f32 0.2, %v602_v2  ;;  %vm651_vm3 = vcmp.ge.f32.partialorder %v647_v3, 0.0  ;;  %v655_v6 = vmul.f32 0.2, %v647_v3 }
 0x2c5   :  { %vm607_vm4 = vcmp.ge.f32.partialorder %v603_v4, 0.0  ;;  %v611_v7 = vmul.f32 0.2, %v603_v4  ;;  %vm652_vm5 = vcmp.ge.f32.partialorder %v648_v5, 0.0  ;;  %v656_v27 = vmul.f32 0.2, %v648_v5  ;;  %v571_v28 = vpop.permute.xlu1 %570  ;;  %v595_v14 = vpop.permute.xlu0 %594 }
 0x2c6   :  { %v614_v8 = vsel %vm606_vm2, %v602_v2, %v610_v59  ;;  %v659_v36 = vsel %vm651_vm3, %v647_v3, %v655_v6  ;;  %v580_v41 = vmul.f32 %v571_v28, %v1072_v47  ;;  %v645_v9 = vmul.f32 %v571_v28, %v1074_v48 }
 0x2c7   :  { %v768_v10 = vpack.c.bf16 %v614_v8, %v614_v8  ;;  %v772_v11 = vpack.c.bf16 %v659_v36, %v659_v36  ;;  %v615_v12 = vsel %vm607_vm4, %v603_v4, %v611_v7  ;;  %v660_v13 = vsel %vm652_vm5, %v648_v5, %v656_v27 }
 0x2c8   :  { %v769_v15 = vpack.c.bf16 %v615_v12, %v615_v12  ;;  %v773_v16 = vpack.c.bf16 %v660_v13, %v660_v13  ;;  %v604_v17 = vadd.f32 %v595_v14, %v580_v41  ;;  %v649_v18 = vadd.f32 %v645_v9, %v595_v14 }
 0x2c9   :  { %635 = vst.msk [vmem:[%s1169_s5] sm:$0xf] %vm634_vm1, %v768_v10  ;;  %764 = vst.msk [vmem:[%s1169_s5 + $0x10] sm:$0xf] %vm634_vm1, %v772_v11  ;;  %v576_v47 = vpop.permute.xlu1 %575 }
 0x2ca   :  { %636 = vst.msk [vmem:[%s1169_s5 + $0x4] sm:$0xf] %vm634_vm1, %v769_v15  ;;  %765 = vst.msk [vmem:[%s1169_s5 + $0x14] sm:$0xf] %vm634_vm1, %v773_v16  ;;  %vm608_vm6 = vcmp.ge.f32.partialorder %v604_v17, 0.0  ;;  %vm653_vm7 = vcmp.ge.f32.partialorder %v649_v18, 0.0  ;;  %v581_v22 = vmul.f32 %v576_v47, %v1085_v60  ;;  %v646_v23 = vmul.f32 %v576_v47, %v1087_v61 }
 0x2cb   :  { %v612_v48 = vmul.f32 0.2, %v604_v17  ;;  %v657_v19 = vmul.f32 0.2, %v649_v18 }
 0x2cd   :  { %v616_v20 = vsel %vm608_vm6, %v604_v17, %v612_v48  ;;  %v661_v21 = vsel %vm653_vm7, %v649_v18, %v657_v19  ;;  %v600_v29 = vpop.permute.xlu1 %599 }
 0x2ce   :  { %v770_v25 = vpack.c.bf16 %v616_v20, %v616_v20  ;;  %v774_v26 = vpack.c.bf16 %v661_v21, %v661_v21  ;;  %v605_v30 = vadd.f32 %v600_v29, %v581_v22  ;;  %v650_v31 = vadd.f32 %v646_v23, %v600_v29 }
 0x2d0   :  { %637 = vst.msk [vmem:[%s1169_s5 + $0x8] sm:$0xf] %vm634_vm1, %v770_v25  ;;  %766 = vst.msk [vmem:[%s1169_s5 + $0x18] sm:$0xf] %vm634_vm1, %v774_v26  ;;  %vm609_vm8 = vcmp.ge.f32.partialorder %v605_v30, 0.0  ;;  %vm654_vm9 = vcmp.ge.f32.partialorder %v650_v31, 0.0 }
 0x2d1   :  { %v613_v33 = vmul.f32 0.2, %v605_v30  ;;  %v658_v60 = vmul.f32 0.2, %v650_v31 }
 0x2d3   :  { %v617_v61 = vsel %vm609_vm8, %v605_v30, %v613_v33  ;;  %v662_v34 = vsel %vm654_vm9, %v650_v31, %v658_v60 }
 0x2d4   :  { %v771_v35 = vpack.c.bf16 %v617_v61, %v617_v61  ;;  %v775_v37 = vpack.c.bf16 %v662_v34, %v662_v34 }
 0x2d6   :  { %638 = vst.msk [vmem:[%s1169_s5 + $0xc] sm:$0xf] %vm634_vm1, %v771_v35  ;;  %767 = vst.msk [vmem:[%s1169_s5 + $0x1c] sm:$0xf] %vm634_vm1, %v775_v37 }

// kernel: image_classifier_forward.9
= control target key start
LH: loop header
LB: loop body
LE: loop exit
PB: predicated region body
PF: predicated region fallthrough
CT: control target
= control target key end

     0   :  { %v1909_v1 = vmov 0   ;;  %vm551_vm0 = vcmask 130048   ;;  %vm1356_vm1 = vcmask 125952   ;;  %s2554_s0 = inlined_call_operand.vmem [shape: bf16[2,512,16], index: 0, kind: input, shape index: {}]   ;;  %s2555_s1 = inlined_call_operand.vmem [shape: bf16[64,512], index: 1, kind: input, shape index: {}]   ;;  %s2556_s2 = inlined_call_operand.vmem [shape: f32[64,1], index: 2, kind: input, shape index: {}]   ;;  %s2557_s3 = inlined_call_operand.vmem [shape: f32[64,1], index: 3, kind: input, shape index: {}]   ;;  %s2558_s4 = inlined_call_operand.vmem [shape: f32[64,1], index: 4, kind: input, shape index: {}]   ;;  %s2559_s5 = inlined_call_operand.vmem [shape: bf16[2,64,16], index: 5, kind: output, shape index: {}]  }
   0x1   :  { %v1805_v0 = vld [vmem:[%s2554_s0 + $0x40] sm:$0xff]   ;;  %1803 = vset.pattern.permute.xlu0 %v1909_v1  ;;  %1804 = vset.pattern.permute.xlu1 %v1909_v1  ;;  %v1809_v5 = vld [vmem:[%s2554_s0 + $0x48] sm:$0xff]   ;;  %v1813_v9 = vld [vmem:[%s2554_s0 + $0x50] sm:$0xff]  }
   0x2   :  { %v1806_v2 = vld [vmem:[%s2554_s0 + $0xc0] sm:$0xff]   ;;  %1642 = vmatprep.subr.bf16.mxu0 %v1805_v0  ;;  %v1810_v6 = vld [vmem:[%s2554_s0 + $0xc8] sm:$0xff]   ;;  %v1814_v10 = vld [vmem:[%s2554_s0 + $0xd0] sm:$0xff]  }
   0x3   :  { %v1807_v3 = vld [vmem:[%s2554_s0] sm:$0xff]   ;;  %1682 = vmatprep.subr.bf16.mxu1 %v1806_v2  ;;  %v1811_v7 = vld [vmem:[%s2554_s0 + $0x8] sm:$0xff]   ;;  %v1815_v11 = vld [vmem:[%s2554_s0 + $0x10] sm:$0xff]  }
   0x4   :  { %v1808_v4 = vld [vmem:[%s2554_s0 + $0x80] sm:$0xff]   ;;  %1643 = vmatpush3.bf16.msra.mxu0 %v1807_v3  ;;  %v1812_v8 = vld [vmem:[%s2554_s0 + $0x88] sm:$0xff]   ;;  %v1816_v12 = vld [vmem:[%s2554_s0 + $0x90] sm:$0xff]  }
   0x5   :  { %1683 = vmatpush3.bf16.msra.mxu1 %v1808_v4  ;;  %1644 = vmatprep.subr.bf16.mxu0 %v1809_v5  ;;  %v1817_v13 = vld [vmem:[%s2554_s0 + $0x58] sm:$0xff]   ;;  %v1821_v17 = vld [vmem:[%s2554_s0 + $0x60] sm:$0xff]   ;;  %v1825_v21 = vld [vmem:[%s2554_s0 + $0x68] sm:$0xff]  }
   0x6   :  { %1684 = vmatprep.subr.bf16.mxu1 %v1810_v6  ;;  %v1818_v14 = vld [vmem:[%s2554_s0 + $0xd8] sm:$0xff]   ;;  %v1822_v18 = vld [vmem:[%s2554_s0 + $0xe0] sm:$0xff]   ;;  %v1826_v22 = vld [vmem:[%s2554_s0 + $0xe8] sm:$0xff]  }
   0x7   :  { %v1819_v15 = vld [vmem:[%s2554_s0 + $0x18] sm:$0xff]   ;;  %v1823_v19 = vld [vmem:[%s2554_s0 + $0x20] sm:$0xff]   ;;  %v1827_v23 = vld [vmem:[%s2554_s0 + $0x28] sm:$0xff]  }
   0x8   :  { %1645 = vmatpush3.bf16.msra.mxu0 %v1811_v7  ;;  %v1820_v16 = vld [vmem:[%s2554_s0 + $0x98] sm:$0xff]   ;;  %v1824_v20 = vld [vmem:[%s2554_s0 + $0xa0] sm:$0xff]   ;;  %v1828_v24 = vld [vmem:[%s2554_s0 + $0xa8] sm:$0xff]  }
   0x9   :  { %1685 = vmatpush3.bf16.msra.mxu1 %v1812_v8  ;;  %1646 = vmatprep.subr.bf16.mxu0 %v1813_v9  ;;  %v1829_v25 = vld [vmem:[%s2554_s0 + $0x70] sm:$0xff]   ;;  %v1833_v29 = vld [vmem:[%s2554_s0 + $0x78] sm:$0xff]   ;;  %v1843_v37 = vld [vmem:[%s2554_s0 + $0x140] sm:$0xff]  }
   0xa   :  { %1686 = vmatprep.subr.bf16.mxu1 %v1814_v10  ;;  %v1830_v26 = vld [vmem:[%s2554_s0 + $0xf0] sm:$0xff]   ;;  %v1834_v30 = vld [vmem:[%s2554_s0 + $0xf8] sm:$0xff]   ;;  %v1844_v38 = vld [vmem:[%s2554_s0 + $0x1c0] sm:$0xff]  }
   0xb   :  { %v1831_v27 = vld [vmem:[%s2554_s0 + $0x30] sm:$0xff]   ;;  %v1835_v31 = vld [vmem:[%s2554_s0 + $0x38] sm:$0xff]   ;;  %v1845_v39 = vld [vmem:[%s2554_s0 + $0x100] sm:$0xff]  }
   0xc   :  { %1647 = vmatpush3.bf16.msra.mxu0 %v1815_v11  ;;  %v1832_v28 = vld [vmem:[%s2554_s0 + $0xb0] sm:$0xff]   ;;  %v1836_v32 = vld [vmem:[%s2554_s0 + $0xb8] sm:$0xff]   ;;  %v1846_v40 = vld [vmem:[%s2554_s0 + $0x180] sm:$0xff]  }
   0xd   :  { %1687 = vmatpush3.bf16.msra.mxu1 %v1816_v12  ;;  %1648 = vmatprep.subr.bf16.mxu0 %v1817_v13  ;;  %v2039_v33 = vld [vmem:[%s2555_s1] ss:$16 sps:$4 sm:$0xff]   ;;  %v2044_v34 = vld [vmem:[%s2555_s1 + $0x4] ss:$16 sps:$4 sm:$0xff]   ;;  %v2049_v35 = vld [vmem:[%s2555_s1 + $0x8] ss:$16 sps:$4 sm:$0xff]  }
   0xe   :  { %1688 = vmatprep.subr.bf16.mxu1 %v1818_v14  ;;  %v2054_v36 = vld [vmem:[%s2555_s1 + $0xc] ss:$16 sps:$4 sm:$0xff]   ;;  %453 = vmatprep.mubr.bf16.mxu0 %v2044_v34  ;;  %v2087_v45 = vld [vmem:[%s2555_s1 + $0x24] ss:$16 sps:$4 sm:$0xff]   ;;  %v2097_v47 = vld [vmem:[%s2555_s1 + $0x20] ss:$16 sps:$4 sm:$0xff]  }
   0xf   :  { %518 = vmatprep.mubr.bf16.mxu1 %v2054_v36  ;;  %v1847_v41 = vld [vmem:[%s2554_s0 + $0x148] sm:$0xff]   ;;  %v1857_v49 = vld [vmem:[%s2554_s0 + $0x150] sm:$0xff]   ;;  %v1861_v53 = vld [vmem:[%s2554_s0 + $0x158] sm:$0xff]  }
  0x10   :  { %1649 = vmatpush3.bf16.msra.mxu0 %v1819_v15  ;;  %v1848_v42 = vld [vmem:[%s2554_s0 + $0x1c8] sm:$0xff]   ;;  %v1858_v50 = vld [vmem:[%s2554_s0 + $0x1d0] sm:$0xff]   ;;  %v1862_v54 = vld [vmem:[%s2554_s0 + $0x1d8] sm:$0xff]  }
  0x11   :  { %1689 = vmatpush3.bf16.msra.mxu1 %v1820_v16  ;;  %1650 = vmatprep.subr.bf16.mxu0 %v1821_v17  ;;  %v1849_v43 = vld [vmem:[%s2554_s0 + $0x108] sm:$0xff]   ;;  %v1859_v51 = vld [vmem:[%s2554_s0 + $0x110] sm:$0xff]   ;;  %v1863_v55 = vld [vmem:[%s2554_s0 + $0x118] sm:$0xff]  }
  0x12   :  { %1690 = vmatprep.subr.bf16.mxu1 %v1822_v18  ;;  %v1850_v44 = vld [vmem:[%s2554_s0 + $0x188] sm:$0xff]   ;;  %v1860_v52 = vld [vmem:[%s2554_s0 + $0x190] sm:$0xff]   ;;  %v1864_v56 = vld [vmem:[%s2554_s0 + $0x198] sm:$0xff]  }
  0x13   :  { %v2092_v46 = vld [vmem:[%s2555_s1 + $0x2c] ss:$16 sps:$4 sm:$0xff]   ;;  %v2103_v48 = vld [vmem:[%s2555_s1 + $0x28] ss:$16 sps:$4 sm:$0xff]   ;;  %v2135_v57 = vld [vmem:[%s2555_s1 + $0x44] ss:$16 sps:$4 sm:$0xff]  }
  0x14   :  { %1651 = vmatpush3.bf16.msra.mxu0 %v1823_v19  ;;  %v2140_v58 = vld [vmem:[%s2555_s1 + $0x4c] ss:$16 sps:$4 sm:$0xff]   ;;  %v2145_v59 = vld [vmem:[%s2555_s1 + $0x40] ss:$16 sps:$4 sm:$0xff]   ;;  %v2150_v60 = vld [vmem:[%s2555_s1 + $0x48] ss:$16 sps:$4 sm:$0xff]  }
  0x15   :  { %1691 = vmatpush3.bf16.msra.mxu1 %v1824_v20  ;;  %1652 = vmatprep.subr.bf16.mxu0 %v1825_v21  ;;  %v1871_v61 = vld [vmem:[%s2554_s0 + $0x160] sm:$0xff]   ;;  %v1875_v1 = vld [vmem:[%s2554_s0 + $0x168] sm:$0xff]   ;;  %v1885_v9 = vld [vmem:[%s2554_s0 + $0x170] sm:$0xff]  }
  0x16   :  { %1692 = vmatprep.subr.bf16.mxu1 %v1826_v22  ;;  %v1872_v62 = vld [vmem:[%s2554_s0 + $0x1e0] sm:$0xff]   ;;  %v1876_v2 = vld [vmem:[%s2554_s0 + $0x1e8] sm:$0xff]   ;;  %v1886_v10 = vld [vmem:[%s2554_s0 + $0x1f0] sm:$0xff]  }
  0x17   :  { %v1873_v63 = vld [vmem:[%s2554_s0 + $0x120] sm:$0xff]   ;;  %v1877_v3 = vld [vmem:[%s2554_s0 + $0x128] sm:$0xff]   ;;  %v1887_v11 = vld [vmem:[%s2554_s0 + $0x130] sm:$0xff]  }
  0x18   :  { %1653 = vmatpush3.bf16.msra.mxu0 %v1827_v23  ;;  %v1874_v0 = vld [vmem:[%s2554_s0 + $0x1a0] sm:$0xff]   ;;  %v1878_v4 = vld [vmem:[%s2554_s0 + $0x1a8] sm:$0xff]   ;;  %v1888_v12 = vld [vmem:[%s2554_s0 + $0x1b0] sm:$0xff]  }
  0x19   :  { %1693 = vmatpush3.bf16.msra.mxu1 %v1828_v24  ;;  %1654 = vmatprep.subr.bf16.mxu0 %v1829_v25  ;;  %v1879_v5 = vld [vmem:[%s2555_s1 + $0x64] ss:$16 sps:$4 sm:$0xff]   ;;  %v1881_v6 = vld [vmem:[%s2555_s1 + $0x6c] ss:$16 sps:$4 sm:$0xff]   ;;  %v1883_v7 = vld [vmem:[%s2555_s1 + $0x60] ss:$16 sps:$4 sm:$0xff]  }
  0x1a   :  { %1694 = vmatprep.subr.bf16.mxu1 %v1830_v26  ;;  %v1884_v8 = vld [vmem:[%s2555_s1 + $0x68] ss:$16 sps:$4 sm:$0xff]   ;;  %v37_v17 = vld [vmem:[%s2556_s2] sm:$0xff]  ;;  %v39_v18 = vld [vmem:[%s2556_s2 + $0x10] sm:$0xff] }
  0x1b   :  { %v1889_v13 = vld [vmem:[%s2554_s0 + $0x178] sm:$0xff]   ;;  %111 = vperm.xlu0 %1803, %v37_v17   ;;  %121 = vperm.xlu1 %1804, %v39_v18   ;;  %v38_v19 = vld [vmem:[%s2556_s2 + $0x8] sm:$0xff]  ;;  %v41_v21 = vld [vmem:[%s2556_s2 + $0x20] sm:$0xff] }
  0x1c   :  { %1655 = vmatpush3.bf16.msra.mxu0 %v1831_v27  ;;  %v1890_v14 = vld [vmem:[%s2554_s0 + $0x1f8] sm:$0xff]   ;;  %v42_v22 = vld [vmem:[%s2556_s2 + $0x28] sm:$0xff]  ;;  %v43_v23 = vld [vmem:[%s2556_s2 + $0x30] sm:$0xff] }
  0x1d   :  { %1695 = vmatpush3.bf16.msra.mxu1 %v1832_v28  ;;  %1656 = vmatprep.subr.bf16.mxu0 %v1833_v29  ;;  %v1891_v15 = vld [vmem:[%s2554_s0 + $0x138] sm:$0xff]  }
  0x1e   :  { %1696 = vmatprep.subr.bf16.mxu1 %v1834_v30  ;;  %v1892_v16 = vld [vmem:[%s2554_s0 + $0x1b8] sm:$0xff]  }
  0x1f   :  { %v40_v20 = vld [vmem:[%s2556_s2 + $0x18] sm:$0xff]  ;;  %116 = vperm.xlu0 %1803, %v38_v19  }
  0x20   :  { %1657 = vmatpush3.bf16.msra.mxu0 %v1835_v31  ;;  %126 = vperm.xlu1 %1804, %v40_v20   ;;  %v44_v24 = vld [vmem:[%s2556_s2 + $0x38] sm:$0xff] }
  0x21   :  { %1697 = vmatpush3.bf16.msra.mxu1 %v1836_v32  ;;  %1722 = vmatprep.subr.bf16.mxu0 %v1843_v37 }
  0x22   :  { %1762 = vmatprep.subr.bf16.mxu1 %v1844_v38 }
  0x23   :  { %454 = vmatmul.mubr.bf16.vlgmr.msra.gmra.mrb[0].mxu0 %v2039_v33  ;;  %131 = vperm.xlu0 %1803, %v41_v21  }
  0x24   :  { %519 = vmatmul.mubr.bf16.vlgmr.msra.gmra.mrb[0].mxu1 %v2049_v35  ;;  %1723 = vmatpush3.bf16.msra.mxu0 %v1845_v39 }
  0x25   :  { %1763 = vmatpush3.bf16.msra.mxu1 %v1846_v40  ;;  %1724 = vmatprep.subr.bf16.mxu0 %v1847_v41 }
  0x26   :  { %1764 = vmatprep.subr.bf16.mxu1 %v1848_v42  ;;  %461 = vmatprep.mubr.bf16.mxu0 %v2087_v45 }
  0x27   :  { %526 = vmatprep.mubr.bf16.mxu1 %v2092_v46  ;;  %136 = vperm.xlu1 %1804, %v42_v22  }
  0x28   :  { %1725 = vmatpush3.bf16.msra.mxu0 %v1849_v43  ;;  %141 = vperm.xlu0 %1803, %v43_v23  }
  0x29   :  { %1765 = vmatpush3.bf16.msra.mxu1 %v1850_v44  ;;  %1726 = vmatprep.subr.bf16.mxu0 %v1857_v49 }
  0x2a   :  { %1766 = vmatprep.subr.bf16.mxu1 %v1858_v50 }
  0x2b   :  { %462 = vmatmul.mubr.bf16.gmra.mrb[4].mxu0 %v2097_v47  ;;  %146 = vperm.xlu1 %1804, %v44_v24  }
  0x2c   :  { %527 = vmatmul.mubr.bf16.gmra.mrb[4].mxu1 %v2103_v48  ;;  %1727 = vmatpush3.bf16.msra.mxu0 %v1859_v51 }
  0x2d   :  { %1767 = vmatpush3.bf16.msra.mxu1 %v1860_v52  ;;  %1728 = vmatprep.subr.bf16.mxu0 %v1861_v53 }
  0x2e   :  { %1768 = vmatprep.subr.bf16.mxu1 %v1862_v54  ;;  %469 = vmatprep.mubr.bf16.mxu0 %v2135_v57 }
  0x2f   :  { %534 = vmatprep.mubr.bf16.mxu1 %v2140_v58 }
  0x30   :  { %1729 = vmatpush3.bf16.msra.mxu0 %v1863_v55 }
  0x31   :  { %1769 = vmatpush3.bf16.msra.mxu1 %v1864_v56  ;;  %1730 = vmatprep.subr.bf16.mxu0 %v1871_v61 }
  0x32   :  { %1770 = vmatprep.subr.bf16.mxu1 %v1872_v62 }
  0x33   :  { %470 = vmatmul.mubr.bf16.gmra.mrb[8].mxu0 %v2145_v59 }
  0x34   :  { %535 = vmatmul.mubr.bf16.gmra.mrb[8].mxu1 %v2150_v60  ;;  %1731 = vmatpush3.bf16.msra.mxu0 %v1873_v63 }
  0x35   :  { %1771 = vmatpush3.bf16.msra.mxu1 %v1874_v0  ;;  %1732 = vmatprep.subr.bf16.mxu0 %v1875_v1 }
  0x36   :  { %1772 = vmatprep.subr.bf16.mxu1 %v1876_v2  ;;  %477 = vmatprep.mubr.bf16.mxu0 %v1879_v5 }
  0x37   :  { %542 = vmatprep.mubr.bf16.mxu1 %v1881_v6 }
  0x38   :  { %1733 = vmatpush3.bf16.msra.mxu0 %v1877_v3 }
  0x39   :  { %1773 = vmatpush3.bf16.msra.mxu1 %v1878_v4  ;;  %1734 = vmatprep.subr.bf16.mxu0 %v1885_v9 }
  0x3a   :  { %1774 = vmatprep.subr.bf16.mxu1 %v1886_v10 }
  0x3b   :  { %478 = vmatmul.mubr.bf16.gmra.mrb[12].mxu0 %v1883_v7 }
  0x3c   :  { %543 = vmatmul.mubr.bf16.gmra.mrb[12].mxu1 %v1884_v8  ;;  %881 = vmatprep.mubr.bf16.mxu0 %v2044_v34 }
  0x3d   :  { %946 = vmatprep.mubr.bf16.mxu1 %v2054_v36  ;;  %1735 = vmatpush3.bf16.msra.mxu0 %v1887_v11 }
  0x3e   :  { %1775 = vmatpush3.bf16.msra.mxu1 %v1888_v12  ;;  %1736 = vmatprep.subr.bf16.mxu0 %v1889_v13 }
  0x3f   :  { %1776 = vmatprep.subr.bf16.mxu1 %v1890_v14 }
  0x41   :  { %1737 = vmatpush3.bf16.msra.mxu0 %v1891_v15 }
  0x42   :  { %1777 = vmatpush3.bf16.msra.mxu1 %v1892_v16 }
  0x44   :  { %882 = vmatmul.mubr.bf16.vlgmr.msra.gmra.mrb[16].mxu0 %v2039_v33 }
  0x45   :  { %947 = vmatmul.mubr.bf16.vlgmr.msra.gmra.mrb[16].mxu1 %v2049_v35  ;;  %889 = vmatprep.mubr.bf16.mxu0 %v2087_v45 }
  0x46   :  { %954 = vmatprep.mubr.bf16.mxu1 %v2092_v46 }
  0x4c   :  { %890 = vmatmul.mubr.bf16.gmra.mrb[20].mxu0 %v2097_v47 }
  0x4d   :  { %955 = vmatmul.mubr.bf16.gmra.mrb[20].mxu1 %v2103_v48  ;;  %897 = vmatprep.mubr.bf16.mxu0 %v2135_v57 }
  0x4e   :  { %962 = vmatprep.mubr.bf16.mxu1 %v2140_v58 }
  0x54   :  { %898 = vmatmul.mubr.bf16.gmra.mrb[24].mxu0 %v2145_v59 }
  0x55   :  { %963 = vmatmul.mubr.bf16.gmra.mrb[24].mxu1 %v2150_v60  ;;  %905 = vmatprep.mubr.bf16.mxu0 %v1879_v5 }
  0x56   :  { %970 = vmatprep.mubr.bf16.mxu1 %v1881_v6 }
  0x5c   :  { %906 = vmatmul.mubr.bf16.gmra.mrb[28].mxu0 %v1883_v7 }
  0x5d   :  { %971 = vmatmul.mubr.bf16.gmra.mrb[28].mxu1 %v1884_v8 }
  0x9a   :  { %v2252_v25 = vpop.permute.xlu0 %111  ;;  %v2257_v39 = vpop.permute.xlu1 %121 }
  0x9e   :  { %v2254_v27 = vpop.permute.xlu0 %116 }
  0x9f   :  { %v2264_v47 = vpop.permute.xlu1 %126 }
  0xa2   :  { %v2271_v0 = vpop.permute.xlu0 %131 }
  0xa6   :  { %v2275_v14 = vpop.permute.xlu1 %136 }
  0xa7   :  { %v2280_v20 = vpop.permute.xlu0 %141 }
  0xf6   :  { %v1658_v26 = vpop.f32.mrb[0].mxu0 }
  0xf7   :  { %v1698_v28 = vpop.f32.mrb[0].mxu1  ;;  %v1659_v29 = vpop.f32.mrb[1].mxu0 }
  0xf8   :  { %v1660_v30 = vadd.f32 %v1659_v29, %v1658_v26  ;;  %v1699_v31 = vpop.f32.mrb[1].mxu1  ;;  %v1661_v32 = vpop.f32.mrb[2].mxu0 }
  0xf9   :  { %v1700_v33 = vadd.f32 %v1699_v31, %v1698_v28  ;;  %v1701_v34 = vpop.f32.mrb[2].mxu1  ;;  %v1662_v35 = vpop.f32.mrb[3].mxu0 }
  0xfa   :  { %v456_v36 = vadd.f32 %v1660_v30, %v2252_v25  ;;  %v1663_v37 = vadd.f32 %v1662_v35, %v1661_v32  ;;  %v1702_v38 = vpop.f32.mrb[3].mxu1 }
  0xfb   :  { %v1703_v40 = vadd.f32 %v1702_v38, %v1701_v34 }
  0xfc   :  { %v459_v41 = vadd.f32 %v1663_v37, %v2254_v27  ;;  %v521_v42 = vadd.f32 %v1700_v33, %v456_v36  ;;  %v2285_v37 = vpop.permute.xlu1 %146 }
  0xfe   :  { %v560_v43 = vsel %vm551_vm0, %v521_v42, 0.0  ;;  %552 = vst.msk [vmem:[#allocation2] sm:$0xff] %vm551_vm0, %v521_v42  ;;  %v524_v44 = vadd.f32 %v1703_v40, %v459_v41  ;;  %v1664_v45 = vpop.f32.mrb[4].mxu0 }
  0xff   :  { %561 = vadd.xlane.f32.xlu0 %v560_v43  ;;  %v1704_v48 = vpop.f32.mrb[4].mxu1  ;;  %v1665_v49 = vpop.f32.mrb[5].mxu0 }
 0x100   :  { %v563_v46 = vsel %vm551_vm0, %v524_v44, 0.0  ;;  %553 = vst.msk [vmem:[#allocation2 + $0x8] sm:$0xff] %vm551_vm0, %v524_v44  ;;  %v1666_v50 = vadd.f32 %v1665_v49, %v1664_v45  ;;  %v1705_v51 = vpop.f32.mrb[5].mxu1  ;;  %v1667_v52 = vpop.f32.mrb[6].mxu0 }
 0x101   :  { %564 = vadd.xlane.f32.xlu1 %v563_v46  ;;  %v1706_v53 = vadd.f32 %v1705_v51, %v1704_v48  ;;  %v1707_v54 = vpop.f32.mrb[6].mxu1  ;;  %v1668_v55 = vpop.f32.mrb[7].mxu0 }
 0x102   :  { %v464_v56 = vadd.f32 %v1666_v50, %v2257_v39  ;;  %v1669_v57 = vadd.f32 %v1668_v55, %v1667_v52  ;;  %v1708_v58 = vpop.f32.mrb[7].mxu1 }
 0x103   :  { %v1709_v59 = vadd.f32 %v1708_v58, %v1707_v54 }
 0x104   :  { %v467_v60 = vadd.f32 %v1669_v57, %v2264_v47  ;;  %v529_v61 = vadd.f32 %v1706_v53, %v464_v56 }
 0x106   :  { %554 = vst.msk [vmem:[#allocation2 + $0x10] sm:$0xff] %vm551_vm0, %v529_v61  ;;  %v566_v62 = vsel %vm551_vm0, %v529_v61, 0.0  ;;  %v532_v63 = vadd.f32 %v1709_v59, %v467_v60  ;;  %v1670_v1 = vpop.f32.mrb[8].mxu0 }
 0x107   :  { %567 = vadd.xlane.f32.xlu0 %v566_v62  ;;  %v1710_v2 = vpop.f32.mrb[8].mxu1  ;;  %v1671_v3 = vpop.f32.mrb[9].mxu0 }
 0x108   :  { %555 = vst.msk [vmem:[#allocation2 + $0x18] sm:$0xff] %vm551_vm0, %v532_v63  ;;  %v569_v4 = vsel %vm551_vm0, %v532_v63, 0.0  ;;  %v1672_v5 = vadd.f32 %v1671_v3, %v1670_v1  ;;  %v1711_v6 = vpop.f32.mrb[9].mxu1  ;;  %v1673_v7 = vpop.f32.mrb[10].mxu0 }
 0x109   :  { %v1712_v8 = vadd.f32 %v1711_v6, %v1710_v2  ;;  %v1713_v9 = vpop.f32.mrb[10].mxu1  ;;  %v1674_v10 = vpop.f32.mrb[11].mxu0 }
 0x10a   :  { %v472_v11 = vadd.f32 %v1672_v5, %v2271_v0  ;;  %v1675_v12 = vadd.f32 %v1674_v10, %v1673_v7  ;;  %v1714_v13 = vpop.f32.mrb[11].mxu1 }
 0x10b   :  { %570 = vadd.xlane.f32.xlu0 %v569_v4  ;;  %v1715_v15 = vadd.f32 %v1714_v13, %v1713_v9 }
 0x10c   :  { %v475_v16 = vadd.f32 %v1675_v12, %v2275_v14  ;;  %v537_v17 = vadd.f32 %v1712_v8, %v472_v11 }
 0x10e   :  { %556 = vst.msk [vmem:[#allocation2 + $0x20] sm:$0xff] %vm551_vm0, %v537_v17  ;;  %v572_v18 = vsel %vm551_vm0, %v537_v17, 0.0  ;;  %v540_v19 = vadd.f32 %v1715_v15, %v475_v16  ;;  %v1676_v22 = vpop.f32.mrb[12].mxu0 }
 0x10f   :  { %573 = vadd.xlane.f32.xlu1 %v572_v18  ;;  %v1716_v23 = vpop.f32.mrb[12].mxu1  ;;  %v1677_v24 = vpop.f32.mrb[13].mxu0 }
 0x110   :  { %557 = vst.msk [vmem:[#allocation2 + $0x28] sm:$0xff] %vm551_vm0, %v540_v19  ;;  %v575_v21 = vsel %vm551_vm0, %v540_v19, 0.0  ;;  %v1717_v26 = vpop.f32.mrb[13].mxu1  ;;  %v1678_v28 = vadd.f32 %v1677_v24, %v1676_v22  ;;  %v1679_v30 = vpop.f32.mrb[14].mxu0 }
 0x111   :  { %576 = vadd.xlane.f32.xlu0 %v575_v21  ;;  %v1718_v29 = vadd.f32 %v1717_v26, %v1716_v23  ;;  %v1719_v31 = vpop.f32.mrb[14].mxu1  ;;  %v1680_v32 = vpop.f32.mrb[15].mxu0 }
 0x112   :  { %v1720_v33 = vpop.f32.mrb[15].mxu1  ;;  %v480_v34 = vadd.f32 %v1678_v28, %v2280_v20  ;;  %v1681_v35 = vadd.f32 %v1680_v32, %v1679_v30 }
 0x113   :  { %v1721_v36 = vadd.f32 %v1720_v33, %v1719_v31 }
 0x114   :  { %v483_v38 = vadd.f32 %v1681_v35, %v2285_v37  ;;  %v545_v40 = vadd.f32 %v1718_v29, %v480_v34 }
 0x116   :  { %558 = vst.msk [vmem:[#allocation2 + $0x30] sm:$0xff] %vm551_vm0, %v545_v40  ;;  %v578_v41 = vsel %vm551_vm0, %v545_v40, 0.0  ;;  %v548_v42 = vadd.f32 %v1721_v36, %v483_v38 }
 0x117   :  { %579 = vadd.xlane.f32.xlu1 %v578_v41  ;;  %v1738_v43 = vpop.f32.mrb[16].mxu0 }
 0x118   :  { %559 = vst.msk [vmem:[#allocation2 + $0x38] sm:$0xff] %vm551_vm0, %v548_v42  ;;  %v581_v44 = vsel %vm551_vm0, %v548_v42, 0.0  ;;  %v1778_v45 = vpop.f32.mrb[16].mxu1  ;;  %v1739_v46 = vpop.f32.mrb[17].mxu0 }
 0x119   :  { %582 = vadd.xlane.f32.xlu0 %v581_v44  ;;  %v1740_v48 = vadd.f32 %v1739_v46, %v1738_v43  ;;  %v1779_v49 = vpop.f32.mrb[17].mxu1  ;;  %v1741_v50 = vpop.f32.mrb[18].mxu0 }
 0x11a   :  { %v1780_v51 = vadd.f32 %v1779_v49, %v1778_v45  ;;  %v1781_v52 = vpop.f32.mrb[18].mxu1  ;;  %v1742_v53 = vpop.f32.mrb[19].mxu0 }
 0x11b   :  { %v884_v54 = vadd.f32 %v1740_v48, %v2252_v25  ;;  %v1743_v55 = vadd.f32 %v1742_v53, %v1741_v50  ;;  %v1782_v56 = vpop.f32.mrb[19].mxu1 }
 0x11c   :  { %v1783_v57 = vadd.f32 %v1782_v56, %v1781_v52 }
 0x11d   :  { %v887_v58 = vadd.f32 %v1743_v55, %v2254_v27  ;;  %v949_v59 = vadd.f32 %v1780_v51, %v884_v54 }
 0x11f   :  { %v1744_v60 = vpop.f32.mrb[20].mxu0  ;;  %980 = vst.msk [vmem:[#allocation2 + $0x40] sm:$0xff] %vm551_vm0, %v949_v59  ;;  %v988_v61 = vsel %vm551_vm0, %v949_v59, 0.0  ;;  %v952_v62 = vadd.f32 %v1783_v57, %v887_v58 }
 0x120   :  { %v1745_v63 = vpop.f32.mrb[21].mxu0  ;;  %989 = vadd.xlane.f32.xlu1 %v988_v61  ;;  %v1784_v1 = vpop.f32.mrb[20].mxu1 }
 0x121   :  { %v1746_v2 = vadd.f32 %v1745_v63, %v1744_v60  ;;  %v1747_v3 = vpop.f32.mrb[22].mxu0  ;;  %v1785_v4 = vpop.f32.mrb[21].mxu1  ;;  %981 = vst.msk [vmem:[#allocation2 + $0x48] sm:$0xff] %vm551_vm0, %v952_v62  ;;  %v991_v25 = vsel %vm551_vm0, %v952_v62, 0.0 }
 0x122   :  { %v1748_v5 = vpop.f32.mrb[23].mxu0  ;;  %v1786_v6 = vadd.f32 %v1785_v4, %v1784_v1  ;;  %992 = vadd.xlane.f32.xlu0 %v991_v25  ;;  %v1787_v27 = vpop.f32.mrb[22].mxu1 }
 0x123   :  { %v892_v7 = vadd.f32 %v1746_v2, %v2257_v39  ;;  %v1749_v8 = vadd.f32 %v1748_v5, %v1747_v3  ;;  %v1788_v9 = vpop.f32.mrb[23].mxu1  ;;  %v2322_v3 = vld [vmem:[#allocation2] sm:$0xff] }
 0x124   :  { %v1789_v10 = vadd.f32 %v1788_v9, %v1787_v27  ;;  %v2332_v27 = vld [vmem:[#allocation2 + $0x8] sm:$0xff] }
 0x125   :  { %v895_v11 = vadd.f32 %v1749_v8, %v2264_v47  ;;  %v957_v12 = vadd.f32 %v1786_v6, %v892_v7 }
 0x126   :  { %v2324_v4 = vld [vmem:[#allocation2 + $0x40] sm:$0xff] }
 0x127   :  { %v1750_v13 = vpop.f32.mrb[24].mxu0  ;;  %982 = vst.msk [vmem:[#allocation2 + $0x50] sm:$0xff] %vm551_vm0, %v957_v12  ;;  %v994_v15 = vsel %vm551_vm0, %v957_v12, 0.0  ;;  %v960_v16 = vadd.f32 %v1789_v10, %v895_v11 }
 0x128   :  { %v1751_v17 = vpop.f32.mrb[25].mxu0  ;;  %995 = vadd.xlane.f32.xlu1 %v994_v15  ;;  %v1790_v18 = vpop.f32.mrb[24].mxu1  ;;  %v2334_v7 = vld [vmem:[#allocation2 + $0x48] sm:$0xff] }
 0x129   :  { %v1752_v19 = vadd.f32 %v1751_v17, %v1750_v13  ;;  %v1753_v21 = vpop.f32.mrb[26].mxu0  ;;  %v1791_v22 = vpop.f32.mrb[25].mxu1  ;;  %983 = vst.msk [vmem:[#allocation2 + $0x58] sm:$0xff] %vm551_vm0, %v960_v16  ;;  %v997_v39 = vsel %vm551_vm0, %v960_v16, 0.0 }
 0x12a   :  { %v1754_v23 = vpop.f32.mrb[27].mxu0  ;;  %v1792_v24 = vadd.f32 %v1791_v22, %v1790_v18  ;;  %998 = vadd.xlane.f32.xlu0 %v997_v39  ;;  %v1793_v47 = vpop.f32.mrb[26].mxu1  ;;  %v2344_v39 = vld [vmem:[#allocation2 + $0x10] sm:$0xff] }
 0x12b   :  { %v900_v26 = vadd.f32 %v1752_v19, %v2271_v0  ;;  %v1755_v28 = vadd.f32 %v1754_v23, %v1753_v21  ;;  %v1794_v29 = vpop.f32.mrb[27].mxu1 }
 0x12c   :  { %v1795_v30 = vadd.f32 %v1794_v29, %v1793_v47  ;;  %v2355_v29 = vld [vmem:[#allocation2 + $0x18] sm:$0xff] }
 0x12d   :  { %v903_v31 = vadd.f32 %v1755_v28, %v2275_v14  ;;  %v965_v32 = vadd.f32 %v1792_v24, %v900_v26 }
 0x12e   :  { %v2346_v23 = vld [vmem:[#allocation2 + $0x50] sm:$0xff] }
 0x12f   :  { %v1756_v33 = vpop.f32.mrb[28].mxu0  ;;  %984 = vst.msk [vmem:[#allocation2 + $0x60] sm:$0xff] %vm551_vm0, %v965_v32  ;;  %v1000_v34 = vsel %vm551_vm0, %v965_v32, 0.0  ;;  %v968_v35 = vadd.f32 %v1795_v30, %v903_v31 }
 0x130   :  { %v1757_v36 = vpop.f32.mrb[29].mxu0  ;;  %1001 = vadd.xlane.f32.xlu1 %v1000_v34  ;;  %v1796_v38 = vpop.f32.mrb[28].mxu1  ;;  %v2357_v30 = vld [vmem:[#allocation2 + $0x58] sm:$0xff] }
 0x131   :  { %v1758_v40 = vadd.f32 %v1757_v36, %v1756_v33  ;;  %v1759_v41 = vpop.f32.mrb[30].mxu0  ;;  %v1797_v42 = vpop.f32.mrb[29].mxu1  ;;  %985 = vst.msk [vmem:[#allocation2 + $0x68] sm:$0xff] %vm551_vm0, %v968_v35  ;;  %v1003_v0 = vsel %vm551_vm0, %v968_v35, 0.0 }
 0x132   :  { %v1760_v43 = vpop.f32.mrb[31].mxu0  ;;  %v1798_v44 = vadd.f32 %v1797_v42, %v1796_v38  ;;  %1004 = vadd.xlane.f32.xlu0 %v1003_v0  ;;  %v1799_v14 = vpop.f32.mrb[30].mxu1 }
 0x133   :  { %v908_v45 = vadd.f32 %v1758_v40, %v2280_v20  ;;  %v1761_v46 = vadd.f32 %v1760_v43, %v1759_v41  ;;  %v1800_v48 = vpop.f32.mrb[31].mxu1 }
 0x134   :  { %v1801_v49 = vadd.f32 %v1800_v48, %v1799_v14 }
 0x135   :  { %v911_v50 = vadd.f32 %v1761_v46, %v2285_v37  ;;  %v973_v51 = vadd.f32 %v1798_v44, %v908_v45  ;;  %v2368_v45 = vld [vmem:[#allocation2 + $0x20] sm:$0xff] }
 0x136   :  { %v2370_v46 = vld [vmem:[#allocation2 + $0x60] sm:$0xff] }
 0x137   :  { %986 = vst.msk [vmem:[#allocation2 + $0x70] sm:$0xff] %vm551_vm0, %v973_v51  ;;  %v1006_v52 = vsel %vm551_vm0, %v973_v51, 0.0  ;;  %v976_v53 = vadd.f32 %v1801_v49, %v911_v50 }
 0x138   :  { %1007 = vadd.xlane.f32.xlu1 %v1006_v52  ;;  %v2379_v52 = vld [vmem:[#allocation2 + $0x28] sm:$0xff] }
 0x139   :  { %987 = vst.msk [vmem:[#allocation2 + $0x78] sm:$0xff] %vm551_vm0, %v976_v53  ;;  %v1009_v54 = vsel %vm551_vm0, %v976_v53, 0.0  ;;  %v2381_v53 = vld [vmem:[#allocation2 + $0x68] sm:$0xff] }
 0x13a   :  { %1010 = vadd.xlane.f32.xlu0 %v1009_v54 }
 0x18c   :  { %v562_v55 = vpop.xlane.xlu0 %561 }
 0x18e   :  { %v565_v20 = vpop.xlane.xlu1 %564 }
 0x194   :  { %v568_v56 = vpop.xlane.xlu0 %567 }
 0x198   :  { %v571_v57 = vpop.xlane.xlu0 %570 }
 0x19c   :  { %v574_v58 = vpop.xlane.xlu1 %573 }
 0x19e   :  { %v577_v59 = vpop.xlane.xlu0 %576 }
 0x1a4   :  { %v2316_v60 = vpop.xlane.xlu1 %579 }
 0x1a6   :  { %v2318_v37 = vpop.xlane.xlu0 %582 }
 0x1ad   :  { %v990_v61 = vpop.xlane.xlu1 %989 }
 0x1ae   :  { %v1012_v62 = vadd.f32 %v990_v61, %v562_v55 }
 0x1af   :  { %v993_v63 = vpop.xlane.xlu0 %992 }
 0x1b0   :  { %v2320_v1 = vmul.f32 0.03125, %v1012_v62  ;;  %v1013_v2 = vadd.f32 %v993_v63, %v565_v20 }
 0x1b2   :  { %v2326_v25 = vmul.f32 0.03125, %v1013_v2  ;;  %v1036_v5 = vsub.f32 %v2322_v3, %v2320_v1  ;;  %v1092_v6 = vsub.f32 %v2324_v4, %v2320_v1 }
 0x1b4   :  { %v1044_v8 = vmul.f32 %v1036_v5, %v1036_v5  ;;  %v1037_v9 = vsub.f32 %v2332_v27, %v2326_v25  ;;  %v1093_v10 = vsub.f32 %v2334_v7, %v2326_v25  ;;  %v1100_v16 = vmul.f32 %v1092_v6, %v1092_v6 }
 0x1b5   :  { %v996_v11 = vpop.xlane.xlu1 %995 }
 0x1b6   :  { %v1014_v12 = vadd.f32 %v996_v11, %v568_v56  ;;  %v1052_v13 = vsel %vm551_vm0, %v1044_v8, 0.0  ;;  %v1045_v15 = vmul.f32 %v1037_v9, %v1037_v9  ;;  %v1101_v22 = vmul.f32 %v1093_v10, %v1093_v10  ;;  %v2394_v9 = vld [vmem:[#allocation2 + $0x30] sm:$0xff] }
 0x1b7   :  { %v999_v17 = vpop.xlane.xlu0 %998  ;;  %1053 = vadd.xlane.f32.xlu1 %v1052_v13  ;;  %v1108_v47 = vsel %vm551_vm0, %v1100_v16, 0.0  ;;  %v2396_v10 = vld [vmem:[#allocation2 + $0x70] sm:$0xff] }
 0x1b8   :  { %v2341_v18 = vmul.f32 0.03125, %v1014_v12  ;;  %v1015_v19 = vadd.f32 %v999_v17, %v571_v57  ;;  %v1055_v21 = vsel %vm551_vm0, %v1045_v15, 0.0  ;;  %v1111_v31 = vsel %vm551_vm0, %v1101_v22, 0.0  ;;  %v2407_v15 = vld [vmem:[#allocation2 + $0x78] sm:$0xff] }
 0x1b9   :  { %1056 = vadd.xlane.f32.xlu0 %v1055_v21 }
 0x1ba   :  { %v2348_v24 = vmul.f32 0.03125, %v1015_v19  ;;  %v1038_v26 = vsub.f32 %v2344_v39, %v2341_v18  ;;  %v1094_v28 = vsub.f32 %v2346_v23, %v2341_v18 }
 0x1bb   :  { %1109 = vadd.xlane.f32.xlu1 %v1108_v47 }
 0x1bc   :  { %v1046_v32 = vmul.f32 %v1038_v26, %v1038_v26  ;;  %v1039_v33 = vsub.f32 %v2355_v29, %v2348_v24  ;;  %v1095_v34 = vsub.f32 %v2357_v30, %v2348_v24  ;;  %v1102_v41 = vmul.f32 %v1094_v28, %v1094_v28 }
 0x1bd   :  { %v1002_v35 = vpop.xlane.xlu1 %1001  ;;  %1112 = vadd.xlane.f32.xlu0 %v1111_v31 }
 0x1be   :  { %v1016_v36 = vadd.f32 %v1002_v35, %v574_v58  ;;  %v1058_v38 = vsel %vm551_vm0, %v1046_v32, 0.0  ;;  %v1047_v40 = vmul.f32 %v1039_v33, %v1039_v33  ;;  %v1103_v14 = vmul.f32 %v1095_v34, %v1095_v34 }
 0x1bf   :  { %v1005_v42 = vpop.xlane.xlu0 %1004  ;;  %1059 = vadd.xlane.f32.xlu1 %v1058_v38  ;;  %v1114_v49 = vsel %vm551_vm0, %v1102_v41, 0.0 }
 0x1c0   :  { %v2365_v0 = vmul.f32 0.03125, %v1016_v36  ;;  %v1017_v43 = vadd.f32 %v1005_v42, %v577_v59  ;;  %v1061_v44 = vsel %vm551_vm0, %v1047_v40, 0.0  ;;  %v1117_v54 = vsel %vm551_vm0, %v1103_v14, 0.0 }
 0x1c1   :  { %1062 = vadd.xlane.f32.xlu0 %v1061_v44 }
 0x1c2   :  { %v2372_v48 = vmul.f32 0.03125, %v1017_v43  ;;  %v1040_v50 = vsub.f32 %v2368_v45, %v2365_v0  ;;  %v1096_v51 = vsub.f32 %v2370_v46, %v2365_v0 }
 0x1c3   :  { %1115 = vadd.xlane.f32.xlu1 %v1114_v49 }
 0x1c4   :  { %v1048_v55 = vmul.f32 %v1040_v50, %v1040_v50  ;;  %v1041_v56 = vsub.f32 %v2379_v52, %v2372_v48  ;;  %v1097_v20 = vsub.f32 %v2381_v53, %v2372_v48  ;;  %v1104_v62 = vmul.f32 %v1096_v51, %v1096_v51 }
 0x1c5   :  { %v1008_v57 = vpop.xlane.xlu1 %1007  ;;  %1118 = vadd.xlane.f32.xlu0 %v1117_v54 }
 0x1c6   :  { %v1018_v58 = vadd.f32 %v1008_v57, %v2316_v60  ;;  %v1064_v59 = vsel %vm551_vm0, %v1048_v55, 0.0  ;;  %v1049_v61 = vmul.f32 %v1041_v56, %v1041_v56  ;;  %v1105_v8 = vmul.f32 %v1097_v20, %v1097_v20 }
 0x1c7   :  { %v1011_v63 = vpop.xlane.xlu0 %1010  ;;  %1065 = vadd.xlane.f32.xlu1 %v1064_v59  ;;  %v1120_v60 = vsel %vm551_vm0, %v1104_v62, 0.0 }
 0x1c8   :  { %v2390_v2 = vmul.f32 0.03125, %v1018_v58  ;;  %v1019_v5 = vadd.f32 %v1011_v63, %v2318_v37  ;;  %v1067_v6 = vsel %vm551_vm0, %v1049_v61, 0.0  ;;  %v2405_v37 = vld [vmem:[#allocation2 + $0x38] sm:$0xff]  ;;  %v1123_v16 = vsel %vm551_vm0, %v1105_v8, 0.0  ;;  %v1164_v63 = vld [vmem:[%s2557_s3] sm:$0xff] }
 0x1c9   :  { %1068 = vadd.xlane.f32.xlu0 %v1067_v6 }
 0x1ca   :  { %v2398_v11 = vmul.f32 0.03125, %v1019_v5  ;;  %v1042_v12 = vsub.f32 %v2394_v9, %v2390_v2  ;;  %v1098_v13 = vsub.f32 %v2396_v10, %v2390_v2 }
 0x1cb   :  { %1121 = vadd.xlane.f32.xlu1 %v1120_v60  ;;  %v1165_v60 = vld [vmem:[%s2557_s3 + $0x8] sm:$0xff] }
 0x1cc   :  { %v1050_v17 = vmul.f32 %v1042_v12, %v1042_v12  ;;  %v1043_v19 = vsub.f32 %v2405_v37, %v2398_v11  ;;  %v1099_v21 = vsub.f32 %v2407_v15, %v2398_v11  ;;  %v1106_v26 = vmul.f32 %v1098_v13, %v1098_v13 }
 0x1cd   :  { %1124 = vadd.xlane.f32.xlu0 %v1123_v16 }
 0x1ce   :  { %v1070_v22 = vsel %vm551_vm0, %v1050_v17, 0.0  ;;  %v1051_v47 = vmul.f32 %v1043_v19, %v1043_v19  ;;  %v1107_v31 = vmul.f32 %v1099_v21, %v1099_v21  ;;  %v1126_v32 = vsel %vm551_vm0, %v1106_v26, 0.0 }
 0x1cf   :  { %1071 = vadd.xlane.f32.xlu1 %v1070_v22 }
 0x1d0   :  { %v1073_v28 = vsel %vm551_vm0, %v1051_v47, 0.0  ;;  %v1129_v33 = vsel %vm551_vm0, %v1107_v31, 0.0  ;;  %v1181_v31 = vld [vmem:[%s2558_s4 + $0x8] sm:$0xff] }
 0x1d1   :  { %1074 = vadd.xlane.f32.xlu0 %v1073_v28 }
 0x1d3   :  { %1127 = vadd.xlane.f32.xlu1 %v1126_v32  ;;  %v1180_v32 = vld [vmem:[%s2558_s4] sm:$0xff] }
 0x1d5   :  { %1130 = vadd.xlane.f32.xlu0 %v1129_v33 }
 0x244   :  { %v1054_v34 = vpop.xlane.xlu1 %1053 }
 0x246   :  { %v1057_v35 = vpop.xlane.xlu0 %1056 }
 0x248   :  { %v1110_v36 = vpop.xlane.xlu1 %1109 }
 0x249   :  { %v1132_v38 = vadd.f32 %v1110_v36, %v1054_v34 }
 0x24a   :  { %v1113_v40 = vpop.xlane.xlu0 %1112 }
 0x24b   :  { %v1140_v41 = vmul.f32 0.03125, %v1132_v38  ;;  %v1133_v42 = vadd.f32 %v1113_v40, %v1057_v35 }
 0x24c   :  { %v1060_v43 = vpop.xlane.xlu1 %1059 }
 0x24d   :  { %v1148_v44 = vadd.f32 1e-05, %v1140_v41  ;;  %v1141_v14 = vmul.f32 0.03125, %v1133_v42 }
 0x24e   :  { %v1063_v49 = vpop.xlane.xlu0 %1062 }
 0x24f   :  { %1893 = vrsqrt.f32 %v1148_v44  ;;  %v1149_v50 = vadd.f32 1e-05, %v1141_v14 }
 0x250   :  { %v1116_v51 = vpop.xlane.xlu1 %1115 }
 0x251   :  { %1895 = vrsqrt.f32 %v1149_v50  ;;  %v1134_v54 = vadd.f32 %v1116_v51, %v1060_v43  ;;  %v1167_v43 = vld [vmem:[%s2557_s3 + $0x18] sm:$0xff]  ;;  %v1182_v51 = vld [vmem:[%s2558_s4 + $0x10] sm:$0xff] }
 0x252   :  { %v1119_v55 = vpop.xlane.xlu0 %1118 }
 0x253   :  { %v1142_v56 = vmul.f32 0.03125, %v1134_v54  ;;  %v1135_v20 = vadd.f32 %v1119_v55, %v1063_v49 }
 0x254   :  { %v1066_v57 = vpop.xlane.xlu1 %1065 }
 0x255   :  { %v1150_v58 = vadd.f32 1e-05, %v1142_v56  ;;  %v1143_v59 = vmul.f32 0.03125, %v1135_v20 }
 0x256   :  { %v1069_v61 = vpop.xlane.xlu0 %1068 }
 0x257   :  { %1897 = vrsqrt.f32 %v1150_v58  ;;  %v1151_v62 = vadd.f32 1e-05, %v1143_v59  ;;  %v1168_v59 = vld [vmem:[%s2557_s3 + $0x20] sm:$0xff] }
 0x258   :  { %v1122_v5 = vpop.xlane.xlu1 %1121 }
 0x259   :  { %v1894_v6 = vpop.eup %1893  ;;  %1899 = vrsqrt.f32 %v1151_v62  ;;  %v1136_v8 = vadd.f32 %v1122_v5, %v1066_v57 }
 0x25a   :  { %v1125_v12 = vpop.xlane.xlu0 %1124  ;;  %v1172_v13 = vmul.f32 %v1894_v6, %v1164_v63  ;;  %v1169_v63 = vld [vmem:[%s2557_s3 + $0x28] sm:$0xff] }
 0x25b   :  { %v1896_v16 = vpop.eup %1895  ;;  %v1144_v17 = vmul.f32 0.03125, %v1136_v8  ;;  %v1137_v19 = vadd.f32 %v1125_v12, %v1069_v61  ;;  %v1184_v8 = vld [vmem:[%s2558_s4 + $0x20] sm:$0xff] }
 0x25c   :  { %1206 = vperm.xlu1 %1804, %v1172_v13   ;;  %v1072_v21 = vpop.xlane.xlu1 %1071  ;;  %v1173_v22 = vmul.f32 %v1896_v16, %v1165_v60  ;;  %v1188_v47 = vmul.f32 %v1172_v13, %v2320_v1  ;;  %v1166_v1 = vld [vmem:[%s2557_s3 + $0x10] sm:$0xff] }
 0x25d   :  { %v1152_v26 = vadd.f32 1e-05, %v1144_v17  ;;  %v1145_v28 = vmul.f32 0.03125, %v1137_v19  ;;  %v1170_v16 = vld [vmem:[%s2557_s3 + $0x30] sm:$0xff] }
 0x25e   :  { %1211 = vperm.xlu0 %1803, %v1173_v22   ;;  %v1075_v33 = vpop.xlane.xlu0 %1074  ;;  %v1189_v34 = vmul.f32 %v1173_v22, %v2326_v25  ;;  %v1196_v40 = vsub.f32 %v1180_v32, %v1188_v47  ;;  %v1171_v22 = vld [vmem:[%s2557_s3 + $0x38] sm:$0xff] }
 0x25f   :  { %1901 = vrsqrt.f32 %v1152_v26  ;;  %v1153_v35 = vadd.f32 1e-05, %v1145_v28  ;;  %v1186_v26 = vld [vmem:[%s2558_s4 + $0x30] sm:$0xff] }
 0x260   :  { %v1128_v36 = vpop.xlane.xlu1 %1127  ;;  %v1197_v38 = vsub.f32 %v1181_v31, %v1189_v34  ;;  %v1187_v34 = vld [vmem:[%s2558_s4 + $0x38] sm:$0xff] }
 0x261   :  { %v1898_v41 = vpop.eup %1897  ;;  %1903 = vrsqrt.f32 %v1153_v35  ;;  %v1138_v42 = vadd.f32 %v1128_v36, %v1072_v21  ;;  %v1185_v21 = vld [vmem:[%s2558_s4 + $0x28] sm:$0xff] }
 0x262   :  { %v1131_v44 = vpop.xlane.xlu0 %1130  ;;  %1259 = vperm.xlu1 %1804, %v1197_v38   ;;  %1254 = vperm.xlu0 %1803, %v1196_v40   ;;  %v1174_v25 = vmul.f32 %v1898_v41, %v1166_v1 }
 0x263   :  { %v1900_v14 = vpop.eup %1899  ;;  %v1146_v49 = vmul.f32 0.03125, %v1138_v42  ;;  %v1139_v50 = vadd.f32 %v1131_v44, %v1075_v33 }
 0x264   :  { %v1190_v54 = vmul.f32 %v1174_v25, %v2341_v18  ;;  %v1175_v55 = vmul.f32 %v1900_v14, %v1167_v43  ;;  %v1183_v18 = vld [vmem:[%s2558_s4 + $0x18] sm:$0xff] }
 0x265   :  { %v1154_v56 = vadd.f32 1e-05, %v1146_v49  ;;  %v1147_v20 = vmul.f32 0.03125, %v1139_v50 }
 0x266   :  { %1216 = vperm.xlu1 %1804, %v1174_v25   ;;  %v1198_v57 = vsub.f32 %v1182_v51, %v1190_v54  ;;  %v1191_v61 = vmul.f32 %v1175_v55, %v2348_v24 }
 0x267   :  { %1905 = vrsqrt.f32 %v1154_v56  ;;  %v1155_v58 = vadd.f32 1e-05, %v1147_v20 }
 0x268   :  { %1264 = vperm.xlu0 %1803, %v1198_v57   ;;  %v1199_v60 = vsub.f32 %v1183_v18, %v1191_v61 }
 0x269   :  { %v1902_v62 = vpop.eup %1901  ;;  %1907 = vrsqrt.f32 %v1155_v58 }
 0x26a   :  { %1221 = vperm.xlu1 %1804, %v1175_v55   ;;  %v1176_v5 = vmul.f32 %v1902_v62, %v1168_v59 }
 0x26b   :  { %v1904_v6 = vpop.eup %1903 }
 0x26c   :  { %1226 = vperm.xlu0 %1803, %v1176_v5   ;;  %v1192_v24 = vmul.f32 %v1176_v5, %v2365_v0  ;;  %v1177_v12 = vmul.f32 %v1904_v6, %v1169_v63 }
 0x26e   :  { %1269 = vperm.xlu1 %1804, %v1199_v60   ;;  %v1200_v13 = vsub.f32 %v1184_v8, %v1192_v24  ;;  %v1193_v17 = vmul.f32 %v1177_v12, %v2372_v48 }
 0x270   :  { %1274 = vperm.xlu0 %1803, %v1200_v13   ;;  %v1201_v28 = vsub.f32 %v1185_v21, %v1193_v17 }
 0x271   :  { %v1906_v19 = vpop.eup %1905 }
 0x272   :  { %1231 = vperm.xlu1 %1804, %v1177_v12   ;;  %v1178_v0 = vmul.f32 %v1906_v19, %v1170_v16 }
 0x273   :  { %v1908_v47 = vpop.eup %1907 }
 0x274   :  { %1236 = vperm.xlu0 %1803, %v1178_v0   ;;  %v1194_v48 = vmul.f32 %v1178_v0, %v2390_v2  ;;  %v1179_v31 = vmul.f32 %v1908_v47, %v1171_v22 }
 0x276   :  { %1279 = vperm.xlu1 %1804, %v1201_v28   ;;  %v1202_v32 = vsub.f32 %v1186_v26, %v1194_v48  ;;  %v1195_v33 = vmul.f32 %v1179_v31, %v2398_v11 }
 0x278   :  { %1284 = vperm.xlu0 %1803, %v1202_v32   ;;  %v1203_v35 = vsub.f32 %v1187_v34, %v1195_v33 }
 0x27a   :  { %1241 = vperm.xlu1 %1804, %v1179_v31  }
 0x27e   :  { %1289 = vperm.xlu1 %1804, %v1203_v35  }
 0x2db   :  { %v1207_v1 = vpop.permute.xlu1 %1206 }
 0x2dc   :  { %v1244_v38 = vmul.f32 %v1207_v1, %v2322_v3  ;;  %v1373_v40 = vmul.f32 %v1207_v1, %v2324_v4 }
 0x2dd   :  { %v1212_v36 = vpop.permute.xlu0 %1211 }
 0x2de   :  { %v1245_v2 = vmul.f32 %v1212_v36, %v2332_v27  ;;  %v1374_v41 = vmul.f32 %v1212_v36, %v2334_v7 }
 0x2e1   :  { %v1255_v42 = vpop.permute.xlu0 %1254  ;;  %v1260_v43 = vpop.permute.xlu1 %1259 }
 0x2e2   :  { %v1292_v11 = vadd.f32 %v1255_v42, %v1244_v38  ;;  %v1381_v44 = vadd.f32 %v1373_v40, %v1255_v42  ;;  %v1293_v25 = vadd.f32 %v1260_v43, %v1245_v2  ;;  %v1382_v14 = vadd.f32 %v1374_v41, %v1260_v43 }
 0x2e4   :  { %vm1300_vm2 = vcmp.ge.f32.partialorder %v1292_v11, 0.0  ;;  %v1308_v49 = vmul.f32 0.2, %v1292_v11  ;;  %vm1389_vm3 = vcmp.ge.f32.partialorder %v1381_v44, 0.0  ;;  %v1397_v50 = vmul.f32 0.2, %v1381_v44 }
 0x2e5   :  { %vm1301_vm4 = vcmp.ge.f32.partialorder %v1293_v25, 0.0  ;;  %v1309_v51 = vmul.f32 0.2, %v1293_v25  ;;  %vm1390_vm5 = vcmp.ge.f32.partialorder %v1382_v14, 0.0  ;;  %v1398_v3 = vmul.f32 0.2, %v1382_v14  ;;  %v1217_v4 = vpop.permute.xlu1 %1216 }
 0x2e6   :  { %v1316_v54 = vsel %vm1300_vm2, %v1292_v11, %v1308_v49  ;;  %v1405_v27 = vsel %vm1389_vm3, %v1381_v44, %v1397_v50  ;;  %v1246_v7 = vmul.f32 %v1217_v4, %v2344_v39  ;;  %v1375_v55 = vmul.f32 %v1217_v4, %v2346_v23 }
 0x2e7   :  { %v1626_v56 = vpack.c.bf16 %v1316_v54, %v1316_v54  ;;  %v1634_v20 = vpack.c.bf16 %v1405_v27, %v1405_v27  ;;  %v1317_v57 = vsel %vm1301_vm4, %v1293_v25, %v1309_v51  ;;  %v1406_v58 = vsel %vm1390_vm5, %v1382_v14, %v1398_v3  ;;  %v1265_v59 = vpop.permute.xlu0 %1264 }
 0x2e8   :  { %v1627_v61 = vpack.c.bf16 %v1317_v57, %v1317_v57  ;;  %v1635_v62 = vpack.c.bf16 %v1406_v58, %v1406_v58  ;;  %v1294_v18 = vadd.f32 %v1265_v59, %v1246_v7  ;;  %v1383_v63 = vadd.f32 %v1375_v55, %v1265_v59 }
 0x2e9   :  { %1357 = vst.msk [vmem:[%s2559_s5] sm:$0xf] %vm1356_vm1, %v1626_v56  ;;  %1618 = vst.msk [vmem:[%s2559_s5 + $0x20] sm:$0xf] %vm1356_vm1, %v1634_v20  ;;  %v1222_v39 = vpop.permute.xlu1 %1221 }
 0x2ea   :  { %1358 = vst.msk [vmem:[%s2559_s5 + $0x4] sm:$0xf] %vm1356_vm1, %v1627_v61  ;;  %1619 = vst.msk [vmem:[%s2559_s5 + $0x24] sm:$0xf] %vm1356_vm1, %v1635_v62  ;;  %vm1302_vm6 = vcmp.ge.f32.partialorder %v1294_v18, 0.0  ;;  %vm1391_vm7 = vcmp.ge.f32.partialorder %v1383_v63, 0.0  ;;  %v1247_v24 = vmul.f32 %v1222_v39, %v2355_v29  ;;  %v1376_v12 = vmul.f32 %v1222_v39, %v2357_v30 }
 0x2eb   :  { %v1310_v23 = vmul.f32 0.2, %v1294_v18  ;;  %v1399_v5 = vmul.f32 0.2, %v1383_v63  ;;  %v1227_v6 = vpop.permute.xlu0 %1226 }
 0x2ec   :  { %v1248_v22 = vmul.f32 %v1227_v6, %v2368_v45  ;;  %v1377_v29 = vmul.f32 %v1227_v6, %v2370_v46 }
 0x2ed   :  { %v1318_v8 = vsel %vm1302_vm6, %v1294_v18, %v1310_v23  ;;  %v1407_v60 = vsel %vm1391_vm7, %v1383_v63, %v1399_v5  ;;  %v1270_v17 = vpop.permute.xlu1 %1269 }
 0x2ee   :  { %v1628_v13 = vpack.c.bf16 %v1318_v8, %v1318_v8  ;;  %v1636_v16 = vpack.c.bf16 %v1407_v60, %v1407_v60  ;;  %v1295_v19 = vadd.f32 %v1270_v17, %v1247_v24  ;;  %v1384_v21 = vadd.f32 %v1376_v12, %v1270_v17 }
 0x2ef   :  { %v1275_v30 = vpop.permute.xlu0 %1274 }
 0x2f0   :  { %1359 = vst.msk [vmem:[%s2559_s5 + $0x8] sm:$0xf] %vm1356_vm1, %v1628_v13  ;;  %1620 = vst.msk [vmem:[%s2559_s5 + $0x28] sm:$0xf] %vm1356_vm1, %v1636_v16  ;;  %vm1303_vm8 = vcmp.ge.f32.partialorder %v1295_v19, 0.0  ;;  %vm1392_vm9 = vcmp.ge.f32.partialorder %v1384_v21, 0.0  ;;  %v1296_v26 = vadd.f32 %v1275_v30, %v1248_v22  ;;  %v1385_v28 = vadd.f32 %v1377_v29, %v1275_v30 }
 0x2f1   :  { %v1311_v0 = vmul.f32 0.2, %v1295_v19  ;;  %v1400_v47 = vmul.f32 0.2, %v1384_v21  ;;  %v1232_v48 = vpop.permute.xlu1 %1231 }
 0x2f2   :  { %vm1304_vm10 = vcmp.ge.f32.partialorder %v1296_v26, 0.0  ;;  %v1312_v35 = vmul.f32 0.2, %v1296_v26  ;;  %vm1393_vm11 = vcmp.ge.f32.partialorder %v1385_v28, 0.0  ;;  %v1401_v36 = vmul.f32 0.2, %v1385_v28 }
 0x2f3   :  { %v1319_v31 = vsel %vm1303_vm8, %v1295_v19, %v1311_v0  ;;  %v1408_v32 = vsel %vm1392_vm9, %v1384_v21, %v1400_v47  ;;  %v1237_v1 = vpop.permute.xlu0 %1236  ;;  %v1249_v45 = vmul.f32 %v1232_v48, %v2379_v52  ;;  %v1378_v46 = vmul.f32 %v1232_v48, %v2381_v53 }
 0x2f4   :  { %v1629_v33 = vpack.c.bf16 %v1319_v31, %v1319_v31  ;;  %v1637_v34 = vpack.c.bf16 %v1408_v32, %v1408_v32  ;;  %v1320_v38 = vsel %vm1304_vm10, %v1296_v26, %v1312_v35  ;;  %v1409_v41 = vsel %vm1393_vm11, %v1385_v28, %v1401_v36 }
 0x2f5   :  { %v1280_v40 = vpop.permute.xlu1 %1279  ;;  %v1630_v2 = vpack.c.bf16 %v1320_v38, %v1320_v38  ;;  %v1638_v11 = vpack.c.bf16 %v1409_v41, %v1409_v41  ;;  %v1250_v52 = vmul.f32 %v1237_v1, %v2394_v9  ;;  %v1379_v53 = vmul.f32 %v1237_v1, %v2396_v10 }
 0x2f6   :  { %1360 = vst.msk [vmem:[%s2559_s5 + $0xc] sm:$0xf] %vm1356_vm1, %v1629_v33  ;;  %1621 = vst.msk [vmem:[%s2559_s5 + $0x2c] sm:$0xf] %vm1356_vm1, %v1637_v34  ;;  %v1297_v42 = vadd.f32 %v1280_v40, %v1249_v45  ;;  %v1386_v43 = vadd.f32 %v1378_v46, %v1280_v40 }
 0x2f7   :  { %v1285_v44 = vpop.permute.xlu0 %1284  ;;  %1361 = vst.msk [vmem:[%s2559_s5 + $0x10] sm:$0xf] %vm1356_vm1, %v1630_v2  ;;  %1622 = vst.msk [vmem:[%s2559_s5 + $0x30] sm:$0xf] %vm1356_vm1, %v1638_v11 }
 0x2f8   :  { %vm1305_vm12 = vcmp.ge.f32.partialorder %v1297_v42, 0.0  ;;  %v1313_v25 = vmul.f32 0.2, %v1297_v42  ;;  %vm1394_vm13 = vcmp.ge.f32.partialorder %v1386_v43, 0.0  ;;  %v1402_v14 = vmul.f32 0.2, %v1386_v43 }
 0x2f9   :  { %v1298_v49 = vadd.f32 %v1285_v44, %v1250_v52  ;;  %v1387_v50 = vadd.f32 %v1379_v53, %v1285_v44  ;;  %v1242_v9 = vpop.permute.xlu1 %1241 }
 0x2fa   :  { %v1321_v51 = vsel %vm1305_vm12, %v1297_v42, %v1313_v25  ;;  %v1410_v10 = vsel %vm1394_vm13, %v1386_v43, %v1402_v14  ;;  %v1251_v7 = vmul.f32 %v1242_v9, %v2405_v37  ;;  %v1380_v55 = vmul.f32 %v1242_v9, %v2407_v15 }
 0x2fb   :  { %v1631_v3 = vpack.c.bf16 %v1321_v51, %v1321_v51  ;;  %v1639_v4 = vpack.c.bf16 %v1410_v10, %v1410_v10  ;;  %vm1306_vm14 = vcmp.ge.f32.partialorder %v1298_v49, 0.0  ;;  %v1314_v54 = vmul.f32 0.2, %v1298_v49 }
 0x2fc   :  { %vm1395_vm15 = vcmp.ge.f32.partialorder %v1387_v50, 0.0  ;;  %v1403_v27 = vmul.f32 0.2, %v1387_v50 }
 0x2fd   :  { %1362 = vst.msk [vmem:[%s2559_s5 + $0x14] sm:$0xf] %vm1356_vm1, %v1631_v3  ;;  %1623 = vst.msk [vmem:[%s2559_s5 + $0x34] sm:$0xf] %vm1356_vm1, %v1639_v4  ;;  %v1322_v56 = vsel %vm1306_vm14, %v1298_v49, %v1314_v54  ;;  %v1290_v20 = vpop.permute.xlu1 %1289 }
 0x2fe   :  { %v1632_v57 = vpack.c.bf16 %v1322_v56, %v1322_v56  ;;  %v1411_v58 = vsel %vm1395_vm15, %v1387_v50, %v1403_v27  ;;  %v1299_v59 = vadd.f32 %v1290_v20, %v1251_v7  ;;  %v1388_v61 = vadd.f32 %v1380_v55, %v1290_v20 }
 0x2ff   :  { %v1640_v62 = vpack.c.bf16 %v1411_v58, %v1411_v58 }
 0x300   :  { %1363 = vst.msk [vmem:[%s2559_s5 + $0x18] sm:$0xf] %vm1356_vm1, %v1632_v57  ;;  %vm1307_vm0 = vcmp.ge.f32.partialorder %v1299_v59, 0.0  ;;  %v1315_v37 = vmul.f32 0.2, %v1299_v59  ;;  %vm1396_vm2 = vcmp.ge.f32.partialorder %v1388_v61, 0.0 }
 0x301   :  { %v1404_v15 = vmul.f32 0.2, %v1388_v61  ;;  %1624 = vst.msk [vmem:[%s2559_s5 + $0x38] sm:$0xf] %vm1356_vm1, %v1640_v62 }
 0x302   :  { %v1323_v18 = vsel %vm1307_vm0, %v1299_v59, %v1315_v37 }
 0x303   :  { %v1412_v63 = vsel %vm1396_vm2, %v1388_v61, %v1404_v15  ;;  %v1633_v39 = vpack.c.bf16 %v1323_v18, %v1323_v18 }
 0x304   :  { %v1641_v23 = vpack.c.bf16 %v1412_v63, %v1412_v63 }
 0x305   :  { %1364 = vst.msk [vmem:[%s2559_s5 + $0x1c] sm:$0xf] %vm1356_vm1, %v1633_v39 }
 0x306   :  { %1625 = vst.msk [vmem:[%s2559_s5 + $0x3c] sm:$0xf] %vm1356_vm1, %v1641_v23 }

// kernel: image_classifier_forward.11
= control target key start
LH: loop header
LB: loop body
LE: loop exit
PB: predicated region body
PF: predicated region fallthrough
CT: control target
= control target key end

     0   :  { %v74_v8 = vlaneseq  ;;  %v408_v14 = vmov 1966171168   ;;  %s517_s0 = inlined_call_operand.vmem [shape: bf16[2,256], index: 0, kind: input, shape index: {}]   ;;  %s518_s1 = inlined_call_operand.vmem [shape: bf16[256,32], index: 1, kind: input, shape index: {}]   ;;  %s519_s2 = inlined_call_operand.vmem [shape: f32[1,32], index: 2, kind: input, shape index: {}]   ;;  %s520_s3 = inlined_call_operand.vmem [shape: bf16[32,2], index: 3, kind: input, shape index: {}]   ;;  %s521_s4 = inlined_call_operand.vmem [shape: f32[1,2], index: 4, kind: input, shape index: {}]   ;;  %s522_s5 = inlined_call_operand.hbm [shape: f32[2,2], index: 5, kind: output, shape index: {}]  }
   0x1   :  { %v366_v0 = vld [vmem:[%s518_s1 + $0x40] sm:$0xff]   ;;  %v368_v2 = vld [vmem:[%s518_s1 + $0x48] sm:$0xff]   ;;  %v370_v4 = vld [vmem:[%s518_s1 + $0x50] sm:$0xff]   ;;  %v72_v15 = vunpack.c.l.s4 %v408_v14 }
   0x2   :  { %v367_v1 = vld [vmem:[%s518_s1] sm:$0xff]   ;;  %329 = vmatprep.subr.bf16.mxu0 %v366_v0  ;;  %v369_v3 = vld [vmem:[%s518_s1 + $0x8] sm:$0xff]   ;;  %v371_v5 = vld [vmem:[%s518_s1 + $0x10] sm:$0xff]   ;;  %v75_v12 = vshrl.u32 %v74_v8, 7 }
   0x3   :  { %330 = vmatpush3.bf16.msra.mxu0 %v367_v1  ;;  %v372_v6 = vld [vmem:[%s518_s1 + $0x58] sm:$0xff]   ;;  %v374_v9 = vld [vmem:[%s518_s1 + $0x60] sm:$0xff]   ;;  %v376_v11 = vld [vmem:[%s518_s1 + $0x68] sm:$0xff]  }
   0x4   :  { %331 = vmatprep.subr.bf16.mxu0 %v368_v2  ;;  %v373_v7 = vld [vmem:[%s518_s1 + $0x18] sm:$0xff]   ;;  %v375_v10 = vld [vmem:[%s518_s1 + $0x20] sm:$0xff]  }
   0x5   :  { %v308_v13 = vld.sshfl [vmem:[%s517_s0] sm:$0x11 pattern:$0x75316420] }
   0x7   :  { %332 = vmatpush3.bf16.msra.mxu0 %v369_v3 }
   0x8   :  { %333 = vmatprep.subr.bf16.mxu0 %v370_v4 }
   0xb   :  { %334 = vmatpush3.bf16.msra.mxu0 %v371_v5 }
   0xc   :  { %335 = vmatprep.subr.bf16.mxu0 %v372_v6 }
   0xf   :  { %336 = vmatpush3.bf16.msra.mxu0 %v373_v7 }
  0x10   :  { %337 = vmatprep.subr.bf16.mxu0 %v374_v9 }
  0x11   :  { %10 = vsyncpa [#allocation3], 0  ;;  %v377_v16 = vld [vmem:[%s518_s1 + $0x28] sm:$0xff]   ;;  %v70_v17 = vcombine.high %v308_v13, %v308_v13  ;;  %v73_v18 = vunpack.c.0.s8 %v72_v15  ;;  %v378_v19 = vld [vmem:[%s518_s1 + $0x70] sm:$0xff]   ;;  %v409_v27 = vmov 0.0   ;;  %vm410_vm0 = vmmov 0  }
  0x12   :  { %v379_v21 = vld [vmem:[%s518_s1 + $0x30] sm:$0xff]   ;;  %v380_v23 = vld [vmem:[%s518_s1 + $0x78] sm:$0xff]   ;;  %v382_v26 = vld [vmem:[%s520_s3] sm:$0xff]   ;;  %354 = vmatprep.subr.bf16.mxu1 %v409_v27  ;;  %358 = vmatprep.mubr.msk.bf16.mxu1 %vm410_vm0, %v409_v27  ;;  %vm247_vm1 = vcmask 261120   ;;  %vm291_vm2 = vcmask 9216  }
  0x13   :  { %338 = vmatpush3.bf16.msra.mxu0 %v375_v10  ;;  %v76_v20 = vsub.s32 %v73_v18, %v75_v12  ;;  %v381_v24 = vld [vmem:[%s518_s1 + $0x38] sm:$0xff]   ;;  %355 = vmatpush3.bf16.msra.mxu1 %v382_v26  ;;  %v383_v28 = vld [vmem:[%s520_s3 + $0x8] sm:$0xff]   ;;  %v307_v30 = vld [vmem:[%s519_s2] ss:$0 sm:$0xff]  ;;  %s411_s3 = smov [#allocation2]  }
  0x14   :  { %339 = vmatprep.subr.bf16.mxu0 %v376_v11  ;;  %356 = vmatprep.subr.bf16.mxu1 %v409_v27  ;;  %v325_v37 = vld [vmem:[%s521_s4] ss:$0 sm:$0xff]  ;;  %s299_s8 = sshll.u32 %s411_s3, 4  ;;  %s300_s8 = int_to_ptr.vmem [resolvable:$true] %s299_s8 }
  0x15   :  { %v84_v22 = vrot.slane %v70_v17, %v76_v20  ;;  %v77_v25 = vrot.slane %v308_v13, %v76_v20  ;;  %s384_s2 = scalar_lea.vmem %s300_s8, 32  ;;  %p389_p1 = scmp.lt.s32.totalorder %s300_s8, %s300_s8 }
  0x16   :  { %p385_p0 = scmp.ne.s32.totalorder %s300_s8, %s384_s2  ;;  %p390_p2 = scmp.lt.s32.totalorder %s384_s2, %s384_s2 }
  0x17   :  { %340 = vmatpush3.bf16.msra.mxu0 %v377_v16  ;;  %215 = vmatprep.mubr.bf16.mxu0 %v84_v22 }
  0x18   :  { %341 = vmatprep.subr.bf16.mxu0 %v378_v19  ;;  %357 = vmatpush3.bf16.msra.mxu1 %v383_v28  ;;  %p391_p3 = por %p390_p2, %p389_p1 }
  0x1a   :  { %p392_p4 = pnand %p391_p3, %p385_p0 }
  0x1b   :  { %342 = vmatpush3.bf16.msra.mxu0 %v379_v21 }
  0x1c   :  { %343 = vmatprep.subr.bf16.mxu0 %v380_v23 }
  0x1f   :  { %344 = vmatpush3.bf16.msra.mxu0 %v381_v24 }
  0x22   :  { %216 = vmatmul.mubr.bf16.vlgmr.msra.gmra.mrb[0].mxu0 %v77_v25 }
  0xf5   :  { %v345_v29 = vpop.f32.mrb[0].mxu0 }
  0xf6   :  { %v346_v31 = vpop.f32.mrb[1].mxu0 }
  0xf7   :  { %v347_v32 = vadd.f32 %v346_v31, %v345_v29  ;;  %v348_v33 = vpop.f32.mrb[2].mxu0 }
  0xf8   :  { %v349_v34 = vpop.f32.mrb[3].mxu0 }
  0xf9   :  { %v218_v35 = vadd.f32 %v347_v32, %v307_v30 }
  0xfb   :  { %v223_v36 = vpack.c.bf16 %v218_v35, %v218_v35 }
  0xfd   :  { %359 = vmatmul.mubr.msk.bf16.vlgmr.msra.gmra.mrb[0].mxu1 %vm247_vm1, %v223_v36 }
 0x1d0   :  { %v285_v38 = vpop.f32.mrb[0].mxu1 }
 0x1d1   :  { %v286_v39 = vadd.f32 %v325_v37, %v285_v38  ;;  %v360_v40 = vpop.f32.mrb[1].mxu1 }
 0x1d2   :  { %v288_v41 = vpop.f32.mrb[2].mxu1 }
 0x1d3   :  { %v361_v42 = vpop.f32.mrb[3].mxu1  ;;  %292 = vst.msk [vmem:[#allocation2] sm:$0x3] %vm291_vm2, %v286_v39 }
 0x1d4   :  { %395 = shalt.err (!%p392_p4)
}
 0x1d5   :  { %s396_s4 = scalar_lea.hbm %s522_s5, 32 }
 0x1d6   :  { %p397_p5 = scmp.ne.s32.totalorder %s522_s5, %s396_s4  ;;  %p400_p6 = scmp.lt.u32.totalorder %s396_s4, %s522_s5 }
 0x1d8   :  { %p402_p7 = pnand %p400_p6, %p397_p5 }
 0x1da   :  { %405 = shalt.err (!%p402_p7)
}
 0x1db   :  { %302 = dma.vmem_to_hbm [thread:$0]  %s300_s8, 32, %s522_s5, [#allocation3]  }
 0x1dc   :  { %406 = dma.done.wait [#allocation3], 32  }
 0x1dd   :  { %407 = vsyncadd [#allocation3], 4294967264 }
 0x1de   :  { %306 = vsyncpa [#allocation3], 1 }

// kernel: image_classifier_forward.10
= control target key start
LH: loop header
LB: loop body
LE: loop exit
PB: predicated region body
PF: predicated region fallthrough
CT: control target
= control target key end

     0   :  { %v3121_v2 = vmov 0   ;;  %vm1033_vm0 = vcmask 31744   ;;  %vm2224_vm1 = vcmask 27648   ;;  %s4119_s0 = inlined_call_operand.vmem [shape: bf16[2,1024,4], index: 0, kind: input, shape index: {}]   ;;  %s4120_s1 = inlined_call_operand.vmem [shape: bf16[64,1024], index: 1, kind: input, shape index: {}]   ;;  %s4121_s2 = inlined_call_operand.vmem [shape: f32[64,1], index: 2, kind: input, shape index: {}]   ;;  %s4122_s3 = inlined_call_operand.vmem [shape: f32[64,1], index: 3, kind: input, shape index: {}]   ;;  %s4123_s4 = inlined_call_operand.vmem [shape: f32[64,1], index: 4, kind: input, shape index: {}]   ;;  %s4124_s5 = inlined_call_operand.vmem [shape: bf16[2,64,4], index: 5, kind: output, shape index: {}]  }
   0x1   :  { %v2977_v0 = vld [vmem:[%s4119_s0 + $0x40] sm:$0xff]   ;;  %2975 = vset.pattern.permute.xlu0 %v3121_v2  ;;  %2976 = vset.pattern.permute.xlu1 %v3121_v2  ;;  %v2981_v5 = vld [vmem:[%s4119_s0 + $0x48] sm:$0xff]   ;;  %v2985_v9 = vld [vmem:[%s4119_s0 + $0x50] sm:$0xff]  }
   0x2   :  { %v2978_v1 = vld [vmem:[%s4119_s0 + $0xc0] sm:$0xff]   ;;  %2654 = vmatprep.subr.bf16.mxu0 %v2977_v0  ;;  %v2982_v6 = vld [vmem:[%s4119_s0 + $0xc8] sm:$0xff]   ;;  %v2986_v10 = vld [vmem:[%s4119_s0 + $0xd0] sm:$0xff]  }
   0x3   :  { %v2979_v3 = vld [vmem:[%s4119_s0] sm:$0xff]   ;;  %2694 = vmatprep.subr.bf16.mxu1 %v2978_v1  ;;  %v2983_v7 = vld [vmem:[%s4119_s0 + $0x8] sm:$0xff]   ;;  %v2987_v11 = vld [vmem:[%s4119_s0 + $0x10] sm:$0xff]  }
   0x4   :  { %v2980_v4 = vld [vmem:[%s4119_s0 + $0x80] sm:$0xff]   ;;  %2655 = vmatpush3.bf16.msra.mxu0 %v2979_v3  ;;  %v2984_v8 = vld [vmem:[%s4119_s0 + $0x88] sm:$0xff]   ;;  %v2988_v12 = vld [vmem:[%s4119_s0 + $0x90] sm:$0xff]  }
   0x5   :  { %2695 = vmatpush3.bf16.msra.mxu1 %v2980_v4  ;;  %2656 = vmatprep.subr.bf16.mxu0 %v2981_v5  ;;  %v2989_v13 = vld [vmem:[%s4119_s0 + $0x58] sm:$0xff]   ;;  %v2993_v17 = vld [vmem:[%s4119_s0 + $0x60] sm:$0xff]   ;;  %v2997_v21 = vld [vmem:[%s4119_s0 + $0x68] sm:$0xff]  }
   0x6   :  { %2696 = vmatprep.subr.bf16.mxu1 %v2982_v6  ;;  %v2990_v14 = vld [vmem:[%s4119_s0 + $0xd8] sm:$0xff]   ;;  %v2994_v18 = vld [vmem:[%s4119_s0 + $0xe0] sm:$0xff]   ;;  %v2998_v22 = vld [vmem:[%s4119_s0 + $0xe8] sm:$0xff]  }
   0x7   :  { %v2991_v15 = vld [vmem:[%s4119_s0 + $0x18] sm:$0xff]   ;;  %v2995_v19 = vld [vmem:[%s4119_s0 + $0x20] sm:$0xff]   ;;  %v2999_v23 = vld [vmem:[%s4119_s0 + $0x28] sm:$0xff]  }
   0x8   :  { %2657 = vmatpush3.bf16.msra.mxu0 %v2983_v7  ;;  %v2992_v16 = vld [vmem:[%s4119_s0 + $0x98] sm:$0xff]   ;;  %v2996_v20 = vld [vmem:[%s4119_s0 + $0xa0] sm:$0xff]   ;;  %v3000_v24 = vld [vmem:[%s4119_s0 + $0xa8] sm:$0xff]  }
   0x9   :  { %2697 = vmatpush3.bf16.msra.mxu1 %v2984_v8  ;;  %2658 = vmatprep.subr.bf16.mxu0 %v2985_v9  ;;  %v3001_v25 = vld [vmem:[%s4119_s0 + $0x70] sm:$0xff]   ;;  %v3005_v29 = vld [vmem:[%s4119_s0 + $0x78] sm:$0xff]   ;;  %v21_v33 = vld [vmem:[%s4120_s1] sm:$0xff] }
   0xa   :  { %2698 = vmatprep.subr.bf16.mxu1 %v2986_v10  ;;  %v3002_v26 = vld [vmem:[%s4119_s0 + $0xf0] sm:$0xff]   ;;  %v3006_v30 = vld [vmem:[%s4119_s0 + $0xf8] sm:$0xff]   ;;  %v25_v34 = vld [vmem:[%s4120_s1 + $0x20] sm:$0xff] }
   0xb   :  { %v3003_v27 = vld [vmem:[%s4119_s0 + $0x30] sm:$0xff]   ;;  %v3007_v31 = vld [vmem:[%s4119_s0 + $0x38] sm:$0xff]   ;;  %v22_v35 = vld [vmem:[%s4120_s1 + $0x8] sm:$0xff]  ;;  %v3257_v36 = vcombine.low %v21_v33, %v25_v34  ;;  %v3259_v37 = vcombine.high %v21_v33, %v25_v34 }
   0xc   :  { %2659 = vmatpush3.bf16.msra.mxu0 %v2987_v11  ;;  %v3004_v28 = vld [vmem:[%s4119_s0 + $0xb0] sm:$0xff]   ;;  %v3008_v32 = vld [vmem:[%s4119_s0 + $0xb8] sm:$0xff]   ;;  %v26_v38 = vld [vmem:[%s4120_s1 + $0x28] sm:$0xff] }
   0xd   :  { %2699 = vmatpush3.bf16.msra.mxu1 %v2988_v12  ;;  %2660 = vmatprep.subr.bf16.mxu0 %v2989_v13  ;;  %v3264_v39 = vcombine.low %v22_v35, %v26_v38  ;;  %v3266_v40 = vcombine.high %v22_v35, %v26_v38  ;;  %v3009_v41 = vld [vmem:[%s4119_s0 + $0x140] sm:$0xff]   ;;  %v3013_v45 = vld [vmem:[%s4119_s0 + $0x148] sm:$0xff]   ;;  %v3017_v57 = vld [vmem:[%s4119_s0 + $0x150] sm:$0xff]  }
   0xe   :  { %2700 = vmatprep.subr.bf16.mxu1 %v2990_v14  ;;  %805 = vmatprep.mubr.bf16.mxu0 %v3259_v37  ;;  %v3010_v42 = vld [vmem:[%s4119_s0 + $0x1c0] sm:$0xff]   ;;  %v3014_v46 = vld [vmem:[%s4119_s0 + $0x1c8] sm:$0xff]   ;;  %v3018_v58 = vld [vmem:[%s4119_s0 + $0x1d0] sm:$0xff]  }
   0xf   :  { %870 = vmatprep.mubr.bf16.mxu1 %v3266_v40  ;;  %v3011_v43 = vld [vmem:[%s4119_s0 + $0x100] sm:$0xff]   ;;  %v3015_v47 = vld [vmem:[%s4119_s0 + $0x108] sm:$0xff]   ;;  %v3019_v59 = vld [vmem:[%s4119_s0 + $0x110] sm:$0xff]  }
  0x10   :  { %2661 = vmatpush3.bf16.msra.mxu0 %v2991_v15  ;;  %v3012_v44 = vld [vmem:[%s4119_s0 + $0x180] sm:$0xff]   ;;  %v3016_v48 = vld [vmem:[%s4119_s0 + $0x188] sm:$0xff]   ;;  %v3020_v60 = vld [vmem:[%s4119_s0 + $0x190] sm:$0xff]  }
  0x11   :  { %2701 = vmatpush3.bf16.msra.mxu1 %v2992_v16  ;;  %2662 = vmatprep.subr.bf16.mxu0 %v2993_v17  ;;  %v29_v49 = vld [vmem:[%s4120_s1 + $0x40] sm:$0xff]  ;;  %v30_v52 = vld [vmem:[%s4120_s1 + $0x48] sm:$0xff]  ;;  %v3021_v61 = vld [vmem:[%s4119_s0 + $0x158] sm:$0xff]  }
  0x12   :  { %2702 = vmatprep.subr.bf16.mxu1 %v2994_v18  ;;  %v33_v50 = vld [vmem:[%s4120_s1 + $0x60] sm:$0xff]  ;;  %v34_v53 = vld [vmem:[%s4120_s1 + $0x68] sm:$0xff]  ;;  %v3022_v62 = vld [vmem:[%s4119_s0 + $0x1d8] sm:$0xff]  }
  0x13   :  { %v3302_v51 = vcombine.high %v29_v49, %v33_v50  ;;  %v3310_v54 = vcombine.low %v29_v49, %v33_v50  ;;  %v3312_v55 = vcombine.high %v30_v52, %v34_v53  ;;  %v3314_v56 = vcombine.low %v30_v52, %v34_v53  ;;  %v3023_v63 = vld [vmem:[%s4119_s0 + $0x118] sm:$0xff]   ;;  %v37_v1 = vld [vmem:[%s4120_s1 + $0x80] sm:$0xff]  ;;  %v38_v3 = vld [vmem:[%s4120_s1 + $0x88] sm:$0xff] }
  0x14   :  { %2663 = vmatpush3.bf16.msra.mxu0 %v2995_v19  ;;  %v3024_v0 = vld [vmem:[%s4119_s0 + $0x198] sm:$0xff]   ;;  %v41_v2 = vld [vmem:[%s4120_s1 + $0xa0] sm:$0xff]  ;;  %v42_v4 = vld [vmem:[%s4120_s1 + $0xa8] sm:$0xff] }
  0x15   :  { %2703 = vmatpush3.bf16.msra.mxu1 %v2996_v20  ;;  %2664 = vmatprep.subr.bf16.mxu0 %v2997_v21  ;;  %v3356_v5 = vcombine.high %v37_v1, %v41_v2  ;;  %v3358_v6 = vcombine.high %v38_v3, %v42_v4  ;;  %v3360_v7 = vcombine.low %v37_v1, %v41_v2  ;;  %v3025_v9 = vld [vmem:[%s4119_s0 + $0x160] sm:$0xff]   ;;  %v3029_v13 = vld [vmem:[%s4119_s0 + $0x168] sm:$0xff]   ;;  %v23_v33 = vld [vmem:[%s4120_s1 + $0x10] sm:$0xff] }
  0x16   :  { %2704 = vmatprep.subr.bf16.mxu1 %v2998_v22  ;;  %v3362_v8 = vcombine.low %v38_v3, %v42_v4  ;;  %v3026_v10 = vld [vmem:[%s4119_s0 + $0x1e0] sm:$0xff]   ;;  %v3030_v14 = vld [vmem:[%s4119_s0 + $0x1e8] sm:$0xff]   ;;  %v27_v34 = vld [vmem:[%s4120_s1 + $0x30] sm:$0xff] }
  0x17   :  { %v3027_v11 = vld [vmem:[%s4119_s0 + $0x120] sm:$0xff]   ;;  %v3031_v15 = vld [vmem:[%s4119_s0 + $0x128] sm:$0xff]   ;;  %v3446_v35 = vcombine.low %v23_v33, %v27_v34  ;;  %v3448_v38 = vcombine.high %v23_v33, %v27_v34  ;;  %v3049_v1 = vld [vmem:[%s4119_s0 + $0x250] sm:$0xff]  }
  0x18   :  { %2665 = vmatpush3.bf16.msra.mxu0 %v2999_v23  ;;  %v3028_v12 = vld [vmem:[%s4119_s0 + $0x1a0] sm:$0xff]   ;;  %v3032_v16 = vld [vmem:[%s4119_s0 + $0x1a8] sm:$0xff]   ;;  %v3050_v2 = vld [vmem:[%s4119_s0 + $0x2d0] sm:$0xff]  }
  0x19   :  { %2705 = vmatpush3.bf16.msra.mxu1 %v3000_v24  ;;  %2666 = vmatprep.subr.bf16.mxu0 %v3001_v25  ;;  %v45_v17 = vld [vmem:[%s4120_s1 + $0xc0] sm:$0xff]  ;;  %v46_v19 = vld [vmem:[%s4120_s1 + $0xc8] sm:$0xff]  ;;  %v3033_v25 = vld [vmem:[%s4119_s0 + $0x170] sm:$0xff]  }
  0x1a   :  { %2706 = vmatprep.subr.bf16.mxu1 %v3002_v26  ;;  %v49_v18 = vld [vmem:[%s4120_s1 + $0xe0] sm:$0xff]  ;;  %v50_v21 = vld [vmem:[%s4120_s1 + $0xe8] sm:$0xff]  ;;  %v3034_v26 = vld [vmem:[%s4119_s0 + $0x1f0] sm:$0xff]  }
  0x1b   :  { %v3401_v20 = vcombine.high %v45_v17, %v49_v18  ;;  %v3406_v22 = vcombine.low %v45_v17, %v49_v18  ;;  %v3408_v23 = vcombine.high %v46_v19, %v50_v21  ;;  %v3410_v24 = vcombine.low %v46_v19, %v50_v21  ;;  %v3045_v49 = vld [vmem:[%s4119_s0 + $0x248] sm:$0xff]   ;;  %v3051_v3 = vld [vmem:[%s4119_s0 + $0x210] sm:$0xff]   ;;  %v44_v17 = vld [vmem:[%s4120_s1 + $0xb8] sm:$0xff] }
  0x1c   :  { %2667 = vmatpush3.bf16.msra.mxu0 %v3003_v27  ;;  %v3035_v27 = vld [vmem:[%s4119_s0 + $0x130] sm:$0xff]   ;;  %v3046_v50 = vld [vmem:[%s4119_s0 + $0x2c8] sm:$0xff]  }
  0x1d   :  { %2707 = vmatpush3.bf16.msra.mxu1 %v3004_v28  ;;  %2668 = vmatprep.subr.bf16.mxu0 %v3005_v29  ;;  %v3036_v28 = vld [vmem:[%s4119_s0 + $0x1b0] sm:$0xff]   ;;  %v3037_v29 = vld [vmem:[%s4119_s0 + $0x178] sm:$0xff]   ;;  %v3047_v52 = vld [vmem:[%s4119_s0 + $0x208] sm:$0xff]  }
  0x1e   :  { %2708 = vmatprep.subr.bf16.mxu1 %v3006_v30  ;;  %v3038_v30 = vld [vmem:[%s4119_s0 + $0x1f8] sm:$0xff]   ;;  %v3048_v53 = vld [vmem:[%s4119_s0 + $0x288] sm:$0xff]   ;;  %v3052_v4 = vld [vmem:[%s4119_s0 + $0x290] sm:$0xff]  }
  0x1f   :  { %v47_v33 = vld [vmem:[%s4120_s1 + $0xd0] sm:$0xff] }
  0x20   :  { %2669 = vmatpush3.bf16.msra.mxu0 %v3007_v31  ;;  %v3039_v31 = vld [vmem:[%s4119_s0 + $0x138] sm:$0xff]   ;;  %v51_v34 = vld [vmem:[%s4120_s1 + $0xf0] sm:$0xff] }
  0x21   :  { %2709 = vmatpush3.bf16.msra.mxu1 %v3008_v32  ;;  %2734 = vmatprep.subr.bf16.mxu0 %v3009_v41  ;;  %v3040_v32 = vld [vmem:[%s4119_s0 + $0x1b8] sm:$0xff]  }
  0x22   :  { %2774 = vmatprep.subr.bf16.mxu1 %v3010_v42  ;;  %v24_v41 = vld [vmem:[%s4120_s1 + $0x18] sm:$0xff] }
  0x23   :  { %806 = vmatmul.mubr.bf16.vlgmr.msra.gmra.mrb[0].mxu0 %v3257_v36  ;;  %v28_v42 = vld [vmem:[%s4120_s1 + $0x38] sm:$0xff] }
  0x24   :  { %871 = vmatmul.mubr.bf16.vlgmr.msra.gmra.mrb[0].mxu1 %v3264_v39  ;;  %2735 = vmatpush3.bf16.msra.mxu0 %v3011_v43  ;;  %v3456_v43 = vcombine.low %v24_v41, %v28_v42 }
  0x25   :  { %2775 = vmatpush3.bf16.msra.mxu1 %v3012_v44  ;;  %2736 = vmatprep.subr.bf16.mxu0 %v3013_v45  ;;  %v3458_v44 = vcombine.high %v24_v41, %v28_v42  ;;  %v3041_v45 = vld [vmem:[%s4119_s0 + $0x240] sm:$0xff]   ;;  %v3590_v41 = vcombine.high %v47_v33, %v51_v34  ;;  %v48_v42 = vld [vmem:[%s4120_s1 + $0xd8] sm:$0xff] }
  0x26   :  { %2776 = vmatprep.subr.bf16.mxu1 %v3014_v46  ;;  %813 = vmatprep.mubr.bf16.mxu0 %v3302_v51  ;;  %v3042_v46 = vld [vmem:[%s4119_s0 + $0x2c0] sm:$0xff]  }
  0x27   :  { %878 = vmatprep.mubr.bf16.mxu1 %v3312_v55 }
  0x28   :  { %2737 = vmatpush3.bf16.msra.mxu0 %v3015_v47  ;;  %v3043_v47 = vld [vmem:[%s4119_s0 + $0x200] sm:$0xff]  }
  0x29   :  { %2777 = vmatpush3.bf16.msra.mxu1 %v3016_v48  ;;  %2738 = vmatprep.subr.bf16.mxu0 %v3017_v57  ;;  %v3044_v48 = vld [vmem:[%s4119_s0 + $0x280] sm:$0xff]   ;;  %v31_v57 = vld [vmem:[%s4120_s1 + $0x50] sm:$0xff] }
  0x2a   :  { %2778 = vmatprep.subr.bf16.mxu1 %v3018_v58  ;;  %v35_v58 = vld [vmem:[%s4120_s1 + $0x70] sm:$0xff] }
  0x2b   :  { %814 = vmatmul.mubr.bf16.gmra.mrb[4].mxu0 %v3310_v54 }
  0x2c   :  { %879 = vmatmul.mubr.bf16.gmra.mrb[4].mxu1 %v3314_v56  ;;  %2739 = vmatpush3.bf16.msra.mxu0 %v3019_v59  ;;  %v32_v59 = vld [vmem:[%s4120_s1 + $0x58] sm:$0xff] }
  0x2d   :  { %2779 = vmatpush3.bf16.msra.mxu1 %v3020_v60  ;;  %2740 = vmatprep.subr.bf16.mxu0 %v3021_v61  ;;  %v36_v60 = vld [vmem:[%s4120_s1 + $0x78] sm:$0xff]  ;;  %v3500_v61 = vcombine.high %v31_v57, %v35_v58 }
  0x2e   :  { %2780 = vmatprep.subr.bf16.mxu1 %v3022_v62  ;;  %821 = vmatprep.mubr.bf16.mxu0 %v3356_v5  ;;  %v3502_v62 = vcombine.high %v32_v59, %v36_v60 }
  0x2f   :  { %886 = vmatprep.mubr.bf16.mxu1 %v3358_v6 }
  0x30   :  { %2741 = vmatpush3.bf16.msra.mxu0 %v3023_v63  ;;  %v3504_v63 = vcombine.low %v31_v57, %v35_v58  ;;  %v3069_v57 = vld [vmem:[%s4119_s0 + $0x278] sm:$0xff]  }
  0x31   :  { %2781 = vmatpush3.bf16.msra.mxu1 %v3024_v0  ;;  %2742 = vmatprep.subr.bf16.mxu0 %v3025_v9  ;;  %v3506_v0 = vcombine.low %v32_v59, %v36_v60  ;;  %v3053_v9 = vld [vmem:[%s4119_s0 + $0x258] sm:$0xff]  }
  0x32   :  { %2782 = vmatprep.subr.bf16.mxu1 %v3026_v10  ;;  %v3054_v10 = vld [vmem:[%s4119_s0 + $0x2d8] sm:$0xff]  }
  0x33   :  { %822 = vmatmul.mubr.bf16.gmra.mrb[8].mxu0 %v3360_v7  ;;  %v3070_v58 = vld [vmem:[%s4119_s0 + $0x2f8] sm:$0xff]  }
  0x34   :  { %887 = vmatmul.mubr.bf16.gmra.mrb[8].mxu1 %v3362_v8  ;;  %2743 = vmatpush3.bf16.msra.mxu0 %v3027_v11  ;;  %v3055_v11 = vld [vmem:[%s4119_s0 + $0x218] sm:$0xff]  }
  0x35   :  { %2783 = vmatpush3.bf16.msra.mxu1 %v3028_v12  ;;  %2744 = vmatprep.subr.bf16.mxu0 %v3029_v13  ;;  %v3056_v12 = vld [vmem:[%s4119_s0 + $0x298] sm:$0xff]   ;;  %v39_v13 = vld [vmem:[%s4120_s1 + $0x90] sm:$0xff] }
  0x36   :  { %2784 = vmatprep.subr.bf16.mxu1 %v3030_v14  ;;  %829 = vmatprep.mubr.bf16.mxu0 %v3401_v20  ;;  %v43_v14 = vld [vmem:[%s4120_s1 + $0xb0] sm:$0xff]  ;;  %v3071_v59 = vld [vmem:[%s4119_s0 + $0x238] sm:$0xff]  }
  0x37   :  { %894 = vmatprep.mubr.bf16.mxu1 %v3408_v23  ;;  %v3550_v18 = vcombine.low %v39_v13, %v43_v14  ;;  %v3072_v60 = vld [vmem:[%s4119_s0 + $0x2b8] sm:$0xff]  }
  0x38   :  { %2745 = vmatpush3.bf16.msra.mxu0 %v3031_v15  ;;  %v40_v15 = vld [vmem:[%s4120_s1 + $0x98] sm:$0xff] }
  0x39   :  { %2785 = vmatpush3.bf16.msra.mxu1 %v3032_v16  ;;  %2746 = vmatprep.subr.bf16.mxu0 %v3033_v25  ;;  %v3545_v16 = vcombine.high %v39_v13, %v43_v14  ;;  %v3552_v19 = vcombine.high %v40_v15, %v44_v17  ;;  %v3554_v21 = vcombine.low %v40_v15, %v44_v17  ;;  %v3057_v25 = vld [vmem:[%s4119_s0 + $0x260] sm:$0xff]   ;;  %v3093_v15 = vld [vmem:[%s4119_s0 + $0x368] sm:$0xff]  }
  0x3a   :  { %2786 = vmatprep.subr.bf16.mxu1 %v3034_v26  ;;  %v3058_v26 = vld [vmem:[%s4119_s0 + $0x2e0] sm:$0xff]   ;;  %v3094_v17 = vld [vmem:[%s4119_s0 + $0x3e8] sm:$0xff]  }
  0x3b   :  { %830 = vmatmul.mubr.bf16.gmra.mrb[12].mxu0 %v3406_v22  ;;  %v3089_v13 = vld [vmem:[%s4119_s0 + $0x360] sm:$0xff]  }
  0x3c   :  { %895 = vmatmul.mubr.bf16.gmra.mrb[12].mxu1 %v3410_v24  ;;  %2747 = vmatpush3.bf16.msra.mxu0 %v3035_v27  ;;  %v3059_v27 = vld [vmem:[%s4119_s0 + $0x220] sm:$0xff]  }
  0x3d   :  { %2787 = vmatpush3.bf16.msra.mxu1 %v3036_v28  ;;  %2748 = vmatprep.subr.bf16.mxu0 %v3037_v29  ;;  %v3060_v28 = vld [vmem:[%s4119_s0 + $0x2a0] sm:$0xff]   ;;  %v3061_v29 = vld [vmem:[%s4119_s0 + $0x268] sm:$0xff]  }
  0x3e   :  { %2788 = vmatprep.subr.bf16.mxu1 %v3038_v30  ;;  %935 = vmatprep.mubr.bf16.mxu0 %v3448_v38  ;;  %v3062_v30 = vld [vmem:[%s4119_s0 + $0x2e8] sm:$0xff]   ;;  %v3092_v14 = vld [vmem:[%s4119_s0 + $0x3a0] sm:$0xff]  }
  0x3f   :  { %1000 = vmatprep.mubr.bf16.mxu1 %v3458_v44 }
  0x40   :  { %2749 = vmatpush3.bf16.msra.mxu0 %v3039_v31  ;;  %v3063_v31 = vld [vmem:[%s4119_s0 + $0x228] sm:$0xff]  }
  0x41   :  { %2789 = vmatpush3.bf16.msra.mxu1 %v3040_v32  ;;  %2814 = vmatprep.subr.bf16.mxu0 %v3041_v45  ;;  %v3064_v32 = vld [vmem:[%s4119_s0 + $0x2a8] sm:$0xff]   ;;  %v52_v45 = vld [vmem:[%s4120_s1 + $0xf8] sm:$0xff] }
  0x42   :  { %2854 = vmatprep.subr.bf16.mxu1 %v3042_v46  ;;  %v3598_v46 = vcombine.low %v47_v33, %v51_v34  ;;  %v58_v33 = vld [vmem:[%s4121_s2 + $0x28] sm:$0xff]  ;;  %v60_v34 = vld [vmem:[%s4121_s2 + $0x38] sm:$0xff] }
  0x43   :  { %936 = vmatmul.mubr.bf16.vlgmr.msra.gmra.mrb[16].mxu0 %v3446_v35 }
  0x44   :  { %1001 = vmatmul.mubr.bf16.vlgmr.msra.gmra.mrb[16].mxu1 %v3456_v43  ;;  %2815 = vmatpush3.bf16.msra.mxu0 %v3043_v47  ;;  %v3600_v47 = vcombine.high %v48_v42, %v52_v45 }
  0x45   :  { %2855 = vmatpush3.bf16.msra.mxu1 %v3044_v48  ;;  %2816 = vmatprep.subr.bf16.mxu0 %v3045_v49  ;;  %v3602_v48 = vcombine.low %v48_v42, %v52_v45  ;;  %v3065_v49 = vld [vmem:[%s4119_s0 + $0x270] sm:$0xff]  }
  0x46   :  { %2856 = vmatprep.subr.bf16.mxu1 %v3046_v50  ;;  %943 = vmatprep.mubr.bf16.mxu0 %v3500_v61  ;;  %v3066_v50 = vld [vmem:[%s4119_s0 + $0x2f0] sm:$0xff]  }
  0x47   :  { %1008 = vmatprep.mubr.bf16.mxu1 %v3502_v62 }
  0x48   :  { %2817 = vmatpush3.bf16.msra.mxu0 %v3047_v52  ;;  %v3067_v52 = vld [vmem:[%s4119_s0 + $0x230] sm:$0xff]  }
  0x49   :  { %2857 = vmatpush3.bf16.msra.mxu1 %v3048_v53  ;;  %2818 = vmatprep.subr.bf16.mxu0 %v3049_v1  ;;  %v3068_v53 = vld [vmem:[%s4119_s0 + $0x2b0] sm:$0xff]   ;;  %v3073_v1 = vld [vmem:[%s4119_s0 + $0x340] sm:$0xff]  }
  0x4a   :  { %2858 = vmatprep.subr.bf16.mxu1 %v3050_v2  ;;  %v3076_v2 = vld [vmem:[%s4119_s0 + $0x380] sm:$0xff]  }
  0x4b   :  { %944 = vmatmul.mubr.bf16.gmra.mrb[20].mxu0 %v3504_v63 }
  0x4c   :  { %1009 = vmatmul.mubr.bf16.gmra.mrb[20].mxu1 %v3506_v0  ;;  %2819 = vmatpush3.bf16.msra.mxu0 %v3051_v3  ;;  %v3077_v3 = vld [vmem:[%s4119_s0 + $0x348] sm:$0xff]  }
  0x4d   :  { %2859 = vmatpush3.bf16.msra.mxu1 %v3052_v4  ;;  %2820 = vmatprep.subr.bf16.mxu0 %v3053_v9  ;;  %v3078_v4 = vld [vmem:[%s4119_s0 + $0x3c8] sm:$0xff]   ;;  %v3081_v9 = vld [vmem:[%s4119_s0 + $0x350] sm:$0xff]  }
  0x4e   :  { %2860 = vmatprep.subr.bf16.mxu1 %v3054_v10  ;;  %951 = vmatprep.mubr.bf16.mxu0 %v3545_v16  ;;  %v3084_v10 = vld [vmem:[%s4119_s0 + $0x390] sm:$0xff]  }
  0x4f   :  { %1016 = vmatprep.mubr.bf16.mxu1 %v3552_v19 }
  0x50   :  { %2821 = vmatpush3.bf16.msra.mxu0 %v3055_v11  ;;  %v3085_v11 = vld [vmem:[%s4119_s0 + $0x358] sm:$0xff]  }
  0x51   :  { %2861 = vmatpush3.bf16.msra.mxu1 %v3056_v12  ;;  %2822 = vmatprep.subr.bf16.mxu0 %v3057_v25  ;;  %v3086_v12 = vld [vmem:[%s4119_s0 + $0x3d8] sm:$0xff]   ;;  %v3096_v25 = vld [vmem:[%s4119_s0 + $0x3a8] sm:$0xff]  }
  0x52   :  { %2862 = vmatprep.subr.bf16.mxu1 %v3058_v26  ;;  %v3097_v26 = vld [vmem:[%s4119_s0 + $0x370] sm:$0xff]  }
  0x53   :  { %952 = vmatmul.mubr.bf16.gmra.mrb[24].mxu0 %v3550_v18 }
  0x54   :  { %1017 = vmatmul.mubr.bf16.gmra.mrb[24].mxu1 %v3554_v21  ;;  %2823 = vmatpush3.bf16.msra.mxu0 %v3059_v27  ;;  %v54_v27 = vld [vmem:[%s4121_s2 + $0x8] sm:$0xff] }
  0x55   :  { %2863 = vmatpush3.bf16.msra.mxu1 %v3060_v28  ;;  %2824 = vmatprep.subr.bf16.mxu0 %v3061_v29  ;;  %v3100_v28 = vld [vmem:[%s4119_s0 + $0x3b0] sm:$0xff]   ;;  %v3101_v29 = vld [vmem:[%s4119_s0 + $0x378] sm:$0xff]  }
  0x56   :  { %2864 = vmatprep.subr.bf16.mxu1 %v3062_v30  ;;  %959 = vmatprep.mubr.bf16.mxu0 %v3590_v41  ;;  %v3103_v30 = vld [vmem:[%s4119_s0 + $0x338] sm:$0xff]  }
  0x57   :  { %1024 = vmatprep.mubr.bf16.mxu1 %v3600_v47 }
  0x58   :  { %2825 = vmatpush3.bf16.msra.mxu0 %v3063_v31  ;;  %v56_v31 = vld [vmem:[%s4121_s2 + $0x18] sm:$0xff] }
  0x59   :  { %2865 = vmatpush3.bf16.msra.mxu1 %v3064_v32  ;;  %2826 = vmatprep.subr.bf16.mxu0 %v3065_v49  ;;  %v59_v32 = vld [vmem:[%s4121_s2 + $0x30] sm:$0xff] }
  0x5a   :  { %2866 = vmatprep.subr.bf16.mxu1 %v3066_v50 }
  0x5b   :  { %960 = vmatmul.mubr.bf16.gmra.mrb[28].mxu0 %v3598_v46 }
  0x5c   :  { %1025 = vmatmul.mubr.bf16.gmra.mrb[28].mxu1 %v3602_v48  ;;  %2827 = vmatpush3.bf16.msra.mxu0 %v3067_v52 }
  0x5d   :  { %2867 = vmatpush3.bf16.msra.mxu1 %v3068_v53  ;;  %1619 = vmatprep.mubr.bf16.mxu0 %v3259_v37  ;;  %v3074_v37 = vld [vmem:[%s4119_s0 + $0x3c0] sm:$0xff]  }
  0x5e   :  { %2828 = vmatprep.subr.bf16.mxu0 %v3069_v57  ;;  %1684 = vmatprep.mubr.bf16.mxu1 %v3266_v40  ;;  %v3075_v40 = vld [vmem:[%s4119_s0 + $0x300] sm:$0xff]  }
  0x5f   :  { %2868 = vmatprep.subr.bf16.mxu1 %v3070_v58 }
  0x60   :  { %2829 = vmatpush3.bf16.msra.mxu0 %v3071_v59 }
  0x61   :  { %2869 = vmatpush3.bf16.msra.mxu1 %v3072_v60  ;;  %2894 = vmatprep.subr.bf16.mxu0 %v3073_v1 }
  0x62   :  { %2934 = vmatprep.subr.bf16.mxu1 %v3074_v37 }
  0x63   :  { %1620 = vmatmul.mubr.bf16.vlgmr.msra.gmra.mrb[32].mxu0 %v3257_v36  ;;  %v3079_v36 = vld [vmem:[%s4119_s0 + $0x308] sm:$0xff]  }
  0x64   :  { %1685 = vmatmul.mubr.bf16.vlgmr.msra.gmra.mrb[32].mxu1 %v3264_v39  ;;  %2895 = vmatpush3.bf16.msra.mxu0 %v3075_v40  ;;  %v3080_v39 = vld [vmem:[%s4119_s0 + $0x388] sm:$0xff]  }
  0x65   :  { %2935 = vmatpush3.bf16.msra.mxu1 %v3076_v2  ;;  %1627 = vmatprep.mubr.bf16.mxu0 %v3302_v51  ;;  %v3082_v51 = vld [vmem:[%s4119_s0 + $0x3d0] sm:$0xff]  }
  0x66   :  { %2896 = vmatprep.subr.bf16.mxu0 %v3077_v3  ;;  %1692 = vmatprep.mubr.bf16.mxu1 %v3312_v55  ;;  %v3083_v55 = vld [vmem:[%s4119_s0 + $0x310] sm:$0xff]  }
  0x67   :  { %2936 = vmatprep.subr.bf16.mxu1 %v3078_v4 }
  0x68   :  { %2897 = vmatpush3.bf16.msra.mxu0 %v3079_v36 }
  0x69   :  { %2937 = vmatpush3.bf16.msra.mxu1 %v3080_v39  ;;  %2898 = vmatprep.subr.bf16.mxu0 %v3081_v9 }
  0x6a   :  { %2938 = vmatprep.subr.bf16.mxu1 %v3082_v51 }
  0x6b   :  { %1628 = vmatmul.mubr.bf16.gmra.mrb[36].mxu0 %v3310_v54  ;;  %v3087_v54 = vld [vmem:[%s4119_s0 + $0x318] sm:$0xff]  }
  0x6c   :  { %1693 = vmatmul.mubr.bf16.gmra.mrb[36].mxu1 %v3314_v56  ;;  %2899 = vmatpush3.bf16.msra.mxu0 %v3083_v55  ;;  %v3088_v56 = vld [vmem:[%s4119_s0 + $0x398] sm:$0xff]  }
  0x6d   :  { %2939 = vmatpush3.bf16.msra.mxu1 %v3084_v10  ;;  %1635 = vmatprep.mubr.bf16.mxu0 %v3356_v5  ;;  %v3090_v5 = vld [vmem:[%s4119_s0 + $0x3e0] sm:$0xff]  }
  0x6e   :  { %2900 = vmatprep.subr.bf16.mxu0 %v3085_v11  ;;  %1700 = vmatprep.mubr.bf16.mxu1 %v3358_v6  ;;  %v3091_v6 = vld [vmem:[%s4119_s0 + $0x320] sm:$0xff]  }
  0x6f   :  { %2940 = vmatprep.subr.bf16.mxu1 %v3086_v12 }
  0x70   :  { %2901 = vmatpush3.bf16.msra.mxu0 %v3087_v54 }
  0x71   :  { %2941 = vmatpush3.bf16.msra.mxu1 %v3088_v56  ;;  %2902 = vmatprep.subr.bf16.mxu0 %v3089_v13 }
  0x72   :  { %2942 = vmatprep.subr.bf16.mxu1 %v3090_v5 }
  0x73   :  { %1636 = vmatmul.mubr.bf16.gmra.mrb[40].mxu0 %v3360_v7  ;;  %v53_v7 = vld [vmem:[%s4121_s2] sm:$0xff] }
  0x74   :  { %1701 = vmatmul.mubr.bf16.gmra.mrb[40].mxu1 %v3362_v8  ;;  %2903 = vmatpush3.bf16.msra.mxu0 %v3091_v6  ;;  %v3095_v8 = vld [vmem:[%s4119_s0 + $0x328] sm:$0xff]  }
  0x75   :  { %2943 = vmatpush3.bf16.msra.mxu1 %v3092_v14  ;;  %1643 = vmatprep.mubr.bf16.mxu0 %v3401_v20  ;;  %v3098_v20 = vld [vmem:[%s4119_s0 + $0x3f0] sm:$0xff]  }
  0x76   :  { %2904 = vmatprep.subr.bf16.mxu0 %v3093_v15  ;;  %191 = vperm.xlu0 %2975, %v53_v7  }
  0x77   :  { %2944 = vmatprep.subr.bf16.mxu1 %v3094_v17  ;;  %1708 = vmatprep.mubr.bf16.mxu1 %v3408_v23  ;;  %v3099_v23 = vld [vmem:[%s4119_s0 + $0x330] sm:$0xff]  }
  0x78   :  { %2905 = vmatpush3.bf16.msra.mxu0 %v3095_v8 }
  0x79   :  { %2945 = vmatpush3.bf16.msra.mxu1 %v3096_v25  ;;  %2906 = vmatprep.subr.bf16.mxu0 %v3097_v26 }
  0x7a   :  { %2946 = vmatprep.subr.bf16.mxu1 %v3098_v20  ;;  %196 = vperm.xlu0 %2975, %v54_v27  }
  0x7b   :  { %1644 = vmatmul.mubr.bf16.gmra.mrb[44].mxu0 %v3406_v22  ;;  %v3102_v22 = vld [vmem:[%s4119_s0 + $0x3f8] sm:$0xff]  }
  0x7c   :  { %1709 = vmatmul.mubr.bf16.gmra.mrb[44].mxu1 %v3410_v24  ;;  %2907 = vmatpush3.bf16.msra.mxu0 %v3099_v23  ;;  %v55_v24 = vld [vmem:[%s4121_s2 + $0x10] sm:$0xff] }
  0x7d   :  { %1749 = vmatprep.mubr.bf16.mxu0 %v3448_v38  ;;  %2947 = vmatpush3.bf16.msra.mxu1 %v3100_v28  ;;  %v3104_v38 = vld [vmem:[%s4119_s0 + $0x3b8] sm:$0xff]  }
  0x7e   :  { %1814 = vmatprep.mubr.bf16.mxu1 %v3458_v44  ;;  %2908 = vmatprep.subr.bf16.mxu0 %v3101_v29  ;;  %v57_v44 = vld [vmem:[%s4121_s2 + $0x20] sm:$0xff] }
  0x7f   :  { %201 = vperm.xlu1 %2976, %v55_v24   ;;  %2948 = vmatprep.subr.bf16.mxu1 %v3102_v22 }
  0x80   :  { %2909 = vmatpush3.bf16.msra.mxu0 %v3103_v30  ;;  %211 = vperm.xlu0 %2975, %v57_v44  }
  0x81   :  { %2949 = vmatpush3.bf16.msra.mxu1 %v3104_v38 }
  0x83   :  { %206 = vperm.xlu1 %2976, %v56_v31   ;;  %1750 = vmatmul.mubr.bf16.vlgmr.msra.gmra.mrb[48].mxu0 %v3446_v35 }
  0x84   :  { %1815 = vmatmul.mubr.bf16.vlgmr.msra.gmra.mrb[48].mxu1 %v3456_v43  ;;  %1757 = vmatprep.mubr.bf16.mxu0 %v3500_v61 }
  0x85   :  { %1822 = vmatprep.mubr.bf16.mxu1 %v3502_v62  ;;  %221 = vperm.xlu0 %2975, %v59_v32  }
  0x87   :  { %216 = vperm.xlu1 %2976, %v58_v33  }
  0x8b   :  { %226 = vperm.xlu1 %2976, %v60_v34   ;;  %1758 = vmatmul.mubr.bf16.gmra.mrb[52].mxu0 %v3504_v63 }
  0x8c   :  { %1823 = vmatmul.mubr.bf16.gmra.mrb[52].mxu1 %v3506_v0  ;;  %1765 = vmatprep.mubr.bf16.mxu0 %v3545_v16 }
  0x8d   :  { %1830 = vmatprep.mubr.bf16.mxu1 %v3552_v19 }
  0x93   :  { %1766 = vmatmul.mubr.bf16.gmra.mrb[56].mxu0 %v3550_v18 }
  0x94   :  { %1831 = vmatmul.mubr.bf16.gmra.mrb[56].mxu1 %v3554_v21  ;;  %1773 = vmatprep.mubr.bf16.mxu0 %v3590_v41 }
  0x95   :  { %1838 = vmatprep.mubr.bf16.mxu1 %v3600_v47 }
  0x9b   :  { %1774 = vmatmul.mubr.bf16.gmra.mrb[60].mxu0 %v3598_v46 }
  0x9c   :  { %1839 = vmatmul.mubr.bf16.gmra.mrb[60].mxu1 %v3602_v48 }
  0xf5   :  { %v3784_v49 = vpop.permute.xlu0 %191 }
  0xf6   :  { %v2670_v35 = vpop.f32.mrb[0].mxu0 }
  0xf7   :  { %v2710_v43 = vpop.f32.mrb[0].mxu1  ;;  %v2671_v61 = vpop.f32.mrb[1].mxu0 }
  0xf8   :  { %v2672_v62 = vadd.f32 %v2671_v61, %v2670_v35  ;;  %v2711_v63 = vpop.f32.mrb[1].mxu1  ;;  %v2673_v0 = vpop.f32.mrb[2].mxu0 }
  0xf9   :  { %v2712_v16 = vadd.f32 %v2711_v63, %v2710_v43  ;;  %v2713_v19 = vpop.f32.mrb[2].mxu1  ;;  %v2674_v42 = vpop.f32.mrb[3].mxu0 }
  0xfa   :  { %v2675_v18 = vadd.f32 %v2674_v42, %v2673_v0  ;;  %v2714_v45 = vpop.f32.mrb[3].mxu1  ;;  %v808_v47 = vadd.f32 %v2672_v62, %v3784_v49  ;;  %v3787_v2 = vpop.permute.xlu0 %196 }
  0xfb   :  { %v2715_v21 = vadd.f32 %v2714_v45, %v2713_v19 }
  0xfc   :  { %v873_v57 = vadd.f32 %v2712_v16, %v808_v47  ;;  %v811_v3 = vadd.f32 %v2675_v18, %v3787_v2 }
  0xfe   :  { %v2676_v41 = vpop.f32.mrb[4].mxu0  ;;  %v876_v4 = vadd.f32 %v2715_v21, %v811_v3  ;;  %v3790_v36 = vpop.permute.xlu1 %201 }
  0xff   :  { %v2716_v46 = vpop.f32.mrb[4].mxu1  ;;  %v2677_v50 = vpop.f32.mrb[5].mxu0 }
 0x100   :  { %v2678_v48 = vadd.f32 %v2677_v50, %v2676_v41  ;;  %v2717_v52 = vpop.f32.mrb[5].mxu1  ;;  %v2679_v53 = vpop.f32.mrb[6].mxu0 }
 0x101   :  { %v2718_v58 = vadd.f32 %v2717_v52, %v2716_v46  ;;  %v2719_v59 = vpop.f32.mrb[6].mxu1  ;;  %v2680_v60 = vpop.f32.mrb[7].mxu0 }
 0x102   :  { %v2681_v1 = vadd.f32 %v2680_v60, %v2679_v53  ;;  %v2720_v37 = vpop.f32.mrb[7].mxu1  ;;  %v816_v39 = vadd.f32 %v2678_v48, %v3790_v36  ;;  %v3795_v5 = vpop.permute.xlu1 %206 }
 0x103   :  { %v2721_v40 = vadd.f32 %v2720_v37, %v2719_v59  ;;  %v3797_v6 = vpop.permute.xlu0 %211 }
 0x104   :  { %v3793_v11 = vadd.f32 %v2718_v58, %v816_v39  ;;  %v819_v14 = vadd.f32 %v2681_v1, %v3795_v5 }
 0x106   :  { %v2682_v9 = vpop.f32.mrb[8].mxu0  ;;  %v884_v26 = vadd.f32 %v2721_v40, %v819_v14  ;;  %v3803_v27 = vpop.permute.xlu1 %216 }
 0x107   :  { %v2722_v51 = vpop.f32.mrb[8].mxu1  ;;  %v2683_v55 = vpop.f32.mrb[9].mxu0 }
 0x108   :  { %v2723_v10 = vpop.f32.mrb[9].mxu1  ;;  %v2684_v12 = vadd.f32 %v2683_v55, %v2682_v9  ;;  %v2685_v56 = vpop.f32.mrb[10].mxu0 }
 0x109   :  { %v2724_v54 = vadd.f32 %v2723_v10, %v2722_v51  ;;  %v2725_v13 = vpop.f32.mrb[10].mxu1  ;;  %v2686_v17 = vpop.f32.mrb[11].mxu0 }
 0x10a   :  { %v824_v15 = vadd.f32 %v2684_v12, %v3797_v6  ;;  %v2726_v7 = vpop.f32.mrb[11].mxu1  ;;  %v2687_v8 = vadd.f32 %v2686_v17, %v2685_v56  ;;  %v3806_v29 = vpop.permute.xlu0 %221 }
 0x10b   :  { %v2727_v25 = vadd.f32 %v2726_v7, %v2725_v13  ;;  %v3811_v62 = vpop.permute.xlu1 %226 }
 0x10c   :  { %v3801_v20 = vadd.f32 %v2724_v54, %v824_v15  ;;  %v827_v23 = vadd.f32 %v2687_v8, %v3803_v27 }
 0x10e   :  { %v2688_v28 = vpop.f32.mrb[12].mxu0  ;;  %v3808_v22 = vadd.f32 %v2727_v25, %v827_v23 }
 0x10f   :  { %v2728_v24 = vpop.f32.mrb[12].mxu1  ;;  %v2689_v30 = vpop.f32.mrb[13].mxu0 }
 0x110   :  { %v2690_v38 = vadd.f32 %v2689_v30, %v2688_v28  ;;  %v2729_v31 = vpop.f32.mrb[13].mxu1  ;;  %v2691_v44 = vpop.f32.mrb[14].mxu0 }
 0x111   :  { %v2730_v32 = vadd.f32 %v2729_v31, %v2728_v24  ;;  %v2731_v33 = vpop.f32.mrb[14].mxu1  ;;  %v2692_v34 = vpop.f32.mrb[15].mxu0 }
 0x112   :  { %v832_v35 = vadd.f32 %v2690_v38, %v3806_v29  ;;  %v2693_v43 = vadd.f32 %v2692_v34, %v2691_v44  ;;  %v2732_v61 = vpop.f32.mrb[15].mxu1 }
 0x113   :  { %v2733_v63 = vadd.f32 %v2732_v61, %v2731_v33 }
 0x114   :  { %v3813_v0 = vadd.f32 %v2730_v32, %v832_v35  ;;  %v835_v16 = vadd.f32 %v2693_v43, %v3811_v62 }
 0x116   :  { %v3816_v19 = vadd.f32 %v2733_v63, %v835_v16  ;;  %v2750_v42 = vpop.f32.mrb[16].mxu0 }
 0x117   :  { %v2790_v18 = vpop.f32.mrb[16].mxu1  ;;  %v2751_v45 = vpop.f32.mrb[17].mxu0 }
 0x118   :  { %v2752_v21 = vadd.f32 %v2751_v45, %v2750_v42  ;;  %v2791_v41 = vpop.f32.mrb[17].mxu1  ;;  %v2753_v47 = vpop.f32.mrb[18].mxu0 }
 0x119   :  { %v2792_v46 = vadd.f32 %v2791_v41, %v2790_v18  ;;  %v2793_v50 = vpop.f32.mrb[18].mxu1  ;;  %v2754_v48 = vpop.f32.mrb[19].mxu0 }
 0x11a   :  { %v938_v52 = vadd.f32 %v2752_v21, %v873_v57  ;;  %v2755_v53 = vadd.f32 %v2754_v48, %v2753_v47  ;;  %v2794_v58 = vpop.f32.mrb[19].mxu1 }
 0x11b   :  { %v2795_v59 = vadd.f32 %v2794_v58, %v2793_v50 }
 0x11c   :  { %v941_v60 = vadd.f32 %v2755_v53, %v876_v4  ;;  %v1003_v1 = vadd.f32 %v2792_v46, %v938_v52 }
 0x11e   :  { %v1042_v37 = vsel %vm1033_vm0, %v1003_v1, 0.0  ;;  %1034 = vst.msk [vmem:[#allocation2] sm:$0xff] %vm1033_vm0, %v1003_v1  ;;  %v1006_v40 = vadd.f32 %v2795_v59, %v941_v60  ;;  %v2756_v3 = vpop.f32.mrb[20].mxu0 }
 0x11f   :  { %1043 = vadd.xlane.f32.xlu0 %v1042_v37  ;;  %v2796_v39 = vpop.f32.mrb[20].mxu1  ;;  %v2757_v51 = vpop.f32.mrb[21].mxu0 }
 0x120   :  { %v1045_v9 = vsel %vm1033_vm0, %v1006_v40, 0.0  ;;  %1035 = vst.msk [vmem:[#allocation2 + $0x8] sm:$0xff] %vm1033_vm0, %v1006_v40  ;;  %v2797_v57 = vpop.f32.mrb[21].mxu1  ;;  %v2758_v55 = vadd.f32 %v2757_v51, %v2756_v3  ;;  %v2759_v12 = vpop.f32.mrb[22].mxu0 }
 0x121   :  { %1046 = vadd.xlane.f32.xlu1 %v1045_v9  ;;  %v2798_v10 = vadd.f32 %v2797_v57, %v2796_v39  ;;  %v2799_v4 = vpop.f32.mrb[22].mxu1  ;;  %v2760_v54 = vpop.f32.mrb[23].mxu0 }
 0x122   :  { %v2800_v56 = vpop.f32.mrb[23].mxu1  ;;  %v946_v13 = vadd.f32 %v2758_v55, %v3793_v11  ;;  %v2761_v14 = vadd.f32 %v2760_v54, %v2759_v12 }
 0x123   :  { %v2801_v15 = vadd.f32 %v2800_v56, %v2799_v4 }
 0x124   :  { %v949_v17 = vadd.f32 %v2761_v14, %v884_v26  ;;  %v1011_v7 = vadd.f32 %v2798_v10, %v946_v13 }
 0x126   :  { %1036 = vst.msk [vmem:[#allocation2 + $0x10] sm:$0xff] %vm1033_vm0, %v1011_v7  ;;  %v1048_v8 = vsel %vm1033_vm0, %v1011_v7, 0.0  ;;  %v1014_v25 = vadd.f32 %v2801_v15, %v949_v17  ;;  %v2762_v23 = vpop.f32.mrb[24].mxu0 }
 0x127   :  { %1049 = vadd.xlane.f32.xlu0 %v1048_v8  ;;  %v2802_v28 = vpop.f32.mrb[24].mxu1  ;;  %v2763_v24 = vpop.f32.mrb[25].mxu0 }
 0x128   :  { %1037 = vst.msk [vmem:[#allocation2 + $0x18] sm:$0xff] %vm1033_vm0, %v1014_v25  ;;  %v2764_v30 = vadd.f32 %v2763_v24, %v2762_v23  ;;  %v2803_v38 = vpop.f32.mrb[25].mxu1  ;;  %v2765_v31 = vpop.f32.mrb[26].mxu0  ;;  %v1051_v26 = vsel %vm1033_vm0, %v1014_v25, 0.0 }
 0x129   :  { %v2804_v44 = vadd.f32 %v2803_v38, %v2802_v28  ;;  %v2805_v11 = vpop.f32.mrb[26].mxu1  ;;  %v2766_v32 = vpop.f32.mrb[27].mxu0 }
 0x12a   :  { %v954_v33 = vadd.f32 %v2764_v30, %v3801_v20  ;;  %v2767_v34 = vadd.f32 %v2766_v32, %v2765_v31  ;;  %v2806_v35 = vpop.f32.mrb[27].mxu1 }
 0x12b   :  { %1052 = vadd.xlane.f32.xlu0 %v1051_v26  ;;  %v2807_v43 = vadd.f32 %v2806_v35, %v2805_v11 }
 0x12c   :  { %v957_v61 = vadd.f32 %v2767_v34, %v3808_v22  ;;  %v1019_v63 = vadd.f32 %v2804_v44, %v954_v33 }
 0x12e   :  { %1038 = vst.msk [vmem:[#allocation2 + $0x20] sm:$0xff] %vm1033_vm0, %v1019_v63  ;;  %v1054_v16 = vsel %vm1033_vm0, %v1019_v63, 0.0  ;;  %v1022_v42 = vadd.f32 %v2807_v43, %v957_v61  ;;  %v2768_v18 = vpop.f32.mrb[28].mxu0 }
 0x12f   :  { %1055 = vadd.xlane.f32.xlu1 %v1054_v16  ;;  %v2808_v45 = vpop.f32.mrb[28].mxu1  ;;  %v2769_v21 = vpop.f32.mrb[29].mxu0 }
 0x130   :  { %1039 = vst.msk [vmem:[#allocation2 + $0x28] sm:$0xff] %vm1033_vm0, %v1022_v42  ;;  %v1057_v20 = vsel %vm1033_vm0, %v1022_v42, 0.0  ;;  %v2770_v41 = vadd.f32 %v2769_v21, %v2768_v18  ;;  %v2809_v47 = vpop.f32.mrb[29].mxu1  ;;  %v2771_v46 = vpop.f32.mrb[30].mxu0 }
 0x131   :  { %1058 = vadd.xlane.f32.xlu0 %v1057_v20  ;;  %v2810_v50 = vadd.f32 %v2809_v47, %v2808_v45  ;;  %v2811_v22 = vpop.f32.mrb[30].mxu1  ;;  %v2772_v48 = vpop.f32.mrb[31].mxu0 }
 0x132   :  { %v962_v52 = vadd.f32 %v2770_v41, %v3813_v0  ;;  %v2773_v53 = vadd.f32 %v2772_v48, %v2771_v46  ;;  %v2812_v58 = vpop.f32.mrb[31].mxu1 }
 0x133   :  { %v2813_v59 = vadd.f32 %v2812_v58, %v2811_v22 }
 0x134   :  { %v965_v60 = vadd.f32 %v2773_v53, %v3816_v19  ;;  %v1027_v1 = vadd.f32 %v2810_v50, %v962_v52 }
 0x136   :  { %1040 = vst.msk [vmem:[#allocation2 + $0x30] sm:$0xff] %vm1033_vm0, %v1027_v1  ;;  %v1060_v37 = vsel %vm1033_vm0, %v1027_v1, 0.0  ;;  %v1030_v40 = vadd.f32 %v2813_v59, %v965_v60  ;;  %v2830_v3 = vpop.f32.mrb[32].mxu0 }
 0x137   :  { %1061 = vadd.xlane.f32.xlu1 %v1060_v37  ;;  %v2870_v39 = vpop.f32.mrb[32].mxu1  ;;  %v2831_v9 = vpop.f32.mrb[33].mxu0 }
 0x138   :  { %1041 = vst.msk [vmem:[#allocation2 + $0x38] sm:$0xff] %vm1033_vm0, %v1030_v40  ;;  %v1063_v51 = vsel %vm1033_vm0, %v1030_v40, 0.0  ;;  %v2832_v0 = vadd.f32 %v2831_v9, %v2830_v3  ;;  %v2871_v57 = vpop.f32.mrb[33].mxu1  ;;  %v2833_v55 = vpop.f32.mrb[34].mxu0 }
 0x139   :  { %1064 = vadd.xlane.f32.xlu0 %v1063_v51  ;;  %v2872_v10 = vadd.f32 %v2871_v57, %v2870_v39  ;;  %v2873_v19 = vpop.f32.mrb[34].mxu1  ;;  %v2834_v12 = vpop.f32.mrb[35].mxu0 }
 0x13a   :  { %v1622_v4 = vadd.f32 %v2832_v0, %v3784_v49  ;;  %v2835_v54 = vadd.f32 %v2834_v12, %v2833_v55  ;;  %v2874_v56 = vpop.f32.mrb[35].mxu1 }
 0x13b   :  { %v2875_v13 = vadd.f32 %v2874_v56, %v2873_v19 }
 0x13c   :  { %v1687_v14 = vadd.f32 %v2872_v10, %v1622_v4  ;;  %v1625_v15 = vadd.f32 %v2835_v54, %v3787_v2 }
 0x13e   :  { %v1690_v17 = vadd.f32 %v2875_v13, %v1625_v15  ;;  %v2836_v7 = vpop.f32.mrb[36].mxu0 }
 0x13f   :  { %v2876_v8 = vpop.f32.mrb[36].mxu1  ;;  %v2837_v25 = vpop.f32.mrb[37].mxu0 }
 0x140   :  { %v2838_v23 = vadd.f32 %v2837_v25, %v2836_v7  ;;  %v2877_v28 = vpop.f32.mrb[37].mxu1  ;;  %v2839_v24 = vpop.f32.mrb[38].mxu0 }
 0x141   :  { %v2878_v30 = vadd.f32 %v2877_v28, %v2876_v8  ;;  %v2879_v38 = vpop.f32.mrb[38].mxu1  ;;  %v2840_v31 = vpop.f32.mrb[39].mxu0 }
 0x142   :  { %v1630_v44 = vadd.f32 %v2838_v23, %v3790_v36  ;;  %v2841_v11 = vadd.f32 %v2840_v31, %v2839_v24  ;;  %v2880_v49 = vpop.f32.mrb[39].mxu1 }
 0x143   :  { %v2881_v32 = vadd.f32 %v2880_v49, %v2879_v38 }
 0x144   :  { %v3842_v26 = vadd.f32 %v2878_v30, %v1630_v44  ;;  %v1633_v33 = vadd.f32 %v2841_v11, %v3795_v5 }
 0x146   :  { %v3845_v2 = vadd.f32 %v2881_v32, %v1633_v33  ;;  %v2842_v34 = vpop.f32.mrb[40].mxu0 }
 0x147   :  { %v2882_v35 = vpop.f32.mrb[40].mxu1  ;;  %v2843_v43 = vpop.f32.mrb[41].mxu0 }
 0x148   :  { %v2844_v61 = vadd.f32 %v2843_v43, %v2842_v34  ;;  %v2883_v63 = vpop.f32.mrb[41].mxu1  ;;  %v2845_v16 = vpop.f32.mrb[42].mxu0 }
 0x149   :  { %v2884_v42 = vadd.f32 %v2883_v63, %v2882_v35  ;;  %v2885_v18 = vpop.f32.mrb[42].mxu1  ;;  %v2846_v45 = vpop.f32.mrb[43].mxu0 }
 0x14a   :  { %v1638_v36 = vadd.f32 %v2844_v61, %v3797_v6  ;;  %v2847_v21 = vadd.f32 %v2846_v45, %v2845_v16  ;;  %v2886_v20 = vpop.f32.mrb[43].mxu1 }
 0x14b   :  { %v2887_v41 = vadd.f32 %v2886_v20, %v2885_v18 }
 0x14c   :  { %v3848_v47 = vadd.f32 %v2884_v42, %v1638_v36  ;;  %v1641_v5 = vadd.f32 %v2847_v21, %v3803_v27 }
 0x14e   :  { %v3851_v46 = vadd.f32 %v2887_v41, %v1641_v5  ;;  %v2848_v50 = vpop.f32.mrb[44].mxu0 }
 0x14f   :  { %v2888_v22 = vpop.f32.mrb[44].mxu1  ;;  %v2849_v48 = vpop.f32.mrb[45].mxu0 }
 0x150   :  { %v2850_v52 = vadd.f32 %v2849_v48, %v2848_v50  ;;  %v2889_v53 = vpop.f32.mrb[45].mxu1  ;;  %v2851_v58 = vpop.f32.mrb[46].mxu0 }
 0x151   :  { %v2890_v59 = vadd.f32 %v2889_v53, %v2888_v22  ;;  %v2891_v60 = vpop.f32.mrb[46].mxu1  ;;  %v2852_v1 = vpop.f32.mrb[47].mxu0 }
 0x152   :  { %v1646_v6 = vadd.f32 %v2850_v52, %v3806_v29  ;;  %v2853_v37 = vadd.f32 %v2852_v1, %v2851_v58  ;;  %v2892_v40 = vpop.f32.mrb[47].mxu1 }
 0x153   :  { %v2893_v3 = vadd.f32 %v2892_v40, %v2891_v60 }
 0x154   :  { %v3854_v39 = vadd.f32 %v2890_v59, %v1646_v6  ;;  %v1649_v27 = vadd.f32 %v2853_v37, %v3811_v62 }
 0x156   :  { %v3857_v9 = vadd.f32 %v2893_v3, %v1649_v27  ;;  %v2910_v51 = vpop.f32.mrb[48].mxu0 }
 0x157   :  { %v2950_v0 = vpop.f32.mrb[48].mxu1  ;;  %v2911_v57 = vpop.f32.mrb[49].mxu0 }
 0x158   :  { %v2912_v55 = vadd.f32 %v2911_v57, %v2910_v51  ;;  %v2951_v10 = vpop.f32.mrb[49].mxu1  ;;  %v2913_v19 = vpop.f32.mrb[50].mxu0 }
 0x159   :  { %v2952_v12 = vadd.f32 %v2951_v10, %v2950_v0  ;;  %v2953_v4 = vpop.f32.mrb[50].mxu1  ;;  %v2914_v54 = vpop.f32.mrb[51].mxu0 }
 0x15a   :  { %v1752_v56 = vadd.f32 %v2912_v55, %v1687_v14  ;;  %v2915_v29 = vadd.f32 %v2914_v54, %v2913_v19  ;;  %v2954_v13 = vpop.f32.mrb[51].mxu1 }
 0x15b   :  { %v2955_v15 = vadd.f32 %v2954_v13, %v2953_v4 }
 0x15c   :  { %v1755_v7 = vadd.f32 %v2915_v29, %v1690_v17  ;;  %v1817_v8 = vadd.f32 %v2952_v12, %v1752_v56 }
 0x15e   :  { %v2916_v25 = vpop.f32.mrb[52].mxu0  ;;  %1848 = vst.msk [vmem:[#allocation2 + $0x40] sm:$0xff] %vm1033_vm0, %v1817_v8  ;;  %v1856_v62 = vsel %vm1033_vm0, %v1817_v8, 0.0  ;;  %v1820_v23 = vadd.f32 %v2955_v15, %v1755_v7 }
 0x15f   :  { %v2917_v28 = vpop.f32.mrb[53].mxu0  ;;  %1857 = vadd.xlane.f32.xlu1 %v1856_v62  ;;  %v2956_v24 = vpop.f32.mrb[52].mxu1 }
 0x160   :  { %v2918_v30 = vadd.f32 %v2917_v28, %v2916_v25  ;;  %v2919_v38 = vpop.f32.mrb[54].mxu0  ;;  %v2957_v31 = vpop.f32.mrb[53].mxu1  ;;  %1849 = vst.msk [vmem:[#allocation2 + $0x48] sm:$0xff] %vm1033_vm0, %v1820_v23  ;;  %v1859_v14 = vsel %vm1033_vm0, %v1820_v23, 0.0 }
 0x161   :  { %v2920_v44 = vpop.f32.mrb[55].mxu0  ;;  %v2958_v11 = vadd.f32 %v2957_v31, %v2956_v24  ;;  %1860 = vadd.xlane.f32.xlu0 %v1859_v14  ;;  %v2959_v17 = vpop.f32.mrb[54].mxu1 }
 0x162   :  { %v1760_v49 = vadd.f32 %v2918_v30, %v3842_v26  ;;  %v2921_v32 = vadd.f32 %v2920_v44, %v2919_v38  ;;  %v2960_v33 = vpop.f32.mrb[55].mxu1  ;;  %v3887_v38 = vld [vmem:[#allocation2] sm:$0xff] }
 0x163   :  { %v2961_v34 = vadd.f32 %v2960_v33, %v2959_v17  ;;  %v3897_v17 = vld [vmem:[#allocation2 + $0x8] sm:$0xff] }
 0x164   :  { %v1763_v35 = vadd.f32 %v2921_v32, %v3845_v2  ;;  %v1825_v43 = vadd.f32 %v2958_v11, %v1760_v49 }
 0x165   :  { %v3889_v31 = vld [vmem:[#allocation2 + $0x40] sm:$0xff] }
 0x166   :  { %v2922_v61 = vpop.f32.mrb[56].mxu0  ;;  %1850 = vst.msk [vmem:[#allocation2 + $0x50] sm:$0xff] %vm1033_vm0, %v1825_v43  ;;  %v1862_v63 = vsel %vm1033_vm0, %v1825_v43, 0.0  ;;  %v1828_v16 = vadd.f32 %v2961_v34, %v1763_v35 }
 0x167   :  { %v2923_v42 = vpop.f32.mrb[57].mxu0  ;;  %1863 = vadd.xlane.f32.xlu1 %v1862_v63  ;;  %v2962_v18 = vpop.f32.mrb[56].mxu1  ;;  %v3899_v49 = vld [vmem:[#allocation2 + $0x48] sm:$0xff] }
 0x168   :  { %v2924_v45 = vadd.f32 %v2923_v42, %v2922_v61  ;;  %v2925_v36 = vpop.f32.mrb[58].mxu0  ;;  %v2963_v21 = vpop.f32.mrb[57].mxu1  ;;  %1851 = vst.msk [vmem:[#allocation2 + $0x58] sm:$0xff] %vm1033_vm0, %v1828_v16  ;;  %v1865_v26 = vsel %vm1033_vm0, %v1828_v16, 0.0 }
 0x169   :  { %v2926_v20 = vpop.f32.mrb[59].mxu0  ;;  %v2964_v41 = vadd.f32 %v2963_v21, %v2962_v18  ;;  %1866 = vadd.xlane.f32.xlu0 %v1865_v26  ;;  %v2965_v2 = vpop.f32.mrb[58].mxu1  ;;  %v3909_v26 = vld [vmem:[#allocation2 + $0x10] sm:$0xff] }
 0x16a   :  { %v1768_v5 = vadd.f32 %v2924_v45, %v3848_v47  ;;  %v2927_v50 = vadd.f32 %v2926_v20, %v2925_v36  ;;  %v2966_v22 = vpop.f32.mrb[59].mxu1 }
 0x16b   :  { %v2967_v48 = vadd.f32 %v2966_v22, %v2965_v2  ;;  %v3920_v22 = vld [vmem:[#allocation2 + $0x18] sm:$0xff] }
 0x16c   :  { %v1771_v52 = vadd.f32 %v2927_v50, %v3851_v46  ;;  %v1833_v53 = vadd.f32 %v2964_v41, %v1768_v5 }
 0x16d   :  { %v3911_v20 = vld [vmem:[#allocation2 + $0x50] sm:$0xff] }
 0x16e   :  { %v2928_v58 = vpop.f32.mrb[60].mxu0  ;;  %1852 = vst.msk [vmem:[#allocation2 + $0x60] sm:$0xff] %vm1033_vm0, %v1833_v53  ;;  %v1868_v59 = vsel %vm1033_vm0, %v1833_v53, 0.0  ;;  %v1836_v60 = vadd.f32 %v2967_v48, %v1771_v52 }
 0x16f   :  { %v2929_v1 = vpop.f32.mrb[61].mxu0  ;;  %1869 = vadd.xlane.f32.xlu1 %v1868_v59  ;;  %v2968_v6 = vpop.f32.mrb[60].mxu1  ;;  %v3922_v48 = vld [vmem:[#allocation2 + $0x58] sm:$0xff] }
 0x170   :  { %v2930_v37 = vadd.f32 %v2929_v1, %v2928_v58  ;;  %v2931_v40 = vpop.f32.mrb[62].mxu0  ;;  %v2969_v3 = vpop.f32.mrb[61].mxu1  ;;  %1853 = vst.msk [vmem:[#allocation2 + $0x68] sm:$0xff] %vm1033_vm0, %v1836_v60  ;;  %v1871_v47 = vsel %vm1033_vm0, %v1836_v60, 0.0 }
 0x171   :  { %v2932_v27 = vpop.f32.mrb[63].mxu0  ;;  %v2970_v51 = vadd.f32 %v2969_v3, %v2968_v6  ;;  %1872 = vadd.xlane.f32.xlu0 %v1871_v47  ;;  %v2971_v46 = vpop.f32.mrb[62].mxu1 }
 0x172   :  { %v1776_v0 = vadd.f32 %v2930_v37, %v3854_v39  ;;  %v2933_v57 = vadd.f32 %v2932_v27, %v2931_v40  ;;  %v2972_v55 = vpop.f32.mrb[63].mxu1 }
 0x173   :  { %v2973_v10 = vadd.f32 %v2972_v55, %v2971_v46 }
 0x174   :  { %v1779_v19 = vadd.f32 %v2933_v57, %v3857_v9  ;;  %v1841_v12 = vadd.f32 %v2970_v51, %v1776_v0  ;;  %v3933_v0 = vld [vmem:[#allocation2 + $0x20] sm:$0xff] }
 0x175   :  { %v3935_v57 = vld [vmem:[#allocation2 + $0x60] sm:$0xff] }
 0x176   :  { %1854 = vst.msk [vmem:[#allocation2 + $0x70] sm:$0xff] %vm1033_vm0, %v1841_v12  ;;  %v1874_v4 = vsel %vm1033_vm0, %v1841_v12, 0.0  ;;  %v1844_v54 = vadd.f32 %v2973_v10, %v1779_v19 }
 0x177   :  { %1875 = vadd.xlane.f32.xlu1 %v1874_v4  ;;  %v3944_v4 = vld [vmem:[#allocation2 + $0x28] sm:$0xff] }
 0x178   :  { %1855 = vst.msk [vmem:[#allocation2 + $0x78] sm:$0xff] %vm1033_vm0, %v1844_v54  ;;  %v1877_v56 = vsel %vm1033_vm0, %v1844_v54, 0.0  ;;  %v3946_v54 = vld [vmem:[#allocation2 + $0x68] sm:$0xff] }
 0x179   :  { %1878 = vadd.xlane.f32.xlu0 %v1877_v56 }
 0x1ac   :  { %v1044_v29 = vpop.xlane.xlu0 %1043 }
 0x1ae   :  { %v1047_v39 = vpop.xlane.xlu1 %1046 }
 0x1b4   :  { %v1050_v13 = vpop.xlane.xlu0 %1049 }
 0x1b8   :  { %v1053_v15 = vpop.xlane.xlu0 %1052 }
 0x1bc   :  { %v1056_v7 = vpop.xlane.xlu1 %1055 }
 0x1be   :  { %v1059_v8 = vpop.xlane.xlu0 %1058 }
 0x1c4   :  { %v3881_v25 = vpop.xlane.xlu1 %1061 }
 0x1c6   :  { %v3883_v9 = vpop.xlane.xlu0 %1064 }
 0x1ec   :  { %v1858_v62 = vpop.xlane.xlu1 %1857 }
 0x1ed   :  { %v1880_v23 = vadd.f32 %v1858_v62, %v1044_v29 }
 0x1ee   :  { %v1861_v28 = vpop.xlane.xlu0 %1860 }
 0x1ef   :  { %v3885_v24 = vmul.f32 0.125, %v1880_v23  ;;  %v1881_v30 = vadd.f32 %v1861_v28, %v1047_v39 }
 0x1f1   :  { %v3891_v14 = vmul.f32 0.125, %v1881_v30  ;;  %v1904_v44 = vsub.f32 %v3887_v38, %v3885_v24  ;;  %v1960_v11 = vsub.f32 %v3889_v31, %v3885_v24 }
 0x1f3   :  { %v1912_v32 = vmul.f32 %v1904_v44, %v1904_v44  ;;  %v1905_v33 = vsub.f32 %v3897_v17, %v3891_v14  ;;  %v1961_v34 = vsub.f32 %v3899_v49, %v3891_v14  ;;  %v1968_v16 = vmul.f32 %v1960_v11, %v1960_v11 }
 0x1f4   :  { %v1864_v35 = vpop.xlane.xlu1 %1863 }
 0x1f5   :  { %v1882_v43 = vadd.f32 %v1864_v35, %v1050_v13  ;;  %v1920_v61 = vsel %vm1033_vm0, %v1912_v32, 0.0  ;;  %v1913_v63 = vmul.f32 %v1905_v33, %v1905_v33  ;;  %v1969_v21 = vmul.f32 %v1961_v34, %v1961_v34  ;;  %v3959_v33 = vld [vmem:[#allocation2 + $0x30] sm:$0xff] }
 0x1f6   :  { %v1867_v42 = vpop.xlane.xlu0 %1866  ;;  %1921 = vadd.xlane.f32.xlu1 %v1920_v61  ;;  %v1976_v2 = vsel %vm1033_vm0, %v1968_v16, 0.0  ;;  %v3961_v34 = vld [vmem:[#allocation2 + $0x70] sm:$0xff] }
 0x1f7   :  { %v3906_v18 = vmul.f32 0.125, %v1882_v43  ;;  %v1883_v45 = vadd.f32 %v1867_v42, %v1053_v15  ;;  %v1923_v36 = vsel %vm1033_vm0, %v1913_v63, 0.0  ;;  %v1979_v52 = vsel %vm1033_vm0, %v1969_v21, 0.0  ;;  %v3972_v63 = vld [vmem:[#allocation2 + $0x78] sm:$0xff] }
 0x1f8   :  { %1924 = vadd.xlane.f32.xlu0 %v1923_v36 }
 0x1f9   :  { %v3913_v41 = vmul.f32 0.125, %v1883_v45  ;;  %v1906_v5 = vsub.f32 %v3909_v26, %v3906_v18  ;;  %v1962_v50 = vsub.f32 %v3911_v20, %v3906_v18 }
 0x1fa   :  { %1977 = vadd.xlane.f32.xlu1 %v1976_v2 }
 0x1fb   :  { %v1914_v53 = vmul.f32 %v1906_v5, %v1906_v5  ;;  %v1907_v58 = vsub.f32 %v3920_v22, %v3913_v41  ;;  %v1963_v59 = vsub.f32 %v3922_v48, %v3913_v41  ;;  %v1970_v40 = vmul.f32 %v1962_v50, %v1962_v50 }
 0x1fc   :  { %v1870_v60 = vpop.xlane.xlu1 %1869  ;;  %1980 = vadd.xlane.f32.xlu0 %v1979_v52 }
 0x1fd   :  { %v1884_v1 = vadd.f32 %v1870_v60, %v1056_v7  ;;  %v1926_v6 = vsel %vm1033_vm0, %v1914_v53, 0.0  ;;  %v1915_v37 = vmul.f32 %v1907_v58, %v1907_v58  ;;  %v1971_v46 = vmul.f32 %v1963_v59, %v1963_v59 }
 0x1fe   :  { %v1873_v3 = vpop.xlane.xlu0 %1872  ;;  %1927 = vadd.xlane.f32.xlu1 %v1926_v6  ;;  %v1982_v10 = vsel %vm1033_vm0, %v1970_v40, 0.0 }
 0x1ff   :  { %v3930_v47 = vmul.f32 0.125, %v1884_v1  ;;  %v1885_v27 = vadd.f32 %v1873_v3, %v1059_v8  ;;  %v1929_v51 = vsel %vm1033_vm0, %v1915_v37, 0.0  ;;  %v1985_v56 = vsel %vm1033_vm0, %v1971_v46, 0.0 }
 0x200   :  { %1930 = vadd.xlane.f32.xlu0 %v1929_v51 }
 0x201   :  { %v3937_v55 = vmul.f32 0.125, %v1885_v27  ;;  %v1908_v19 = vsub.f32 %v3933_v0, %v3930_v47  ;;  %v1964_v12 = vsub.f32 %v3935_v57, %v3930_v47 }
 0x202   :  { %1983 = vadd.xlane.f32.xlu1 %v1982_v10 }
 0x203   :  { %v1916_v29 = vmul.f32 %v1908_v19, %v1908_v19  ;;  %v1909_v13 = vsub.f32 %v3944_v4, %v3937_v55  ;;  %v1965_v39 = vsub.f32 %v3946_v54, %v3937_v55  ;;  %v1972_v23 = vmul.f32 %v1964_v12, %v1964_v12 }
 0x204   :  { %v1876_v15 = vpop.xlane.xlu1 %1875  ;;  %1986 = vadd.xlane.f32.xlu0 %v1985_v56 }
 0x205   :  { %v1886_v7 = vadd.f32 %v1876_v15, %v3881_v25  ;;  %v1932_v8 = vsel %vm1033_vm0, %v1916_v29, 0.0  ;;  %v1917_v62 = vmul.f32 %v1909_v13, %v1909_v13  ;;  %v1973_v32 = vmul.f32 %v1965_v39, %v1965_v39 }
 0x206   :  { %v1879_v28 = vpop.xlane.xlu0 %1878  ;;  %1933 = vadd.xlane.f32.xlu1 %v1932_v8  ;;  %v1988_v25 = vsel %vm1033_vm0, %v1972_v23, 0.0 }
 0x207   :  { %v3955_v30 = vmul.f32 0.125, %v1886_v7  ;;  %v1887_v44 = vadd.f32 %v1879_v28, %v3883_v9  ;;  %v1935_v11 = vsel %vm1033_vm0, %v1917_v62, 0.0  ;;  %v3970_v9 = vld [vmem:[#allocation2 + $0x38] sm:$0xff]  ;;  %v1991_v16 = vsel %vm1033_vm0, %v1973_v32, 0.0  ;;  %v2032_v28 = vld [vmem:[%s4122_s3] sm:$0xff] }
 0x208   :  { %1936 = vadd.xlane.f32.xlu0 %v1935_v11 }
 0x209   :  { %v3963_v35 = vmul.f32 0.125, %v1887_v44  ;;  %v1910_v43 = vsub.f32 %v3959_v33, %v3955_v30  ;;  %v1966_v61 = vsub.f32 %v3961_v34, %v3955_v30 }
 0x20a   :  { %1989 = vadd.xlane.f32.xlu1 %v1988_v25  ;;  %v2033_v25 = vld [vmem:[%s4122_s3 + $0x8] sm:$0xff] }
 0x20b   :  { %v1918_v42 = vmul.f32 %v1910_v43, %v1910_v43  ;;  %v1911_v45 = vsub.f32 %v3970_v9, %v3963_v35  ;;  %v1967_v36 = vsub.f32 %v3972_v63, %v3963_v35  ;;  %v1974_v5 = vmul.f32 %v1966_v61, %v1966_v61 }
 0x20c   :  { %1992 = vadd.xlane.f32.xlu0 %v1991_v16 }
 0x20d   :  { %v1938_v21 = vsel %vm1033_vm0, %v1918_v42, 0.0  ;;  %v1919_v2 = vmul.f32 %v1911_v45, %v1911_v45  ;;  %v1975_v52 = vmul.f32 %v1967_v36, %v1967_v36  ;;  %v1994_v53 = vsel %vm1033_vm0, %v1974_v5, 0.0 }
 0x20e   :  { %1939 = vadd.xlane.f32.xlu1 %v1938_v21 }
 0x20f   :  { %v1941_v50 = vsel %vm1033_vm0, %v1919_v2, 0.0  ;;  %v1997_v58 = vsel %vm1033_vm0, %v1975_v52, 0.0  ;;  %v2049_v52 = vld [vmem:[%s4123_s4 + $0x8] sm:$0xff] }
 0x210   :  { %1942 = vadd.xlane.f32.xlu0 %v1941_v50 }
 0x212   :  { %1995 = vadd.xlane.f32.xlu1 %v1994_v53  ;;  %v2048_v53 = vld [vmem:[%s4123_s4] sm:$0xff] }
 0x214   :  { %1998 = vadd.xlane.f32.xlu0 %v1997_v58 }
 0x283   :  { %v1922_v59 = vpop.xlane.xlu1 %1921 }
 0x285   :  { %v1925_v60 = vpop.xlane.xlu0 %1924 }
 0x287   :  { %v1978_v1 = vpop.xlane.xlu1 %1977 }
 0x288   :  { %v2000_v6 = vadd.f32 %v1978_v1, %v1922_v59 }
 0x289   :  { %v1981_v37 = vpop.xlane.xlu0 %1980 }
 0x28a   :  { %v2008_v40 = vmul.f32 0.125, %v2000_v6  ;;  %v2001_v3 = vadd.f32 %v1981_v37, %v1925_v60 }
 0x28b   :  { %v1928_v27 = vpop.xlane.xlu1 %1927 }
 0x28c   :  { %v2016_v51 = vadd.f32 1e-05, %v2008_v40  ;;  %v2009_v46 = vmul.f32 0.125, %v2001_v3 }
 0x28d   :  { %v1931_v10 = vpop.xlane.xlu0 %1930 }
 0x28e   :  { %3105 = vrsqrt.f32 %v2016_v51  ;;  %v2017_v19 = vadd.f32 1e-05, %v2009_v46 }
 0x28f   :  { %v1984_v12 = vpop.xlane.xlu1 %1983 }
 0x290   :  { %3107 = vrsqrt.f32 %v2017_v19  ;;  %v2002_v56 = vadd.f32 %v1984_v12, %v1928_v27  ;;  %v2035_v27 = vld [vmem:[%s4122_s3 + $0x18] sm:$0xff]  ;;  %v2050_v12 = vld [vmem:[%s4123_s4 + $0x10] sm:$0xff] }
 0x291   :  { %v1987_v29 = vpop.xlane.xlu0 %1986 }
 0x292   :  { %v2010_v13 = vmul.f32 0.125, %v2002_v56  ;;  %v2003_v39 = vadd.f32 %v1987_v29, %v1931_v10 }
 0x293   :  { %v1934_v15 = vpop.xlane.xlu1 %1933 }
 0x294   :  { %v2018_v7 = vadd.f32 1e-05, %v2010_v13  ;;  %v2011_v8 = vmul.f32 0.125, %v2003_v39 }
 0x295   :  { %v1937_v62 = vpop.xlane.xlu0 %1936 }
 0x296   :  { %3109 = vrsqrt.f32 %v2018_v7  ;;  %v2019_v23 = vadd.f32 1e-05, %v2011_v8  ;;  %v2036_v8 = vld [vmem:[%s4122_s3 + $0x20] sm:$0xff] }
 0x297   :  { %v1990_v44 = vpop.xlane.xlu1 %1989 }
 0x298   :  { %v3106_v11 = vpop.eup %3105  ;;  %3111 = vrsqrt.f32 %v2019_v23  ;;  %v2004_v32 = vadd.f32 %v1990_v44, %v1934_v15 }
 0x299   :  { %v1993_v43 = vpop.xlane.xlu0 %1992  ;;  %v2040_v61 = vmul.f32 %v3106_v11, %v2032_v28  ;;  %v2037_v28 = vld [vmem:[%s4122_s3 + $0x28] sm:$0xff] }
 0x29a   :  { %v3108_v16 = vpop.eup %3107  ;;  %v2012_v42 = vmul.f32 0.125, %v2004_v32  ;;  %v2005_v45 = vadd.f32 %v1993_v43, %v1937_v62  ;;  %v2052_v32 = vld [vmem:[%s4123_s4 + $0x20] sm:$0xff] }
 0x29b   :  { %2074 = vperm.xlu1 %2976, %v2040_v61   ;;  %v1940_v36 = vpop.xlane.xlu1 %1939  ;;  %v2041_v21 = vmul.f32 %v3108_v16, %v2033_v25  ;;  %v2056_v2 = vmul.f32 %v2040_v61, %v3885_v24  ;;  %v2034_v24 = vld [vmem:[%s4122_s3 + $0x10] sm:$0xff] }
 0x29c   :  { %v2020_v5 = vadd.f32 1e-05, %v2012_v42  ;;  %v2013_v50 = vmul.f32 0.125, %v2005_v45  ;;  %v2038_v16 = vld [vmem:[%s4122_s3 + $0x30] sm:$0xff] }
 0x29d   :  { %2079 = vperm.xlu0 %2975, %v2041_v21   ;;  %v1943_v58 = vpop.xlane.xlu0 %1942  ;;  %v2057_v59 = vmul.f32 %v2041_v21, %v3891_v14  ;;  %v2064_v37 = vsub.f32 %v2048_v53, %v2056_v2  ;;  %v2039_v21 = vld [vmem:[%s4122_s3 + $0x38] sm:$0xff] }
 0x29e   :  { %3113 = vrsqrt.f32 %v2020_v5  ;;  %v2021_v60 = vadd.f32 1e-05, %v2013_v50  ;;  %v2054_v5 = vld [vmem:[%s4123_s4 + $0x30] sm:$0xff] }
 0x29f   :  { %v1996_v1 = vpop.xlane.xlu1 %1995  ;;  %v2065_v6 = vsub.f32 %v2049_v52, %v2057_v59  ;;  %v2055_v59 = vld [vmem:[%s4123_s4 + $0x38] sm:$0xff] }
 0x2a0   :  { %v3110_v40 = vpop.eup %3109  ;;  %3115 = vrsqrt.f32 %v2021_v60  ;;  %v2006_v3 = vadd.f32 %v1996_v1, %v1940_v36  ;;  %v2053_v36 = vld [vmem:[%s4123_s4 + $0x28] sm:$0xff] }
 0x2a1   :  { %v1999_v51 = vpop.xlane.xlu0 %1998  ;;  %2127 = vperm.xlu1 %2976, %v2065_v6   ;;  %2122 = vperm.xlu0 %2975, %v2064_v37   ;;  %v2042_v14 = vmul.f32 %v3110_v40, %v2034_v24 }
 0x2a2   :  { %v3112_v46 = vpop.eup %3111  ;;  %v2014_v10 = vmul.f32 0.125, %v2006_v3  ;;  %v2007_v19 = vadd.f32 %v1999_v51, %v1943_v58 }
 0x2a3   :  { %v2058_v56 = vmul.f32 %v2042_v14, %v3906_v18  ;;  %v2043_v29 = vmul.f32 %v3112_v46, %v2035_v27  ;;  %v2051_v18 = vld [vmem:[%s4123_s4 + $0x18] sm:$0xff] }
 0x2a4   :  { %v2022_v13 = vadd.f32 1e-05, %v2014_v10  ;;  %v2015_v39 = vmul.f32 0.125, %v2007_v19 }
 0x2a5   :  { %2084 = vperm.xlu1 %2976, %v2042_v14   ;;  %v2066_v15 = vsub.f32 %v2050_v12, %v2058_v56  ;;  %v2059_v62 = vmul.f32 %v2043_v29, %v3913_v41 }
 0x2a6   :  { %3117 = vrsqrt.f32 %v2022_v13  ;;  %v2023_v7 = vadd.f32 1e-05, %v2015_v39 }
 0x2a7   :  { %2132 = vperm.xlu0 %2975, %v2066_v15   ;;  %v2067_v25 = vsub.f32 %v2051_v18, %v2059_v62 }
 0x2a8   :  { %v3114_v23 = vpop.eup %3113  ;;  %3119 = vrsqrt.f32 %v2023_v7 }
 0x2a9   :  { %2089 = vperm.xlu1 %2976, %v2043_v29   ;;  %v2044_v44 = vmul.f32 %v3114_v23, %v2036_v8 }
 0x2aa   :  { %v3116_v11 = vpop.eup %3115 }
 0x2ab   :  { %2094 = vperm.xlu0 %2975, %v2044_v44   ;;  %v2060_v41 = vmul.f32 %v2044_v44, %v3930_v47  ;;  %v2045_v43 = vmul.f32 %v3116_v11, %v2037_v28 }
 0x2ad   :  { %2137 = vperm.xlu1 %2976, %v2067_v25   ;;  %v2068_v61 = vsub.f32 %v2052_v32, %v2060_v41  ;;  %v2061_v42 = vmul.f32 %v2045_v43, %v3937_v55 }
 0x2af   :  { %2142 = vperm.xlu0 %2975, %v2068_v61   ;;  %v2069_v50 = vsub.f32 %v2053_v36, %v2061_v42 }
 0x2b0   :  { %v3118_v45 = vpop.eup %3117 }
 0x2b1   :  { %2099 = vperm.xlu1 %2976, %v2045_v43   ;;  %v2046_v47 = vmul.f32 %v3118_v45, %v2038_v16 }
 0x2b2   :  { %v3120_v2 = vpop.eup %3119 }
 0x2b3   :  { %2104 = vperm.xlu0 %2975, %v2046_v47   ;;  %v2062_v55 = vmul.f32 %v2046_v47, %v3955_v30  ;;  %v2047_v52 = vmul.f32 %v3120_v2, %v2039_v21 }
 0x2b5   :  { %2147 = vperm.xlu1 %2976, %v2069_v50   ;;  %v2070_v53 = vsub.f32 %v2054_v5, %v2062_v55  ;;  %v2063_v58 = vmul.f32 %v2047_v52, %v3963_v35 }
 0x2b7   :  { %2152 = vperm.xlu0 %2975, %v2070_v53   ;;  %v2071_v60 = vsub.f32 %v2055_v59, %v2063_v58 }
 0x2b9   :  { %2109 = vperm.xlu1 %2976, %v2047_v52  }
 0x2bd   :  { %2157 = vperm.xlu1 %2976, %v2071_v60  }
 0x31a   :  { %v2075_v24 = vpop.permute.xlu1 %2074 }
 0x31b   :  { %v2112_v6 = vmul.f32 %v2075_v24, %v3887_v38  ;;  %v2241_v37 = vmul.f32 %v2075_v24, %v3889_v31 }
 0x31c   :  { %v2080_v1 = vpop.permute.xlu0 %2079 }
 0x31d   :  { %v2113_v30 = vmul.f32 %v2080_v1, %v3897_v17  ;;  %v2242_v40 = vmul.f32 %v2080_v1, %v3899_v49 }
 0x320   :  { %v2123_v3 = vpop.permute.xlu0 %2122  ;;  %v2128_v27 = vpop.permute.xlu1 %2127 }
 0x321   :  { %v2160_v35 = vadd.f32 %v2123_v3, %v2112_v6  ;;  %v2249_v51 = vadd.f32 %v2241_v37, %v2123_v3  ;;  %v2161_v14 = vadd.f32 %v2128_v27, %v2113_v30  ;;  %v2250_v46 = vadd.f32 %v2242_v40, %v2128_v27 }
 0x323   :  { %vm2168_vm2 = vcmp.ge.f32.partialorder %v2160_v35, 0.0  ;;  %v2176_v10 = vmul.f32 0.2, %v2160_v35  ;;  %vm2257_vm3 = vcmp.ge.f32.partialorder %v2249_v51, 0.0  ;;  %v2265_v19 = vmul.f32 0.2, %v2249_v51 }
 0x324   :  { %vm2169_vm4 = vcmp.ge.f32.partialorder %v2161_v14, 0.0  ;;  %v2177_v12 = vmul.f32 0.2, %v2161_v14  ;;  %vm2258_vm5 = vcmp.ge.f32.partialorder %v2250_v46, 0.0  ;;  %v2266_v38 = vmul.f32 0.2, %v2250_v46  ;;  %v2085_v31 = vpop.permute.xlu1 %2084 }
 0x325   :  { %v2184_v56 = vsel %vm2168_vm2, %v2160_v35, %v2176_v10  ;;  %v2273_v17 = vsel %vm2257_vm3, %v2249_v51, %v2265_v19  ;;  %v2114_v49 = vmul.f32 %v2085_v31, %v3909_v26  ;;  %v2243_v29 = vmul.f32 %v2085_v31, %v3911_v20 }
 0x326   :  { %v2638_v13 = vpack.c.bf16 %v2184_v56, %v2184_v56  ;;  %v2646_v39 = vpack.c.bf16 %v2273_v17, %v2273_v17  ;;  %v2185_v15 = vsel %vm2169_vm4, %v2161_v14, %v2177_v12  ;;  %v2274_v7 = vsel %vm2258_vm5, %v2250_v46, %v2266_v38  ;;  %v2133_v8 = vpop.permute.xlu0 %2132 }
 0x327   :  { %v2639_v62 = vpack.c.bf16 %v2185_v15, %v2185_v15  ;;  %v2647_v23 = vpack.c.bf16 %v2274_v7, %v2274_v7  ;;  %v2162_v18 = vadd.f32 %v2133_v8, %v2114_v49  ;;  %v2251_v28 = vadd.f32 %v2243_v29, %v2133_v8 }
 0x328   :  { %2225 = vst.msk [vmem:[%s4124_s5] sm:$0xf] %vm2224_vm1, %v2638_v13  ;;  %2630 = vst.msk [vmem:[%s4124_s5 + $0x20] sm:$0xf] %vm2224_vm1, %v2646_v39  ;;  %v2090_v26 = vpop.permute.xlu1 %2089 }
 0x329   :  { %2226 = vst.msk [vmem:[%s4124_s5 + $0x4] sm:$0xf] %vm2224_vm1, %v2639_v62  ;;  %2631 = vst.msk [vmem:[%s4124_s5 + $0x24] sm:$0xf] %vm2224_vm1, %v2647_v23  ;;  %vm2170_vm6 = vcmp.ge.f32.partialorder %v2162_v18, 0.0  ;;  %vm2259_vm7 = vcmp.ge.f32.partialorder %v2251_v28, 0.0  ;;  %v2115_v41 = vmul.f32 %v2090_v26, %v3920_v22  ;;  %v2244_v43 = vmul.f32 %v2090_v26, %v3922_v48 }
 0x32a   :  { %v2178_v20 = vmul.f32 0.2, %v2162_v18  ;;  %v2267_v44 = vmul.f32 0.2, %v2251_v28  ;;  %v2095_v11 = vpop.permute.xlu0 %2094 }
 0x32b   :  { %v2116_v21 = vmul.f32 %v2095_v11, %v3933_v0  ;;  %v2245_v22 = vmul.f32 %v2095_v11, %v3935_v57 }
 0x32c   :  { %v2186_v32 = vsel %vm2170_vm6, %v2162_v18, %v2178_v20  ;;  %v2275_v25 = vsel %vm2259_vm7, %v2251_v28, %v2267_v44  ;;  %v2138_v42 = vpop.permute.xlu1 %2137 }
 0x32d   :  { %v2640_v61 = vpack.c.bf16 %v2186_v32, %v2186_v32  ;;  %v2648_v16 = vpack.c.bf16 %v2275_v25, %v2275_v25  ;;  %v2163_v45 = vadd.f32 %v2138_v42, %v2115_v41  ;;  %v2252_v36 = vadd.f32 %v2244_v43, %v2138_v42 }
 0x32e   :  { %v2143_v48 = vpop.permute.xlu0 %2142 }
 0x32f   :  { %2227 = vst.msk [vmem:[%s4124_s5 + $0x8] sm:$0xf] %vm2224_vm1, %v2640_v61  ;;  %2632 = vst.msk [vmem:[%s4124_s5 + $0x28] sm:$0xf] %vm2224_vm1, %v2648_v16  ;;  %vm2171_vm8 = vcmp.ge.f32.partialorder %v2163_v45, 0.0  ;;  %vm2260_vm9 = vcmp.ge.f32.partialorder %v2252_v36, 0.0  ;;  %v2164_v5 = vadd.f32 %v2143_v48, %v2116_v21  ;;  %v2253_v50 = vadd.f32 %v2245_v22, %v2143_v48 }
 0x330   :  { %v2179_v47 = vmul.f32 0.2, %v2163_v45  ;;  %v2268_v2 = vmul.f32 0.2, %v2252_v36  ;;  %v2100_v55 = vpop.permute.xlu1 %2099 }
 0x331   :  { %vm2172_vm10 = vcmp.ge.f32.partialorder %v2164_v5, 0.0  ;;  %v2180_v60 = vmul.f32 0.2, %v2164_v5  ;;  %vm2261_vm11 = vcmp.ge.f32.partialorder %v2253_v50, 0.0  ;;  %v2269_v1 = vmul.f32 0.2, %v2253_v50 }
 0x332   :  { %v2187_v52 = vsel %vm2171_vm8, %v2163_v45, %v2179_v47  ;;  %v2276_v53 = vsel %vm2260_vm9, %v2252_v36, %v2268_v2  ;;  %v2105_v24 = vpop.permute.xlu0 %2104  ;;  %v2117_v0 = vmul.f32 %v2100_v55, %v3944_v4  ;;  %v2246_v57 = vmul.f32 %v2100_v55, %v3946_v54 }
 0x333   :  { %v2641_v58 = vpack.c.bf16 %v2187_v52, %v2187_v52  ;;  %v2649_v59 = vpack.c.bf16 %v2276_v53, %v2276_v53  ;;  %v2188_v6 = vsel %vm2172_vm10, %v2164_v5, %v2180_v60  ;;  %v2277_v40 = vsel %vm2261_vm11, %v2253_v50, %v2269_v1 }
 0x334   :  { %v2148_v37 = vpop.permute.xlu1 %2147  ;;  %v2642_v30 = vpack.c.bf16 %v2188_v6, %v2188_v6  ;;  %v2650_v35 = vpack.c.bf16 %v2277_v40, %v2277_v40  ;;  %v2118_v4 = vmul.f32 %v2105_v24, %v3959_v33  ;;  %v2247_v54 = vmul.f32 %v2105_v24, %v3961_v34 }
 0x335   :  { %2228 = vst.msk [vmem:[%s4124_s5 + $0xc] sm:$0xf] %vm2224_vm1, %v2641_v58  ;;  %2633 = vst.msk [vmem:[%s4124_s5 + $0x2c] sm:$0xf] %vm2224_vm1, %v2649_v59  ;;  %v2165_v3 = vadd.f32 %v2148_v37, %v2117_v0  ;;  %v2254_v27 = vadd.f32 %v2246_v57, %v2148_v37 }
 0x336   :  { %v2153_v51 = vpop.permute.xlu0 %2152  ;;  %2229 = vst.msk [vmem:[%s4124_s5 + $0x10] sm:$0xf] %vm2224_vm1, %v2642_v30  ;;  %2634 = vst.msk [vmem:[%s4124_s5 + $0x30] sm:$0xf] %vm2224_vm1, %v2650_v35 }
 0x337   :  { %vm2173_vm12 = vcmp.ge.f32.partialorder %v2165_v3, 0.0  ;;  %v2181_v14 = vmul.f32 0.2, %v2165_v3  ;;  %vm2262_vm13 = vcmp.ge.f32.partialorder %v2254_v27, 0.0  ;;  %v2270_v46 = vmul.f32 0.2, %v2254_v27 }
 0x338   :  { %v2166_v10 = vadd.f32 %v2153_v51, %v2118_v4  ;;  %v2255_v19 = vadd.f32 %v2247_v54, %v2153_v51  ;;  %v2110_v33 = vpop.permute.xlu1 %2109 }
 0x339   :  { %v2189_v12 = vsel %vm2173_vm12, %v2165_v3, %v2181_v14  ;;  %v2278_v34 = vsel %vm2262_vm13, %v2254_v27, %v2270_v46  ;;  %v2119_v49 = vmul.f32 %v2110_v33, %v3970_v9  ;;  %v2248_v29 = vmul.f32 %v2110_v33, %v3972_v63 }
 0x33a   :  { %v2643_v38 = vpack.c.bf16 %v2189_v12, %v2189_v12  ;;  %v2651_v31 = vpack.c.bf16 %v2278_v34, %v2278_v34  ;;  %vm2174_vm14 = vcmp.ge.f32.partialorder %v2166_v10, 0.0  ;;  %v2182_v56 = vmul.f32 0.2, %v2166_v10 }
 0x33b   :  { %vm2263_vm15 = vcmp.ge.f32.partialorder %v2255_v19, 0.0  ;;  %v2271_v17 = vmul.f32 0.2, %v2255_v19 }
 0x33c   :  { %2230 = vst.msk [vmem:[%s4124_s5 + $0x14] sm:$0xf] %vm2224_vm1, %v2643_v38  ;;  %2635 = vst.msk [vmem:[%s4124_s5 + $0x34] sm:$0xf] %vm2224_vm1, %v2651_v31  ;;  %v2190_v13 = vsel %vm2174_vm14, %v2166_v10, %v2182_v56  ;;  %v2158_v39 = vpop.permute.xlu1 %2157 }
 0x33d   :  { %v2644_v15 = vpack.c.bf16 %v2190_v13, %v2190_v13  ;;  %v2279_v7 = vsel %vm2263_vm15, %v2255_v19, %v2271_v17  ;;  %v2167_v8 = vadd.f32 %v2158_v39, %v2119_v49  ;;  %v2256_v62 = vadd.f32 %v2248_v29, %v2158_v39 }
 0x33e   :  { %v2652_v23 = vpack.c.bf16 %v2279_v7, %v2279_v7 }
 0x33f   :  { %2231 = vst.msk [vmem:[%s4124_s5 + $0x18] sm:$0xf] %vm2224_vm1, %v2644_v15  ;;  %vm2175_vm0 = vcmp.ge.f32.partialorder %v2167_v8, 0.0  ;;  %v2183_v9 = vmul.f32 0.2, %v2167_v8  ;;  %vm2264_vm2 = vcmp.ge.f32.partialorder %v2256_v62, 0.0 }
 0x340   :  { %v2272_v63 = vmul.f32 0.2, %v2256_v62  ;;  %2636 = vst.msk [vmem:[%s4124_s5 + $0x38] sm:$0xf] %vm2224_vm1, %v2652_v23 }
 0x341   :  { %v2191_v18 = vsel %vm2175_vm0, %v2167_v8, %v2183_v9 }
 0x342   :  { %v2280_v28 = vsel %vm2264_vm2, %v2256_v62, %v2272_v63  ;;  %v2645_v26 = vpack.c.bf16 %v2191_v18, %v2191_v18 }
 0x343   :  { %v2653_v20 = vpack.c.bf16 %v2280_v28, %v2280_v28 }
 0x344   :  { %2232 = vst.msk [vmem:[%s4124_s5 + $0x1c] sm:$0xf] %vm2224_vm1, %v2645_v26 }
 0x345   :  { %2637 = vst.msk [vmem:[%s4124_s5 + $0x3c] sm:$0xf] %vm2224_vm1, %v2653_v20 }

</bundles_post_ra>
